<compile_context>
chip_gen: v6e
topology: v6e:2x2x1
jax: 0.10.0
libtpu: 0.0.40
codegen_flags: <defaults>
</compile_context>

<pallas_src>
import functools

import jax
import jax.numpy as jnp
from jax import lax
from jax.experimental import pallas as pl
from jax.experimental.pallas import tpu as pltpu

BN_EPS = 1e-5
_LANE = 128


def _round_up(x, m):
    return (x + m - 1) // m * m


def _vmem_budget_bytes():
    """Per-generation scoped-VMEM budget (~half of physical, capped)."""
    cap = 64 * 1024 * 1024          # conservative fallback (v7x-sized)
    try:
        info = pltpu.get_tpu_info()
        cap = int(getattr(info, "vmem_capacity_bytes", cap))
    except Exception:
        pass
    return max(16 * 1024 * 1024, min(cap // 2, 96 * 1024 * 1024))


# ----------------------------- Pallas kernels ------------------------------

def _conv_stats_mm_kernel(p_ref, w_ref, o_ref, stats_ref):
    """conv-as-matmul (bf16 in, f32 acc), bf16 out + per-tile BN sum/sumsq."""
    y = jnp.dot(p_ref[...], w_ref[...], preferred_element_type=jnp.float32)
    o_ref[...] = y.astype(o_ref.dtype)
    s = jnp.sum(y, axis=0, keepdims=True)
    ss = jnp.sum(y * y, axis=0, keepdims=True)
    stats_ref[0] = jnp.concatenate([s, ss], axis=0)   # per-step slot, no RMW


def _conv_s1_stats_kernel(x_ref, w_ref, mask_ref, o_ref, stats_ref, g_ref, *,
                          wp, h, chunk_h, cin):
    """3x3 / stride-1 conv over one image.

    For each row-chunk: gather the 9 taps of the flattened padded image into a
    contiguous (rows, 9*cin) bf16 VMEM scratch, run a single MXU matmul with
    f32 result, take masked BN sum/sumsq from the f32 values, store bf16.
    """
    cp = o_ref.shape[-1]
    s_acc = jnp.zeros((1, cp), jnp.float32)
    ss_acc = jnp.zeros((1, cp), jnp.float32)
    for h0 in range(0, h, chunk_h):                   # static, usually 1 chunk
        hc = min(chunk_h, h - h0)
        rows = hc * wp
        r0 = h0 * wp
        for t in range(9):                            # static tap offsets
            di, dj = divmod(t, 3)
            src0 = (h0 + di + 1) * wp + dj - 1
            g_ref[0:rows, t * cin:(t + 1) * cin] = x_ref[0, src0:src0 + rows, :]
        y = jnp.dot(g_ref[0:rows, :], w_ref[...],
                    preferred_element_type=jnp.float32)
        o_ref[0, r0:r0 + rows, :] = y.astype(o_ref.dtype)
        ym = y * mask_ref[r0:r0 + rows, :]            # zero the width-pad cols
        s_acc = s_acc + jnp.sum(ym, axis=0, keepdims=True)
        ss_acc = ss_acc + jnp.sum(ym * y, axis=0, keepdims=True)
    stats_ref[0] = jnp.concatenate([s_acc, ss_acc], axis=0)


def _bn_apply_kernel(y_ref, sc_ref, sh_ref, o_ref, *, relu):
    y = y_ref[0].astype(jnp.float32) * sc_ref[...] + sh_ref[...]
    if relu:
        y = jnp.maximum(y, 0.0)
    o_ref[0] = y.astype(o_ref.dtype)


def _bn_apply_res_kernel(y_ref, sc_ref, sh_ref, r_ref, o_ref, *, relu):
    y = (y_ref[0].astype(jnp.float32) * sc_ref[...] + sh_ref[...]
         + r_ref[0].astype(jnp.float32))
    if relu:
        y = jnp.maximum(y, 0.0)
    o_ref[0] = y.astype(o_ref.dtype)


# ------------------------------ kernel wrappers -----------------------------

def conv_stats_mm(patches, w_mat, cp, budget):
    """Tiled conv-as-matmul + per-tile BN stats (fully 'parallel' grid)."""
    M, K = patches.shape
    cout = w_mat.shape[1]
    Kp = _round_up(K, 8)
    per_row = 2 * 2 * (Kp + cp) + 4 * cp          # dbuf bf16 in/out + f32 temp
    tm = max(8, min(2048, ((budget // 2) // per_row) // 8 * 8))
    tm = min(tm, _round_up(M, 8))
    Mp = _round_up(M, tm)
    nt = Mp // tm

    p = jnp.pad(patches.astype(jnp.bfloat16), ((0, Mp - M), (0, Kp - K)))
    w = jnp.pad(w_mat.astype(jnp.bfloat16), ((0, Kp - K), (0, cp - cout)))

    conv, stats = pl.pallas_call(
        _conv_stats_mm_kernel,
        out_shape=(jax.ShapeDtypeStruct((Mp, cp), jnp.bfloat16),
                   jax.ShapeDtypeStruct((nt, 2, cp), jnp.float32)),
        grid=(nt,),
        in_specs=[pl.BlockSpec((tm, Kp), lambda i: (i, 0)),
                  pl.BlockSpec((Kp, cp), lambda i: (0, 0))],
        out_specs=(pl.BlockSpec((tm, cp), lambda i: (i, 0)),
                   pl.BlockSpec((1, 2, cp), lambda i: (i, 0, 0))),
        compiler_params=pltpu.CompilerParams(
            dimension_semantics=("parallel",),
            vmem_limit_bytes=budget),
    )(p, w)
    return conv, stats, Mp, tm


def conv_s1_stats(x_nhwc, w_oihw, cp, budget):
    """3x3 / stride 1 / pad 1 conv + per-image BN stats, in-kernel tap gather."""
    N, H, W, Cin = x_nhwc.shape
    cout = w_oihw.shape[0]
    Wp = W + 2
    out_rows = H * Wp
    flat_len = (H + 4) * Wp

    # Pad rows (2,2) and cols (1,1) once: the (1,1) is the conv padding, the
    # extra row each side gives the flattened tap slices their +-Wp slack.
    xp = jnp.pad(x_nhwc.astype(jnp.bfloat16),
                 ((0, 0), (2, 2), (1, 1), (0, 0))).reshape(N, flat_len, Cin)

    w9 = jnp.transpose(w_oihw, (2, 3, 1, 0)).reshape(9 * Cin, cout)
    w9 = jnp.pad(w9, ((0, 0), (0, cp - cout))).astype(jnp.bfloat16)

    col = jnp.arange(out_rows) % Wp               # mask off the pad columns
    mask = ((col != 0) & (col != Wp - 1)).astype(jnp.float32).reshape(out_rows, 1)

    # Bound the tap-gather scratch by chunking image rows inside the kernel.
    per_h = Wp * (9 * Cin * 2 + cp * 4 + cp * 2)
    chunk_h = max(1, min(H, (budget // 8) // per_h))
    g_rows = _round_up(chunk_h * Wp, 8)

    kernel = functools.partial(_conv_s1_stats_kernel, wp=Wp, h=H,
                               chunk_h=chunk_h, cin=Cin)
    conv, stats = pl.pallas_call(
        kernel,
        out_shape=(jax.ShapeDtypeStruct((N, out_rows, cp), jnp.bfloat16),
                   jax.ShapeDtypeStruct((N, 2, cp), jnp.float32)),
        grid=(N,),
        in_specs=[pl.BlockSpec((1, flat_len, Cin), lambda n: (n, 0, 0)),
                  pl.BlockSpec((9 * Cin, cp), lambda n: (0, 0)),
                  pl.BlockSpec((out_rows, 1), lambda n: (0, 0))],
        out_specs=(pl.BlockSpec((1, out_rows, cp), lambda n: (n, 0, 0)),
                   pl.BlockSpec((1, 2, cp), lambda n: (n, 0, 0))),
        scratch_shapes=[pltpu.VMEM((g_rows, 9 * Cin), jnp.bfloat16)],
        compiler_params=pltpu.CompilerParams(
            dimension_semantics=("parallel",),
            vmem_limit_bytes=budget),
    )(xp, w9, mask)
    return conv, stats, Wp


def bn_scale_shift(stats, count, gamma, beta, cp):
    """Fold batch mean/var (single-pass f32 sum/sumsq) + gamma/beta."""
    c = gamma.shape[0]
    mean = stats[0] / count
    var = jnp.maximum(stats[1] / count - mean * mean, 0.0)   # biased variance
    g = jnp.zeros((cp,), jnp.float32).at[:c].set(gamma.astype(jnp.float32))
    b = jnp.zeros((cp,), jnp.float32).at[:c].set(beta.astype(jnp.float32))
    scale = g * lax.rsqrt(var + BN_EPS)
    shift = b - mean * scale
    return scale.reshape(1, cp), shift.reshape(1, cp)


def bn_apply(y3d, scale, shift, *, residual=None, relu=False,
             out_dtype=jnp.float32, budget=None):
    """Parallel tiled apply pass: y*scale + shift (+ residual) (+ ReLU)."""
    NB, R, Cp = y3d.shape
    tile = lambda g: (g, 0, 0)
    vec = lambda g: (0, 0)
    inputs = [y3d, scale, shift]
    in_specs = [pl.BlockSpec((1, R, Cp), tile),
                pl.BlockSpec((1, Cp), vec),
                pl.BlockSpec((1, Cp), vec)]
    if residual is not None:
        inputs.append(residual)
        in_specs.append(pl.BlockSpec((1, R, Cp), tile))
        kernel = functools.partial(_bn_apply_res_kernel, relu=relu)
    else:
        kernel = functools.partial(_bn_apply_kernel, relu=relu)
    return pl.pallas_call(
        kernel,
        out_shape=jax.ShapeDtypeStruct((NB, R, Cp), out_dtype),
        grid=(NB,),
        in_specs=in_specs,
        out_specs=pl.BlockSpec((1, R, Cp), tile),
        compiler_params=pltpu.CompilerParams(
            dimension_semantics=("parallel",),
            vmem_limit_bytes=budget),
    )(*inputs)


# ------------------------------- JAX glue ----------------------------------

def im2col(x_nhwc, kh, kw, stride, pad):
    x = jnp.pad(x_nhwc, ((0, 0), (pad, pad), (pad, pad), (0, 0)))
    N, Hp, Wpad, C = x.shape
    Ho = (Hp - kh) // stride + 1
    Wo = (Wpad - kw) // stride + 1
    taps = [x[:, i:i + stride * Ho:stride, j:j + stride * Wo:stride, :]
            for i in range(kh) for j in range(kw)]
    patches = jnp.stack(taps, axis=-2).reshape(N * Ho * Wo, kh * kw * C)
    return patches, Ho, Wo


def to_matmul_weight(w_oihw):
    cout, cin, kh, kw = w_oihw.shape
    return jnp.transpose(w_oihw, (2, 3, 1, 0)).reshape(kh * kw * cin, cout)


def _convblock_mm(patches_bf16, count, w_oihw, gamma, beta, cp, *,
                  relu, out_dtype, budget):
    conv, stats, mp, tm = conv_stats_mm(patches_bf16, to_matmul_weight(w_oihw),
                                        cp, budget)
    scale, shift = bn_scale_shift(jnp.sum(stats, axis=0), count, gamma, beta, cp)
    y = bn_apply(conv.reshape(mp // tm, tm, cp), scale, shift,
                 relu=relu, out_dtype=out_dtype, budget=budget)
    return y.reshape(mp, cp)


def residual_block_forward(x_nchw, params, in_channels, out_channels):
    projection = in_channels != out_channels
    stride = 2 if projection else 1
    budget = _vmem_budget_bytes()
    x = jnp.transpose(x_nchw, (0, 2, 3, 1))                        # NHWC
    N, H, W, _ = x.shape
    cp = _round_up(out_channels, _LANE)
    # NOTE: conv biases are intentionally dropped — BatchNorm's mean
    # subtraction cancels them exactly, so they are dead compute.

    # ---- c1: 3x3, stride, pad 1 -> BN -> ReLU ----
    if stride == 1:
        Ho, Wo = H, W
        conv1, st1, Wp1 = conv_s1_stats(x, params["c1_w"], cp, budget)
        sc1, sh1 = bn_scale_shift(jnp.sum(st1, axis=0), N * Ho * Wo,
                                  params["c1_gamma"], params["c1_beta"], cp)
        f = bn_apply(conv1, sc1, sh1, relu=True,
                     out_dtype=jnp.bfloat16, budget=budget)
        f = f.reshape(N, Ho, Wp1, cp)[:, :, 1:1 + W, :out_channels]
    else:
        # TODO(synk): extend the in-kernel tap gather to strided taps so the
        # stride-2 conv also avoids wrapper im2col.
        p1, Ho, Wo = im2col(x.astype(jnp.bfloat16), 3, 3, 2, 1)
        f = _convblock_mm(p1, N * Ho * Wo, params["c1_w"],
                          params["c1_gamma"], params["c1_beta"], cp,
                          relu=True, out_dtype=jnp.bfloat16, budget=budget)
        f = f[:N * Ho * Wo, :out_channels].reshape(N, Ho, Wo, out_channels)

    # ---- projection shortcut: 1x1, stride 2, pad 0 -> BN ----
    if projection:
        xs = x.astype(jnp.bfloat16)[:, ::2, ::2, :]     # 1x1/stride-2 "im2col"
        pp = xs.reshape(N * Ho * Wo, in_channels)
        xr = _convblock_mm(pp, N * Ho * Wo, params["p_w"],
                           params["p_gamma"], params["p_beta"], cp,
                           relu=False, out_dtype=jnp.bfloat16, budget=budget)
        xr = xr[:N * Ho * Wo, :].reshape(N, Ho, Wo, cp)   # padded channels == 0
        res = jnp.pad(xr, ((0, 0), (0, 0), (1, 1), (0, 0)))
    else:
        res = jnp.pad(x.astype(jnp.bfloat16),
                      ((0, 0), (0, 0), (1, 1), (0, cp - out_channels)))
    Wp2 = Wo + 2
    res = res.reshape(N, Ho * Wp2, cp)

    # ---- c2: 3x3, stride 1, pad 1 -> BN, fused residual add + ReLU ----
    conv2, st2, _ = conv_s1_stats(f, params["c2_w"], cp, budget)
    sc2, sh2 = bn_scale_shift(jnp.sum(st2, axis=0), N * Ho * Wo,
                              params["c2_gamma"], params["c2_beta"], cp)
    h = bn_apply(conv2, sc2, sh2, residual=res, relu=True,
                 out_dtype=jnp.float32, budget=budget)
    h = h.reshape(N, Ho, Wp2, cp)[:, :, 1:1 + Wo, :out_channels]
    return jnp.transpose(h, (0, 3, 1, 2))                # back to NCHW


# ------------------------- pure-JAX reference check -------------------------

def _conv_ref(x_nchw, w, b, stride, pad):
    y = lax.conv_general_dilated(
        x_nchw, w, (stride, stride), [(pad, pad), (pad, pad)],
        dimension_numbers=("NCHW", "OIHW", "NCHW"))
    return y + b.reshape(1, -1, 1, 1)


def _bn_ref(y, gamma, beta):
    mean = jnp.mean(y, axis=(0, 2, 3), keepdims=True)
    var = jnp.mean((y - mean) ** 2, axis=(0, 2, 3), keepdims=True)
    return ((y - mean) * lax.rsqrt(var + BN_EPS)
            * gamma.reshape(1, -1, 1, 1) + beta.reshape(1, -1, 1, 1))


def _residual_block_ref(x, p, in_ch, out_ch):
    projection = in_ch != out_ch
    stride = 2 if projection else 1
    f = jnp.maximum(_bn_ref(_conv_ref(x, p["c1_w"], p["c1_b"], stride, 1),
                            p["c1_gamma"], p["c1_beta"]), 0.0)
    f = _bn_ref(_conv_ref(f, p["c2_w"], p["c2_b"], 1, 1),
                p["c2_gamma"], p["c2_beta"])
    if projection:
        x = _bn_ref(_conv_ref(x, p["p_w"], p["p_b"], 2, 0),
                    p["p_gamma"], p["p_beta"])
    return jnp.maximum(f + x, 0.0)


# ---------------------------------- main ------------------------------------

def _make_params(key, in_ch, out_ch):
    ks = jax.random.split(key, 12)

    def winit(k, shape, s=0.1):
        return (s * jax.random.normal(k, shape)).astype(jnp.float32)

    def ginit(k, n):
        return (1.0 + 0.1 * jax.random.normal(k, (n,))).astype(jnp.float32)

    return {
        "c1_w": winit(ks[0], (out_ch, in_ch, 3, 3)),
        "c1_b": winit(ks[1], (out_ch,)),
        "c1_gamma": ginit(ks[2], out_ch),
        "c1_beta": winit(ks[3], (out_ch,)),
        "c2_w": winit(ks[4], (out_ch, out_ch, 3, 3)),
        "c2_b": winit(ks[5], (out_ch,)),
        "c2_gamma": ginit(ks[6], out_ch),
        "c2_beta": winit(ks[7], (out_ch,)),
        "p_w": winit(ks[8], (out_ch, in_ch, 1, 1)),
        "p_b": winit(ks[9], (out_ch,)),
        "p_gamma": ginit(ks[10], out_ch),
        "p_beta": winit(ks[11], (out_ch,)),
    }


if __name__ == "__main__":
    fwd = jax.jit(residual_block_forward, static_argnums=(2, 3))
    key = jax.random.PRNGKey(0)
    k1, k2, kx1, kx2 = jax.random.split(key, 4)

    # Case 1: projection block (in != out -> stride-2 c1 + 1x1 stride-2 shortcut)
    in_ch, out_ch, N, H, W = 4, 8, 2, 16, 16
    params1 = _make_params(k1, in_ch, out_ch)
    x1 = jax.random.normal(kx1, (N, in_ch, H, W), dtype=jnp.float32)
    out1 = jax.block_until_ready(fwd(x1, params1, in_ch, out_ch))
    ref1 = jax.block_until_ready(_residual_block_ref(x1, params1, in_ch, out_ch))
    assert out1.shape == (N, out_ch, H // 2, W // 2), out1.shape
    err1 = float(jnp.max(jnp.abs(out1 - ref1)))
    # bf16 MXU inputs + bf16 intermediates vs an all-f32 reference.
    assert jnp.allclose(out1, ref1, atol=6e-2, rtol=6e-2), err1

    # Case 2: identity block (in == out -> stride-1 in-kernel tap-gather path)
    ch2 = 8
    params2 = _make_params(k2, ch2, ch2)
    x2 = jax.random.normal(kx2, (N, ch2, H, W), dtype=jnp.float32)
    out2 = jax.block_until_ready(fwd(x2, params2, ch2, ch2))
    ref2 = jax.block_until_ready(_residual_block_ref(x2, params2, ch2, ch2))
    assert out2.shape == (N, ch2, H, W), out2.shape
    err2 = float(jnp.max(jnp.abs(out2 - ref2)))
    assert jnp.allclose(out2, ref2, atol=6e-2, rtol=6e-2), err2

    print("KERNEL_OK")
</pallas_src>

<mosaic_0001>
module attributes {stable_mosaic.version = 11 : i64} {
  func.func @_conv_stats_mm_kernel(%arg0: i32, %arg1: memref<128x40xbf16, #tpu.memory_space<vmem>>, %arg2: memref<40x128xbf16, #tpu.memory_space<vmem>>, %arg3: memref<128x128xbf16, #tpu.memory_space<vmem>>, %arg4: memref<1x2x128xf32, #tpu.memory_space<vmem>>) attributes {dimension_semantics = [#tpu.dimension_semantics<parallel>], iteration_bounds = array<i64: 1>, scalar_prefetch = 0 : i64, scratch_operands = 0 : i64, tpu.core_type = #tpu.core_type<tc>, window_params = [{transform_indices = @transform_0, window_bounds = array<i64: 128, 40>}, {pipeline_mode = #tpu.pipeline_mode<synchronous>, transform_indices = @transform_1, window_bounds = array<i64: 40, 128>}, {transform_indices = @transform_2, window_bounds = array<i64: 128, 128>}, {transform_indices = @transform_3, window_bounds = array<i64: 1, 2, 128>}]} {
    %c0 = arith.constant 0 : index
    %c0_0 = arith.constant 0 : index
    %0 = vector.load %arg1[%c0, %c0_0] : memref<128x40xbf16, #tpu.memory_space<vmem>>, vector<128x40xbf16>
    %c0_1 = arith.constant 0 : index
    %c0_2 = arith.constant 0 : index
    %1 = vector.load %arg2[%c0_1, %c0_2] : memref<40x128xbf16, #tpu.memory_space<vmem>>, vector<40x128xbf16>
    %cst = arith.constant dense<0.000000e+00> : vector<128x128xf32>
    %2 = tpu.matmul %0, %1, %cst {dimension_numbers = #tpu.dot_dimension_numbers<[1], [0], [0], [1], [0, 0, 1, 1], [], []>} : vector<128x40xbf16>, vector<40x128xbf16>, vector<128x128xf32> -> vector<128x128xf32>
    %3 = arith.truncf %2 : vector<128x128xf32> to vector<128x128xbf16>
    %c0_3 = arith.constant 0 : index
    %c0_4 = arith.constant 0 : index
    %4 = vector.load %arg3[%c0_3, %c0_4] : memref<128x128xbf16, #tpu.memory_space<vmem>>, vector<128x128xbf16>
    tpu.vector_store %arg3[%c0_3, %c0_4], %3 {strides = array<i32>} : memref<128x128xbf16, #tpu.memory_space<vmem>>, vector<128x128xbf16>,
    %cst_5 = arith.constant dense<0.000000e+00> : vector<128xf32>
    %5 = vector.multi_reduction <add>, %2, %cst_5 [0] : vector<128x128xf32> to vector<128xf32>
    %6 = vector.shape_cast %5 : vector<128xf32> to vector<1x128xf32>
    %7 = arith.mulf %2, %2 : vector<128x128xf32>
    %cst_6 = arith.constant dense<0.000000e+00> : vector<128xf32>
    %8 = vector.multi_reduction <add>, %7, %cst_6 [0] : vector<128x128xf32> to vector<128xf32>
    %9 = vector.shape_cast %8 : vector<128xf32> to vector<1x128xf32>
    %10 = tpu.concatenate %6, %9 in 0 : vector<1x128xf32>, vector<1x128xf32> -> vector<2x128xf32>
    %c0_7 = arith.constant 0 : index
    %c0_8 = arith.constant 0 : index
    %c0_9 = arith.constant 0 : index
    %11 = vector.load %arg4[%c0_7, %c0_8, %c0_9] : memref<1x2x128xf32, #tpu.memory_space<vmem>>, vector<1x2x128xf32>
    %12 = vector.shape_cast %11 : vector<1x2x128xf32> to vector<2x128xf32>
    %13 = vector.shape_cast %10 : vector<2x128xf32> to vector<1x2x128xf32>
    tpu.vector_store %arg4[%c0_7, %c0_8, %c0_9], %13 {strides = array<i32>} : memref<1x2x128xf32, #tpu.memory_space<vmem>>, vector<1x2x128xf32>,
    return
  }
  func.func @transform_0(%arg0: i32) -> (i32, i32) {
    %c0_i32 = arith.constant 0 : i32
    %c0_i32_0 = arith.constant 0 : i32
    return %arg0, %c0_i32 : i32, i32
  }
  func.func @transform_1(%arg0: i32) -> (i32, i32) {
    %c0_i32 = arith.constant 0 : i32
    %c0_i32_0 = arith.constant 0 : i32
    %c0_i32_1 = arith.constant 0 : i32
    return %c0_i32, %c0_i32_0 : i32, i32
  }
  func.func @transform_2(%arg0: i32) -> (i32, i32) {
    %c0_i32 = arith.constant 0 : i32
    %c0_i32_0 = arith.constant 0 : i32
    return %arg0, %c0_i32 : i32, i32
  }
  func.func @transform_3(%arg0: i32) -> (i32, i32, i32) {
    %c0_i32 = arith.constant 0 : i32
    %c0_i32_0 = arith.constant 0 : i32
    %c0_i32_1 = arith.constant 0 : i32
    return %arg0, %c0_i32, %c0_i32_0 : i32, i32, i32
  }
}

module attributes {stable_mosaic.version = 11 : i64} {
  func.func @_bn_apply_kernel(%arg0: i32, %arg1: memref<1x128x128xbf16, #tpu.memory_space<vmem>>, %arg2: memref<1x128xf32, #tpu.memory_space<vmem>>, %arg3: memref<1x128xf32, #tpu.memory_space<vmem>>, %arg4: memref<1x128x128xbf16, #tpu.memory_space<vmem>>) attributes {dimension_semantics = [#tpu.dimension_semantics<parallel>], iteration_bounds = array<i64: 1>, scalar_prefetch = 0 : i64, scratch_operands = 0 : i64, tpu.core_type = #tpu.core_type<tc>, window_params = [{transform_indices = @transform_0, window_bounds = array<i64: 1, 128, 128>}, {pipeline_mode = #tpu.pipeline_mode<synchronous>, transform_indices = @transform_1, window_bounds = array<i64: 1, 128>}, {pipeline_mode = #tpu.pipeline_mode<synchronous>, transform_indices = @transform_2, window_bounds = array<i64: 1, 128>}, {transform_indices = @transform_3, window_bounds = array<i64: 1, 128, 128>}]} {
    %c0 = arith.constant 0 : index
    %c0_0 = arith.constant 0 : index
    %c0_1 = arith.constant 0 : index
    %0 = vector.load %arg1[%c0, %c0_0, %c0_1] : memref<1x128x128xbf16, #tpu.memory_space<vmem>>, vector<1x128x128xbf16>
    %1 = vector.shape_cast %0 : vector<1x128x128xbf16> to vector<128x128xbf16>
    %2 = arith.extf %1 : vector<128x128xbf16> to vector<128x128xf32>
    %c0_2 = arith.constant 0 : index
    %c0_3 = arith.constant 0 : index
    %3 = vector.load %arg2[%c0_2, %c0_3] : memref<1x128xf32, #tpu.memory_space<vmem>>, vector<1x128xf32>
    %4 = vector.broadcast %3 : vector<1x128xf32> to vector<128x128xf32>
    %5 = arith.mulf %2, %4 : vector<128x128xf32>
    %c0_4 = arith.constant 0 : index
    %c0_5 = arith.constant 0 : index
    %6 = vector.load %arg3[%c0_4, %c0_5] : memref<1x128xf32, #tpu.memory_space<vmem>>, vector<1x128xf32>
    %7 = vector.broadcast %6 : vector<1x128xf32> to vector<128x128xf32>
    %8 = arith.addf %5, %7 : vector<128x128xf32>
    %cst = arith.constant 0.000000e+00 : f32
    %9 = vector.broadcast %cst : f32 to vector<128x128xf32>
    %10 = arith.maximumf %8, %9 : vector<128x128xf32>
    %11 = arith.truncf %10 : vector<128x128xf32> to vector<128x128xbf16>
    %c0_6 = arith.constant 0 : index
    %c0_7 = arith.constant 0 : index
    %c0_8 = arith.constant 0 : index
    %12 = vector.load %arg4[%c0_6, %c0_7, %c0_8] : memref<1x128x128xbf16, #tpu.memory_space<vmem>>, vector<1x128x128xbf16>
    %13 = vector.shape_cast %12 : vector<1x128x128xbf16> to vector<128x128xbf16>
    %14 = vector.shape_cast %11 : vector<128x128xbf16> to vector<1x128x128xbf16>
    tpu.vector_store %arg4[%c0_6, %c0_7, %c0_8], %14 {strides = array<i32>} : memref<1x128x128xbf16, #tpu.memory_space<vmem>>, vector<1x128x128xbf16>,
    return
  }
  func.func @transform_0(%arg0: i32) -> (i32, i32, i32) {
    %c0_i32 = arith.constant 0 : i32
    %c0_i32_0 = arith.constant 0 : i32
    %c0_i32_1 = arith.constant 0 : i32
    return %arg0, %c0_i32, %c0_i32_0 : i32, i32, i32
  }
  func.func @transform_1(%arg0: i32) -> (i32, i32) {
    %c0_i32 = arith.constant 0 : i32
    %c0_i32_0 = arith.constant 0 : i32
    %c0_i32_1 = arith.constant 0 : i32
    return %c0_i32, %c0_i32_0 : i32, i32
  }
  func.func @transform_2(%arg0: i32) -> (i32, i32) {
    %c0_i32 = arith.constant 0 : i32
    %c0_i32_0 = arith.constant 0 : i32
    %c0_i32_1 = arith.constant 0 : i32
    return %c0_i32, %c0_i32_0 : i32, i32
  }
  func.func @transform_3(%arg0: i32) -> (i32, i32, i32) {
    %c0_i32 = arith.constant 0 : i32
    %c0_i32_0 = arith.constant 0 : i32
    %c0_i32_1 = arith.constant 0 : i32
    return %arg0, %c0_i32, %c0_i32_0 : i32, i32, i32
  }
}

module attributes {stable_mosaic.version = 11 : i64} {
  func.func @_conv_s1_stats_kernel(%arg0: i32, %arg1: memref<1x120x8xbf16, #tpu.memory_space<vmem>>, %arg2: memref<72x128xbf16, #tpu.memory_space<vmem>>, %arg3: memref<80x1xf32, #tpu.memory_space<vmem>>, %arg4: memref<1x80x128xbf16, #tpu.memory_space<vmem>>, %arg5: memref<1x2x128xf32, #tpu.memory_space<vmem>>, %arg6: memref<80x72xbf16, #tpu.memory_space<vmem>>) attributes {dimension_semantics = [#tpu.dimension_semantics<parallel>], iteration_bounds = array<i64: 2>, scalar_prefetch = 0 : i64, scratch_operands = 1 : i64, tpu.core_type = #tpu.core_type<tc>, window_params = [{transform_indices = @transform_0, window_bounds = array<i64: 1, 120, 8>}, {pipeline_mode = #tpu.pipeline_mode<synchronous>, transform_indices = @transform_1, window_bounds = array<i64: 72, 128>}, {pipeline_mode = #tpu.pipeline_mode<synchronous>, transform_indices = @transform_2, window_bounds = array<i64: 80, 1>}, {transform_indices = @transform_3, window_bounds = array<i64: 1, 80, 128>}, {transform_indices = @transform_4, window_bounds = array<i64: 1, 2, 128>}]} {
    %cst = arith.constant 0.000000e+00 : f32
    %0 = vector.broadcast %cst : f32 to vector<1x128xf32>
    %cst_0 = arith.constant 0.000000e+00 : f32
    %1 = vector.broadcast %cst_0 : f32 to vector<1x128xf32>
    %c0 = arith.constant 0 : index
    %c9 = arith.constant 9 : index
    %c0_1 = arith.constant 0 : index
    %2 = vector.load %arg1[%c0, %c9, %c0_1] : memref<1x120x8xbf16, #tpu.memory_space<vmem>>, vector<1x80x8xbf16>
    %3 = vector.shape_cast %2 : vector<1x80x8xbf16> to vector<80x8xbf16>
    %c0_2 = arith.constant 0 : index
    %c0_3 = arith.constant 0 : index
    %4 = vector.load %arg6[%c0_2, %c0_3] : memref<80x72xbf16, #tpu.memory_space<vmem>>, vector<80x8xbf16>
    tpu.vector_store %arg6[%c0_2, %c0_3], %3 {strides = array<i32>} : memref<80x72xbf16, #tpu.memory_space<vmem>>, vector<80x8xbf16>,
    %c0_4 = arith.constant 0 : index
    %c10 = arith.constant 10 : index
    %c0_5 = arith.constant 0 : index
    %5 = vector.load %arg1[%c0_4, %c10, %c0_5] : memref<1x120x8xbf16, #tpu.memory_space<vmem>>, vector<1x80x8xbf16>
    %6 = vector.shape_cast %5 : vector<1x80x8xbf16> to vector<80x8xbf16>
    %c0_6 = arith.constant 0 : index
    %c8 = arith.constant 8 : index
    %7 = vector.load %arg6[%c0_6, %c8] : memref<80x72xbf16, #tpu.memory_space<vmem>>, vector<80x8xbf16>
    tpu.vector_store %arg6[%c0_6, %c8], %6 {strides = array<i32>} : memref<80x72xbf16, #tpu.memory_space<vmem>>, vector<80x8xbf16>,
    %c0_7 = arith.constant 0 : index
    %c11 = arith.constant 11 : index
    %c0_8 = arith.constant 0 : index
    %8 = vector.load %arg1[%c0_7, %c11, %c0_8] : memref<1x120x8xbf16, #tpu.memory_space<vmem>>, vector<1x80x8xbf16>
    %9 = vector.shape_cast %8 : vector<1x80x8xbf16> to vector<80x8xbf16>
    %c0_9 = arith.constant 0 : index
    %c16 = arith.constant 16 : index
    %10 = vector.load %arg6[%c0_9, %c16] : memref<80x72xbf16, #tpu.memory_space<vmem>>, vector<80x8xbf16>
    tpu.vector_store %arg6[%c0_9, %c16], %9 {strides = array<i32>} : memref<80x72xbf16, #tpu.memory_space<vmem>>, vector<80x8xbf16>,
    %c0_10 = arith.constant 0 : index
    %c19 = arith.constant 19 : index
    %c0_11 = arith.constant 0 : index
    %11 = vector.load %arg1[%c0_10, %c19, %c0_11] : memref<1x120x8xbf16, #tpu.memory_space<vmem>>, vector<1x80x8xbf16>
    %12 = vector.shape_cast %11 : vector<1x80x8xbf16> to vector<80x8xbf16>
    %c0_12 = arith.constant 0 : index
    %c24 = arith.constant 24 : index
    %13 = vector.load %arg6[%c0_12, %c24] : memref<80x72xbf16, #tpu.memory_space<vmem>>, vector<80x8xbf16>
    tpu.vector_store %arg6[%c0_12, %c24], %12 {strides = array<i32>} : memref<80x72xbf16, #tpu.memory_space<vmem>>, vector<80x8xbf16>,
    %c0_13 = arith.constant 0 : index
    %c20 = arith.constant 20 : index
    %c0_14 = arith.constant 0 : index
    %14 = vector.load %arg1[%c0_13, %c20, %c0_14] : memref<1x120x8xbf16, #tpu.memory_space<vmem>>, vector<1x80x8xbf16>
    %15 = vector.shape_cast %14 : vector<1x80x8xbf16> to vector<80x8xbf16>
    %c0_15 = arith.constant 0 : index
    %c32 = arith.constant 32 : index
    %16 = vector.load %arg6[%c0_15, %c32] : memref<80x72xbf16, #tpu.memory_space<vmem>>, vector<80x8xbf16>
    tpu.vector_store %arg6[%c0_15, %c32], %15 {strides = array<i32>} : memref<80x72xbf16, #tpu.memory_space<vmem>>, vector<80x8xbf16>,
    %c0_16 = arith.constant 0 : index
    %c21 = arith.constant 21 : index
    %c0_17 = arith.constant 0 : index
    %17 = vector.load %arg1[%c0_16, %c21, %c0_17] : memref<1x120x8xbf16, #tpu.memory_space<vmem>>, vector<1x80x8xbf16>
    %18 = vector.shape_cast %17 : vector<1x80x8xbf16> to vector<80x8xbf16>
    %c0_18 = arith.constant 0 : index
    %c40 = arith.constant 40 : index
    %19 = vector.load %arg6[%c0_18, %c40] : memref<80x72xbf16, #tpu.memory_space<vmem>>, vector<80x8xbf16>
    tpu.vector_store %arg6[%c0_18, %c40], %18 {strides = array<i32>} : memref<80x72xbf16, #tpu.memory_space<vmem>>, vector<80x8xbf16>,
    %c0_19 = arith.constant 0 : index
    %c29 = arith.constant 29 : index
    %c0_20 = arith.constant 0 : index
    %20 = vector.load %arg1[%c0_19, %c29, %c0_20] : memref<1x120x8xbf16, #tpu.memory_space<vmem>>, vector<1x80x8xbf16>
    %21 = vector.shape_cast %20 : vector<1x80x8xbf16> to vector<80x8xbf16>
    %c0_21 = arith.constant 0 : index
    %c48 = arith.constant 48 : index
    %22 = vector.load %arg6[%c0_21, %c48] : memref<80x72xbf16, #tpu.memory_space<vmem>>, vector<80x8xbf16>
    tpu.vector_store %arg6[%c0_21, %c48], %21 {strides = array<i32>} : memref<80x72xbf16, #tpu.memory_space<vmem>>, vector<80x8xbf16>,
    %c0_22 = arith.constant 0 : index
    %c30 = arith.constant 30 : index
    %c0_23 = arith.constant 0 : index
    %23 = vector.load %arg1[%c0_22, %c30, %c0_23] : memref<1x120x8xbf16, #tpu.memory_space<vmem>>, vector<1x80x8xbf16>
    %24 = vector.shape_cast %23 : vector<1x80x8xbf16> to vector<80x8xbf16>
    %c0_24 = arith.constant 0 : index
    %c56 = arith.constant 56 : index
    %25 = vector.load %arg6[%c0_24, %c56] : memref<80x72xbf16, #tpu.memory_space<vmem>>, vector<80x8xbf16>
    tpu.vector_store %arg6[%c0_24, %c56], %24 {strides = array<i32>} : memref<80x72xbf16, #tpu.memory_space<vmem>>, vector<80x8xbf16>,
    %c0_25 = arith.constant 0 : index
    %c31 = arith.constant 31 : index
    %c0_26 = arith.constant 0 : index
    %26 = vector.load %arg1[%c0_25, %c31, %c0_26] : memref<1x120x8xbf16, #tpu.memory_space<vmem>>, vector<1x80x8xbf16>
    %27 = vector.shape_cast %26 : vector<1x80x8xbf16> to vector<80x8xbf16>
    %c0_27 = arith.constant 0 : index
    %c64 = arith.constant 64 : index
    %28 = vector.load %arg6[%c0_27, %c64] : memref<80x72xbf16, #tpu.memory_space<vmem>>, vector<80x8xbf16>
    tpu.vector_store %arg6[%c0_27, %c64], %27 {strides = array<i32>} : memref<80x72xbf16, #tpu.memory_space<vmem>>, vector<80x8xbf16>,
    %c0_28 = arith.constant 0 : index
    %c0_29 = arith.constant 0 : index
    %29 = vector.load %arg6[%c0_28, %c0_29] : memref<80x72xbf16, #tpu.memory_space<vmem>>, vector<80x72xbf16>
    %c0_30 = arith.constant 0 : index
    %c0_31 = arith.constant 0 : index
    %30 = vector.load %arg2[%c0_30, %c0_31] : memref<72x128xbf16, #tpu.memory_space<vmem>>, vector<72x128xbf16>
    %cst_32 = arith.constant dense<0.000000e+00> : vector<80x128xf32>
    %31 = tpu.matmul %29, %30, %cst_32 {dimension_numbers = #tpu.dot_dimension_numbers<[1], [0], [0], [1], [0, 0, 1, 1], [], []>} : vector<80x72xbf16>, vector<72x128xbf16>, vector<80x128xf32> -> vector<80x128xf32>
    %32 = arith.truncf %31 : vector<80x128xf32> to vector<80x128xbf16>
    %c0_33 = arith.constant 0 : index
    %c0_34 = arith.constant 0 : index
    %c0_35 = arith.constant 0 : index
    %33 = vector.load %arg4[%c0_33, %c0_34, %c0_35] : memref<1x80x128xbf16, #tpu.memory_space<vmem>>, vector<1x80x128xbf16>
    %34 = vector.shape_cast %33 : vector<1x80x128xbf16> to vector<80x128xbf16>
    %35 = vector.shape_cast %32 : vector<80x128xbf16> to vector<1x80x128xbf16>
    tpu.vector_store %arg4[%c0_33, %c0_34, %c0_35], %35 {strides = array<i32>} : memref<1x80x128xbf16, #tpu.memory_space<vmem>>, vector<1x80x128xbf16>,
    %c0_36 = arith.constant 0 : index
    %c0_37 = arith.constant 0 : index
    %36 = vector.load %arg3[%c0_36, %c0_37] : memref<80x1xf32, #tpu.memory_space<vmem>>, vector<80x1xf32>
    %37 = vector.broadcast %36 : vector<80x1xf32> to vector<80x128xf32>
    %38 = arith.mulf %31, %37 : vector<80x128xf32>
    %cst_38 = arith.constant dense<0.000000e+00> : vector<128xf32>
    %39 = vector.multi_reduction <add>, %38, %cst_38 [0] : vector<80x128xf32> to vector<128xf32>
    %40 = vector.shape_cast %39 : vector<128xf32> to vector<1x128xf32>
    %41 = arith.addf %0, %40 : vector<1x128xf32>
    %42 = arith.mulf %38, %31 : vector<80x128xf32>
    %cst_39 = arith.constant dense<0.000000e+00> : vector<128xf32>
    %43 = vector.multi_reduction <add>, %42, %cst_39 [0] : vector<80x128xf32> to vector<128xf32>
    %44 = vector.shape_cast %43 : vector<128xf32> to vector<1x128xf32>
    %45 = arith.addf %1, %44 : vector<1x128xf32>
    %46 = tpu.concatenate %41, %45 in 0 : vector<1x128xf32>, vector<1x128xf32> -> vector<2x128xf32>
    %c0_40 = arith.constant 0 : index
    %c0_41 = arith.constant 0 : index
    %c0_42 = arith.constant 0 : index
    %47 = vector.load %arg5[%c0_40, %c0_41, %c0_42] : memref<1x2x128xf32, #tpu.memory_space<vmem>>, vector<1x2x128xf32>
    %48 = vector.shape_cast %47 : vector<1x2x128xf32> to vector<2x128xf32>
    %49 = vector.shape_cast %46 : vector<2x128xf32> to vector<1x2x128xf32>
    tpu.vector_store %arg5[%c0_40, %c0_41, %c0_42], %49 {strides = array<i32>} : memref<1x2x128xf32, #tpu.memory_space<vmem>>, vector<1x2x128xf32>,
    return
  }
  func.func @transform_0(%arg0: i32) -> (i32, i32, i32) {
    %c0_i32 = arith.constant 0 : i32
    %c0_i32_0 = arith.constant 0 : i32
    %c0_i32_1 = arith.constant 0 : i32
    return %arg0, %c0_i32, %c0_i32_0 : i32, i32, i32
  }
  func.func @transform_1(%arg0: i32) -> (i32, i32) {
    %c0_i32 = arith.constant 0 : i32
    %c0_i32_0 = arith.constant 0 : i32
    %c0_i32_1 = arith.constant 0 : i32
    return %c0_i32, %c0_i32_0 : i32, i32
  }
  func.func @transform_2(%arg0: i32) -> (i32, i32) {
    %c0_i32 = arith.constant 0 : i32
    %c0_i32_0 = arith.constant 0 : i32
    %c0_i32_1 = arith.constant 0 : i32
    return %c0_i32, %c0_i32_0 : i32, i32
  }
  func.func @transform_3(%arg0: i32) -> (i32, i32, i32) {
    %c0_i32 = arith.constant 0 : i32
    %c0_i32_0 = arith.constant 0 : i32
    %c0_i32_1 = arith.constant 0 : i32
    return %arg0, %c0_i32, %c0_i32_0 : i32, i32, i32
  }
  func.func @transform_4(%arg0: i32) -> (i32, i32, i32) {
    %c0_i32 = arith.constant 0 : i32
    %c0_i32_0 = arith.constant 0 : i32
    %c0_i32_1 = arith.constant 0 : i32
    return %arg0, %c0_i32, %c0_i32_0 : i32, i32, i32
  }
}

module attributes {stable_mosaic.version = 11 : i64} {
  func.func @_bn_apply_kernel(%arg0: i32, %arg1: memref<1x128x128xbf16, #tpu.memory_space<vmem>>, %arg2: memref<1x128xf32, #tpu.memory_space<vmem>>, %arg3: memref<1x128xf32, #tpu.memory_space<vmem>>, %arg4: memref<1x128x128xbf16, #tpu.memory_space<vmem>>) attributes {dimension_semantics = [#tpu.dimension_semantics<parallel>], iteration_bounds = array<i64: 1>, scalar_prefetch = 0 : i64, scratch_operands = 0 : i64, tpu.core_type = #tpu.core_type<tc>, window_params = [{transform_indices = @transform_0, window_bounds = array<i64: 1, 128, 128>}, {pipeline_mode = #tpu.pipeline_mode<synchronous>, transform_indices = @transform_1, window_bounds = array<i64: 1, 128>}, {pipeline_mode = #tpu.pipeline_mode<synchronous>, transform_indices = @transform_2, window_bounds = array<i64: 1, 128>}, {transform_indices = @transform_3, window_bounds = array<i64: 1, 128, 128>}]} {
    %c0 = arith.constant 0 : index
    %c0_0 = arith.constant 0 : index
    %c0_1 = arith.constant 0 : index
    %0 = vector.load %arg1[%c0, %c0_0, %c0_1] : memref<1x128x128xbf16, #tpu.memory_space<vmem>>, vector<1x128x128xbf16>
    %1 = vector.shape_cast %0 : vector<1x128x128xbf16> to vector<128x128xbf16>
    %2 = arith.extf %1 : vector<128x128xbf16> to vector<128x128xf32>
    %c0_2 = arith.constant 0 : index
    %c0_3 = arith.constant 0 : index
    %3 = vector.load %arg2[%c0_2, %c0_3] : memref<1x128xf32, #tpu.memory_space<vmem>>, vector<1x128xf32>
    %4 = vector.broadcast %3 : vector<1x128xf32> to vector<128x128xf32>
    %5 = arith.mulf %2, %4 : vector<128x128xf32>
    %c0_4 = arith.constant 0 : index
    %c0_5 = arith.constant 0 : index
    %6 = vector.load %arg3[%c0_4, %c0_5] : memref<1x128xf32, #tpu.memory_space<vmem>>, vector<1x128xf32>
    %7 = vector.broadcast %6 : vector<1x128xf32> to vector<128x128xf32>
    %8 = arith.addf %5, %7 : vector<128x128xf32>
    %9 = arith.truncf %8 : vector<128x128xf32> to vector<128x128xbf16>
    %c0_6 = arith.constant 0 : index
    %c0_7 = arith.constant 0 : index
    %c0_8 = arith.constant 0 : index
    %10 = vector.load %arg4[%c0_6, %c0_7, %c0_8] : memref<1x128x128xbf16, #tpu.memory_space<vmem>>, vector<1x128x128xbf16>
    %11 = vector.shape_cast %10 : vector<1x128x128xbf16> to vector<128x128xbf16>
    %12 = vector.shape_cast %9 : vector<128x128xbf16> to vector<1x128x128xbf16>
    tpu.vector_store %arg4[%c0_6, %c0_7, %c0_8], %12 {strides = array<i32>} : memref<1x128x128xbf16, #tpu.memory_space<vmem>>, vector<1x128x128xbf16>,
    return
  }
  func.func @transform_0(%arg0: i32) -> (i32, i32, i32) {
    %c0_i32 = arith.constant 0 : i32
    %c0_i32_0 = arith.constant 0 : i32
    %c0_i32_1 = arith.constant 0 : i32
    return %arg0, %c0_i32, %c0_i32_0 : i32, i32, i32
  }
  func.func @transform_1(%arg0: i32) -> (i32, i32) {
    %c0_i32 = arith.constant 0 : i32
    %c0_i32_0 = arith.constant 0 : i32
    %c0_i32_1 = arith.constant 0 : i32
    return %c0_i32, %c0_i32_0 : i32, i32
  }
  func.func @transform_2(%arg0: i32) -> (i32, i32) {
    %c0_i32 = arith.constant 0 : i32
    %c0_i32_0 = arith.constant 0 : i32
    %c0_i32_1 = arith.constant 0 : i32
    return %c0_i32, %c0_i32_0 : i32, i32
  }
  func.func @transform_3(%arg0: i32) -> (i32, i32, i32) {
    %c0_i32 = arith.constant 0 : i32
    %c0_i32_0 = arith.constant 0 : i32
    %c0_i32_1 = arith.constant 0 : i32
    return %arg0, %c0_i32, %c0_i32_0 : i32, i32, i32
  }
}

module attributes {stable_mosaic.version = 11 : i64} {
  func.func @_conv_stats_mm_kernel(%arg0: i32, %arg1: memref<128x8xbf16, #tpu.memory_space<vmem>>, %arg2: memref<8x128xbf16, #tpu.memory_space<vmem>>, %arg3: memref<128x128xbf16, #tpu.memory_space<vmem>>, %arg4: memref<1x2x128xf32, #tpu.memory_space<vmem>>) attributes {dimension_semantics = [#tpu.dimension_semantics<parallel>], iteration_bounds = array<i64: 1>, scalar_prefetch = 0 : i64, scratch_operands = 0 : i64, tpu.core_type = #tpu.core_type<tc>, window_params = [{transform_indices = @transform_0, window_bounds = array<i64: 128, 8>}, {pipeline_mode = #tpu.pipeline_mode<synchronous>, transform_indices = @transform_1, window_bounds = array<i64: 8, 128>}, {transform_indices = @transform_2, window_bounds = array<i64: 128, 128>}, {transform_indices = @transform_3, window_bounds = array<i64: 1, 2, 128>}]} {
    %c0 = arith.constant 0 : index
    %c0_0 = arith.constant 0 : index
    %0 = vector.load %arg1[%c0, %c0_0] : memref<128x8xbf16, #tpu.memory_space<vmem>>, vector<128x8xbf16>
    %c0_1 = arith.constant 0 : index
    %c0_2 = arith.constant 0 : index
    %1 = vector.load %arg2[%c0_1, %c0_2] : memref<8x128xbf16, #tpu.memory_space<vmem>>, vector<8x128xbf16>
    %cst = arith.constant dense<0.000000e+00> : vector<128x128xf32>
    %2 = tpu.matmul %0, %1, %cst {dimension_numbers = #tpu.dot_dimension_numbers<[1], [0], [0], [1], [0, 0, 1, 1], [], []>} : vector<128x8xbf16>, vector<8x128xbf16>, vector<128x128xf32> -> vector<128x128xf32>
    %3 = arith.truncf %2 : vector<128x128xf32> to vector<128x128xbf16>
    %c0_3 = arith.constant 0 : index
    %c0_4 = arith.constant 0 : index
    %4 = vector.load %arg3[%c0_3, %c0_4] : memref<128x128xbf16, #tpu.memory_space<vmem>>, vector<128x128xbf16>
    tpu.vector_store %arg3[%c0_3, %c0_4], %3 {strides = array<i32>} : memref<128x128xbf16, #tpu.memory_space<vmem>>, vector<128x128xbf16>,
    %cst_5 = arith.constant dense<0.000000e+00> : vector<128xf32>
    %5 = vector.multi_reduction <add>, %2, %cst_5 [0] : vector<128x128xf32> to vector<128xf32>
    %6 = vector.shape_cast %5 : vector<128xf32> to vector<1x128xf32>
    %7 = arith.mulf %2, %2 : vector<128x128xf32>
    %cst_6 = arith.constant dense<0.000000e+00> : vector<128xf32>
    %8 = vector.multi_reduction <add>, %7, %cst_6 [0] : vector<128x128xf32> to vector<128xf32>
    %9 = vector.shape_cast %8 : vector<128xf32> to vector<1x128xf32>
    %10 = tpu.concatenate %6, %9 in 0 : vector<1x128xf32>, vector<1x128xf32> -> vector<2x128xf32>
    %c0_7 = arith.constant 0 : index
    %c0_8 = arith.constant 0 : index
    %c0_9 = arith.constant 0 : index
    %11 = vector.load %arg4[%c0_7, %c0_8, %c0_9] : memref<1x2x128xf32, #tpu.memory_space<vmem>>, vector<1x2x128xf32>
    %12 = vector.shape_cast %11 : vector<1x2x128xf32> to vector<2x128xf32>
    %13 = vector.shape_cast %10 : vector<2x128xf32> to vector<1x2x128xf32>
    tpu.vector_store %arg4[%c0_7, %c0_8, %c0_9], %13 {strides = array<i32>} : memref<1x2x128xf32, #tpu.memory_space<vmem>>, vector<1x2x128xf32>,
    return
  }
  func.func @transform_0(%arg0: i32) -> (i32, i32) {
    %c0_i32 = arith.constant 0 : i32
    %c0_i32_0 = arith.constant 0 : i32
    return %arg0, %c0_i32 : i32, i32
  }
  func.func @transform_1(%arg0: i32) -> (i32, i32) {
    %c0_i32 = arith.constant 0 : i32
    %c0_i32_0 = arith.constant 0 : i32
    %c0_i32_1 = arith.constant 0 : i32
    return %c0_i32, %c0_i32_0 : i32, i32
  }
  func.func @transform_2(%arg0: i32) -> (i32, i32) {
    %c0_i32 = arith.constant 0 : i32
    %c0_i32_0 = arith.constant 0 : i32
    return %arg0, %c0_i32 : i32, i32
  }
  func.func @transform_3(%arg0: i32) -> (i32, i32, i32) {
    %c0_i32 = arith.constant 0 : i32
    %c0_i32_0 = arith.constant 0 : i32
    %c0_i32_1 = arith.constant 0 : i32
    return %arg0, %c0_i32, %c0_i32_0 : i32, i32, i32
  }
}

module attributes {stable_mosaic.version = 11 : i64} {
  func.func @_bn_apply_res_kernel(%arg0: i32, %arg1: memref<1x80x128xbf16, #tpu.memory_space<vmem>>, %arg2: memref<1x128xf32, #tpu.memory_space<vmem>>, %arg3: memref<1x128xf32, #tpu.memory_space<vmem>>, %arg4: memref<1x80x128xbf16, #tpu.memory_space<vmem>>, %arg5: memref<1x80x128xf32, #tpu.memory_space<vmem>>) attributes {dimension_semantics = [#tpu.dimension_semantics<parallel>], iteration_bounds = array<i64: 2>, scalar_prefetch = 0 : i64, scratch_operands = 0 : i64, tpu.core_type = #tpu.core_type<tc>, window_params = [{transform_indices = @transform_0, window_bounds = array<i64: 1, 80, 128>}, {pipeline_mode = #tpu.pipeline_mode<synchronous>, transform_indices = @transform_1, window_bounds = array<i64: 1, 128>}, {pipeline_mode = #tpu.pipeline_mode<synchronous>, transform_indices = @transform_2, window_bounds = array<i64: 1, 128>}, {transform_indices = @transform_3, window_bounds = array<i64: 1, 80, 128>}, {transform_indices = @transform_4, window_bounds = array<i64: 1, 80, 128>}]} {
    %c0 = arith.constant 0 : index
    %c0_0 = arith.constant 0 : index
    %c0_1 = arith.constant 0 : index
    %0 = vector.load %arg1[%c0, %c0_0, %c0_1] : memref<1x80x128xbf16, #tpu.memory_space<vmem>>, vector<1x80x128xbf16>
    %1 = vector.shape_cast %0 : vector<1x80x128xbf16> to vector<80x128xbf16>
    %2 = arith.extf %1 : vector<80x128xbf16> to vector<80x128xf32>
    %c0_2 = arith.constant 0 : index
    %c0_3 = arith.constant 0 : index
    %3 = vector.load %arg2[%c0_2, %c0_3] : memref<1x128xf32, #tpu.memory_space<vmem>>, vector<1x128xf32>
    %4 = vector.broadcast %3 : vector<1x128xf32> to vector<80x128xf32>
    %5 = arith.mulf %2, %4 : vector<80x128xf32>
    %c0_4 = arith.constant 0 : index
    %c0_5 = arith.constant 0 : index
    %6 = vector.load %arg3[%c0_4, %c0_5] : memref<1x128xf32, #tpu.memory_space<vmem>>, vector<1x128xf32>
    %7 = vector.broadcast %6 : vector<1x128xf32> to vector<80x128xf32>
    %8 = arith.addf %5, %7 : vector<80x128xf32>
    %c0_6 = arith.constant 0 : index
    %c0_7 = arith.constant 0 : index
    %c0_8 = arith.constant 0 : index
    %9 = vector.load %arg4[%c0_6, %c0_7, %c0_8] : memref<1x80x128xbf16, #tpu.memory_space<vmem>>, vector<1x80x128xbf16>
    %10 = vector.shape_cast %9 : vector<1x80x128xbf16> to vector<80x128xbf16>
    %11 = arith.extf %10 : vector<80x128xbf16> to vector<80x128xf32>
    %12 = arith.addf %8, %11 : vector<80x128xf32>
    %cst = arith.constant 0.000000e+00 : f32
    %13 = vector.broadcast %cst : f32 to vector<80x128xf32>
    %14 = arith.maximumf %12, %13 : vector<80x128xf32>
    %c0_9 = arith.constant 0 : index
    %c0_10 = arith.constant 0 : index
    %c0_11 = arith.constant 0 : index
    %15 = vector.load %arg5[%c0_9, %c0_10, %c0_11] : memref<1x80x128xf32, #tpu.memory_space<vmem>>, vector<1x80x128xf32>
    %16 = vector.shape_cast %15 : vector<1x80x128xf32> to vector<80x128xf32>
    %17 = vector.shape_cast %14 : vector<80x128xf32> to vector<1x80x128xf32>
    tpu.vector_store %arg5[%c0_9, %c0_10, %c0_11], %17 {strides = array<i32>} : memref<1x80x128xf32, #tpu.memory_space<vmem>>, vector<1x80x128xf32>,
    return
  }
  func.func @transform_0(%arg0: i32) -> (i32, i32, i32) {
    %c0_i32 = arith.constant 0 : i32
    %c0_i32_0 = arith.constant 0 : i32
    %c0_i32_1 = arith.constant 0 : i32
    return %arg0, %c0_i32, %c0_i32_0 : i32, i32, i32
  }
  func.func @transform_1(%arg0: i32) -> (i32, i32) {
    %c0_i32 = arith.constant 0 : i32
    %c0_i32_0 = arith.constant 0 : i32
    %c0_i32_1 = arith.constant 0 : i32
    return %c0_i32, %c0_i32_0 : i32, i32
  }
  func.func @transform_2(%arg0: i32) -> (i32, i32) {
    %c0_i32 = arith.constant 0 : i32
    %c0_i32_0 = arith.constant 0 : i32
    %c0_i32_1 = arith.constant 0 : i32
    return %c0_i32, %c0_i32_0 : i32, i32
  }
  func.func @transform_3(%arg0: i32) -> (i32, i32, i32) {
    %c0_i32 = arith.constant 0 : i32
    %c0_i32_0 = arith.constant 0 : i32
    %c0_i32_1 = arith.constant 0 : i32
    return %arg0, %c0_i32, %c0_i32_0 : i32, i32, i32
  }
  func.func @transform_4(%arg0: i32) -> (i32, i32, i32) {
    %c0_i32 = arith.constant 0 : i32
    %c0_i32_0 = arith.constant 0 : i32
    %c0_i32_1 = arith.constant 0 : i32
    return %arg0, %c0_i32, %c0_i32_0 : i32, i32, i32
  }
}

</mosaic_0001>

<bundles_post_ra>
// kernel: residual_block_forward.7
= control target key start
LH: loop header
LB: loop body
LE: loop exit
PB: predicated region body
PF: predicated region fallthrough
CT: control target
= control target key end

     0   :  { %s422_s0 = inlined_call_operand.vmem [shape: bf16[1,128,128], index: 0, kind: input, shape index: {}]   ;;  %s423_s1 = inlined_call_operand.vmem [shape: f32[1,128], index: 1, kind: input, shape index: {}]   ;;  %s424_s2 = inlined_call_operand.vmem [shape: f32[1,128], index: 2, kind: input, shape index: {}]   ;;  %s425_s3 = inlined_call_operand.vmem [shape: bf16[1,128,128], index: 3, kind: output, shape index: {}]  }
   0x1   :  { %v227_v0 = vld [vmem:[%s422_s0] sm:$0xff]   ;;  %v298_v4 = vld [vmem:[%s422_s0 + $0x8] sm:$0xff]   ;;  %v299_v5 = vld [vmem:[%s422_s0 + $0x10] sm:$0xff]  }
   0x2   :  { %v338_v1 = vld [vmem:[%s423_s1] ss:$0 sm:$0xff]  ;;  %v228_v2 = vunpack.c.l.bf16 %v227_v0  ;;  %v229_v3 = vunpack.c.h.bf16 %v227_v0  ;;  %v300_v6 = vld [vmem:[%s422_s0 + $0x18] sm:$0xff]   ;;  %v232_v8 = vunpack.c.l.bf16 %v298_v4  ;;  %v233_v9 = vunpack.c.h.bf16 %v298_v4  ;;  %v302_v33 = vld [vmem:[%s422_s0 + $0x28] sm:$0xff]  }
   0x3   :  { %v352_v7 = vld [vmem:[%s424_s2] ss:$0 sm:$0xff]  ;;  %v236_v10 = vunpack.c.l.bf16 %v299_v5  ;;  %v237_v11 = vunpack.c.h.bf16 %v299_v5  ;;  %v240_v14 = vunpack.c.l.bf16 %v300_v6  ;;  %v241_v15 = vunpack.c.h.bf16 %v300_v6  ;;  %v303_v38 = vld [vmem:[%s422_s0 + $0x30] sm:$0xff]   ;;  %v304_v43 = vld [vmem:[%s422_s0 + $0x38] sm:$0xff]  }
   0x4   :  { %v53_v12 = vmul.f32 %v228_v2, %v338_v1  ;;  %v54_v13 = vmul.f32 %v229_v3, %v338_v1  ;;  %v55_v16 = vmul.f32 %v232_v8, %v338_v1  ;;  %v56_v17 = vmul.f32 %v233_v9, %v338_v1  ;;  %v301_v28 = vld [vmem:[%s422_s0 + $0x20] sm:$0xff]  }
   0x5   :  { %v57_v18 = vmul.f32 %v236_v10, %v338_v1  ;;  %v58_v19 = vmul.f32 %v237_v11, %v338_v1  ;;  %v59_v22 = vmul.f32 %v240_v14, %v338_v1  ;;  %v60_v23 = vmul.f32 %v241_v15, %v338_v1 }
   0x6   :  { %v76_v20 = vadd.f32 %v352_v7, %v53_v12  ;;  %v77_v21 = vadd.f32 %v352_v7, %v54_v13  ;;  %v78_v24 = vadd.f32 %v352_v7, %v55_v16  ;;  %v79_v25 = vadd.f32 %v352_v7, %v56_v17 }
   0x7   :  { %v80_v26 = vadd.f32 %v352_v7, %v57_v18  ;;  %v81_v27 = vadd.f32 %v352_v7, %v58_v19  ;;  %v82_v31 = vadd.f32 %v352_v7, %v59_v22  ;;  %v83_v32 = vadd.f32 %v352_v7, %v60_v23 }
   0x8   :  { %v92_v29 = vmax.f32 %v76_v20, 0.0  ;;  %v93_v30 = vmax.f32 %v77_v21, 0.0  ;;  %v94_v34 = vmax.f32 %v78_v24, 0.0  ;;  %v95_v35 = vmax.f32 %v79_v25, 0.0 }
   0x9   :  { %v96_v36 = vmax.f32 %v80_v26, 0.0  ;;  %v97_v37 = vmax.f32 %v81_v27, 0.0  ;;  %v98_v40 = vmax.f32 %v82_v31, 0.0  ;;  %v99_v41 = vmax.f32 %v83_v32, 0.0 }
   0xa   :  { %v261_v39 = vpack.c.bf16 %v93_v30, %v92_v29  ;;  %v244_v42 = vunpack.c.l.bf16 %v301_v28  ;;  %v266_v44 = vpack.c.bf16 %v95_v35, %v94_v34  ;;  %v245_v46 = vunpack.c.h.bf16 %v301_v28 }
   0xb   :  { %v271_v45 = vpack.c.bf16 %v97_v37, %v96_v36  ;;  %v248_v47 = vunpack.c.l.bf16 %v302_v33  ;;  %v276_v48 = vpack.c.bf16 %v99_v41, %v98_v40  ;;  %v249_v50 = vunpack.c.h.bf16 %v302_v33 }
   0xc   :  { %262 = vst [vmem:[%s425_s3] sm:$0xff] %v261_v39   ;;  %v61_v49 = vmul.f32 %v244_v42, %v338_v1  ;;  %v252_v51 = vunpack.c.l.bf16 %v303_v38  ;;  %305 = vst [vmem:[%s425_s3 + $0x8] sm:$0xff] %v266_v44   ;;  %v62_v52 = vmul.f32 %v245_v46, %v338_v1  ;;  %v253_v54 = vunpack.c.h.bf16 %v303_v38 }
   0xd   :  { %306 = vst [vmem:[%s425_s3 + $0x10] sm:$0xff] %v271_v45   ;;  %v63_v53 = vmul.f32 %v248_v47, %v338_v1  ;;  %v256_v55 = vunpack.c.l.bf16 %v304_v43  ;;  %307 = vst [vmem:[%s425_s3 + $0x18] sm:$0xff] %v276_v48   ;;  %v64_v57 = vmul.f32 %v249_v50, %v338_v1  ;;  %v257_v59 = vunpack.c.h.bf16 %v304_v43 }
   0xe   :  { %v84_v56 = vadd.f32 %v352_v7, %v61_v49  ;;  %v65_v58 = vmul.f32 %v252_v51, %v338_v1  ;;  %v85_v60 = vadd.f32 %v352_v7, %v62_v52  ;;  %v66_v62 = vmul.f32 %v253_v54, %v338_v1 }
   0xf   :  { %v86_v61 = vadd.f32 %v352_v7, %v63_v53  ;;  %v67_v63 = vmul.f32 %v256_v55, %v338_v1  ;;  %v87_v2 = vadd.f32 %v352_v7, %v64_v57  ;;  %v68_v4 = vmul.f32 %v257_v59, %v338_v1 }
  0x10   :  { %v100_v0 = vmax.f32 %v84_v56, 0.0  ;;  %v88_v3 = vadd.f32 %v352_v7, %v65_v58  ;;  %v101_v5 = vmax.f32 %v85_v60, 0.0  ;;  %v89_v8 = vadd.f32 %v352_v7, %v66_v62 }
  0x11   :  { %v102_v6 = vmax.f32 %v86_v61, 0.0  ;;  %v90_v9 = vadd.f32 %v352_v7, %v67_v63  ;;  %v103_v10 = vmax.f32 %v87_v2, 0.0  ;;  %v91_v12 = vadd.f32 %v352_v7, %v68_v4 }
  0x12   :  { %v104_v11 = vmax.f32 %v88_v3, 0.0  ;;  %v281_v13 = vpack.c.bf16 %v101_v5, %v100_v0  ;;  %v105_v14 = vmax.f32 %v89_v8, 0.0 }
  0x13   :  { %v106_v15 = vmax.f32 %v90_v9, 0.0  ;;  %v286_v16 = vpack.c.bf16 %v103_v10, %v102_v6  ;;  %v107_v17 = vmax.f32 %v91_v12, 0.0 }
  0x14   :  { %308 = vst [vmem:[%s425_s3 + $0x20] sm:$0xff] %v281_v13   ;;  %v291_v1 = vpack.c.bf16 %v105_v14, %v104_v11 }
  0x15   :  { %309 = vst [vmem:[%s425_s3 + $0x28] sm:$0xff] %v286_v16   ;;  %v296_v18 = vpack.c.bf16 %v107_v17, %v106_v15 }
  0x16   :  { %310 = vst [vmem:[%s425_s3 + $0x30] sm:$0xff] %v291_v1  }
  0x17   :  { %311 = vst [vmem:[%s425_s3 + $0x38] sm:$0xff] %v296_v18  }

// kernel: residual_block_forward.6
= control target key start
LH: loop header
LB: loop body
LE: loop exit
PB: predicated region body
PF: predicated region fallthrough
CT: control target
= control target key end

     0   :  { %vm115_vm0 = vcmask 1043456   ;;  %vm90_vm1 = vcmask 326656   ;;  %vm354_vm2 = vcmask 1040384   ;;  %s603_s1 = inlined_call_operand.vmem [shape: bf16[40,128], index: 1, kind: input, shape index: {}]   ;;  %s604_s0 = inlined_call_operand.vmem [shape: bf16[128,40], index: 0, kind: input, shape index: {}]   ;;  %s605_s2 = inlined_call_operand.vmem [shape: bf16[128,128], index: 2, kind: output, shape index: {0}]   ;;  %s606_s3 = inlined_call_operand.vmem [shape: f32[1,2,128], index: 3, kind: output, shape index: {1}]  }
   0x1   :  { %v504_v0 = vld [vmem:[%s603_s1 + $0x10] ss:$0 sps:$4 sm:$0xff]   ;;  %v505_v1 = vld [vmem:[%s603_s1 + $0x8] sm:$0xff]   ;;  %v507_v3 = vld [vmem:[%s604_s0] sm:$0xff]  }
   0x2   :  { %502 = vmatprep.subr.msk.bf16.mxu0 %vm115_vm0, %v504_v0  ;;  %v117_v2 = vsel %vm115_vm0, %v504_v0, 0  ;;  %503 = vmatprep.subr.msk.bf16.mxu1 %vm115_vm0, %v504_v0  ;;  %v506_v4 = vld [vmem:[%s603_s1] sm:$0xff]   ;;  %v508_v6 = vld [vmem:[%s604_s0 + $0x8] sm:$0xff]   ;;  %v509_v8 = vld [vmem:[%s604_s0 + $0x10] sm:$0xff]  }
   0x3   :  { %475 = vmatpush3.bf16.msra.mxu0 %v117_v2  ;;  %499 = vmatpush3.bf16.msra.mxu1 %v117_v2  ;;  %v511_v5 = vld [vmem:[%s604_s0 + $0x20] sm:$0xff]   ;;  %v512_v7 = vld [vmem:[%s604_s0 + $0x28] sm:$0xff]   ;;  %v513_v9 = vld [vmem:[%s604_s0 + $0x30] sm:$0xff]  }
   0x4   :  { %476 = vmatprep.subr.bf16.mxu0 %v505_v1  ;;  %497 = vmatprep.subr.bf16.mxu1 %v505_v1  ;;  %v510_v10 = vld [vmem:[%s604_s0 + $0x18] sm:$0xff]  }
   0x5   :  { %480 = vmatprep.mubr.msk.bf16.mxu0 %vm90_vm1, %v507_v3  ;;  %488 = vmatprep.mubr.msk.bf16.mxu1 %vm90_vm1, %v511_v5  ;;  %v514_v11 = vld [vmem:[%s604_s0 + $0x38] sm:$0xff]  }
   0x7   :  { %477 = vmatpush3.bf16.msra.mxu0 %v505_v1  ;;  %500 = vmatpush3.bf16.msra.mxu1 %v505_v1 }
   0x8   :  { %478 = vmatprep.subr.bf16.mxu0 %v506_v4  ;;  %498 = vmatprep.subr.bf16.mxu1 %v506_v4 }
   0xb   :  { %479 = vmatpush3.bf16.msra.mxu0 %v506_v4  ;;  %501 = vmatpush3.bf16.msra.mxu1 %v506_v4 }
   0xe   :  { %481 = vmatmul.mubr.msk.bf16.vlgmr.msra.gmra.mxu0 %vm90_vm1, %v508_v6  ;;  %489 = vmatmul.mubr.msk.bf16.vlgmr.msra.gmra.mxu1 %vm90_vm1, %v512_v7 }
   0xf   :  { %484 = vmatprep.mubr.msk.bf16.mxu0 %vm90_vm1, %v509_v8  ;;  %492 = vmatprep.mubr.msk.bf16.mxu1 %vm90_vm1, %v513_v9 }
  0x16   :  { %485 = vmatmul.mubr.msk.bf16.gmra.mxu0 %vm90_vm1, %v510_v10  ;;  %493 = vmatmul.mubr.msk.bf16.gmra.mxu1 %vm90_vm1, %v514_v11 }
  0xce   :  { %v482_v12 = vpop.f32.mrf.mxu0  ;;  %v490_v13 = vpop.f32.mrf.mxu1 }
  0xcf   :  { %v319_v29 = vmul.f32 %v482_v12, %v482_v12  ;;  %v327_v63 = vmul.f32 %v490_v13, %v490_v13 }
  0xd0   :  { %v153_v14 = vpop.f32.mrf.mxu0  ;;  %v185_v15 = vpop.f32.mrf.mxu1 }
  0xd1   :  { %v317_v20 = vmul.f32 %v153_v14, %v153_v14  ;;  %v325_v57 = vmul.f32 %v185_v15, %v185_v15 }
  0xd2   :  { %v483_v16 = vpop.f32.mrf.mxu0  ;;  %v491_v17 = vpop.f32.mrf.mxu1 }
  0xd3   :  { %v424_v18 = vpack.c.bf16 %v483_v16, %v482_v12  ;;  %v444_v19 = vpack.c.bf16 %v491_v17, %v490_v13  ;;  %v320_v34 = vmul.f32 %v483_v16, %v483_v16  ;;  %v328_v2 = vmul.f32 %v491_v17, %v491_v17 }
  0xd4   :  { %v156_v21 = vpop.f32.mrf.mxu0  ;;  %v188_v22 = vpop.f32.mrf.mxu1 }
  0xd5   :  { %456 = vst [vmem:[%s605_s2 + $0x8] sm:$0xff] %v424_v18   ;;  %v419_v23 = vpack.c.bf16 %v156_v21, %v153_v14  ;;  %v296_v24 = vadd.f32 %v156_v21, %v153_v14  ;;  %v318_v25 = vmul.f32 %v156_v21, %v156_v21  ;;  %460 = vst [vmem:[%s605_s2 + $0x28] sm:$0xff] %v444_v19  }
  0xd6   :  { %v439_v26 = vpack.c.bf16 %v188_v22, %v185_v15  ;;  %v486_v27 = vpop.f32.mrf.mxu0  ;;  %v494_v28 = vpop.f32.mrf.mxu1  ;;  %v326_v61 = vmul.f32 %v188_v22, %v188_v22 }
  0xd7   :  { %420 = vst [vmem:[%s605_s2] sm:$0xff] %v419_v23   ;;  %v297_v30 = vadd.f32 %v482_v12, %v296_v24  ;;  %v333_v31 = vadd.f32 %v318_v25, %v317_v20  ;;  %v323_v51 = vmul.f32 %v486_v27, %v486_v27  ;;  %v331_v11 = vmul.f32 %v494_v28, %v494_v28 }
  0xd8   :  { %459 = vst [vmem:[%s605_s2 + $0x20] sm:$0xff] %v439_v26   ;;  %v169_v32 = vpop.f32.mrf.mxu0  ;;  %v201_v33 = vpop.f32.mrf.mxu1 }
  0xd9   :  { %v334_v35 = vadd.f32 %v333_v31, %v319_v29  ;;  %v298_v36 = vadd.f32 %v483_v16, %v297_v30  ;;  %v321_v40 = vmul.f32 %v169_v32, %v169_v32  ;;  %v329_v6 = vmul.f32 %v201_v33, %v201_v33 }
  0xda   :  { %v487_v37 = vpop.f32.mrf.mxu0  ;;  %v495_v38 = vpop.f32.mrf.mxu1 }
  0xdb   :  { %v299_v39 = vadd.f32 %v298_v36, %v169_v32  ;;  %v335_v41 = vadd.f32 %v334_v35, %v320_v34  ;;  %v434_v42 = vpack.c.bf16 %v487_v37, %v486_v27  ;;  %v454_v44 = vpack.c.bf16 %v495_v38, %v494_v28 }
  0xdc   :  { %v172_v43 = vpop.f32.mrf.mxu0  ;;  %v204_v45 = vpop.f32.mrf.mxu1  ;;  %v324_v54 = vmul.f32 %v487_v37, %v487_v37  ;;  %v332_v16 = vmul.f32 %v495_v38, %v495_v38 }
  0xdd   :  { %v336_v46 = vadd.f32 %v335_v41, %v321_v40  ;;  %458 = vst [vmem:[%s605_s2 + $0x18] sm:$0xff] %v434_v42   ;;  %v429_v47 = vpack.c.bf16 %v172_v43, %v169_v32  ;;  %v300_v48 = vadd.f32 %v299_v39, %v172_v43  ;;  %v322_v49 = vmul.f32 %v172_v43, %v172_v43 }
  0xde   :  { %462 = vst [vmem:[%s605_s2 + $0x38] sm:$0xff] %v454_v44   ;;  %v449_v50 = vpack.c.bf16 %v204_v45, %v201_v33  ;;  %v330_v10 = vmul.f32 %v204_v45, %v204_v45 }
  0xdf   :  { %457 = vst [vmem:[%s605_s2 + $0x10] sm:$0xff] %v429_v47   ;;  %v301_v52 = vadd.f32 %v486_v27, %v300_v48  ;;  %v337_v53 = vadd.f32 %v336_v46, %v322_v49 }
  0xe0   :  { %461 = vst [vmem:[%s605_s2 + $0x30] sm:$0xff] %v449_v50  }
  0xe1   :  { %v302_v55 = vadd.f32 %v487_v37, %v301_v52  ;;  %v338_v56 = vadd.f32 %v337_v53, %v323_v51 }
  0xe3   :  { %v339_v58 = vadd.f32 %v338_v56, %v324_v54  ;;  %v303_v59 = vadd.f32 %v302_v55, %v185_v15 }
  0xe5   :  { %v304_v60 = vadd.f32 %v303_v59, %v188_v22  ;;  %v340_v62 = vadd.f32 %v339_v58, %v325_v57 }
  0xe7   :  { %v305_v0 = vadd.f32 %v490_v13, %v304_v60  ;;  %v341_v1 = vadd.f32 %v340_v62, %v326_v61 }
  0xe9   :  { %v342_v3 = vadd.f32 %v341_v1, %v327_v63  ;;  %v306_v4 = vadd.f32 %v491_v17, %v305_v0 }
  0xeb   :  { %v307_v5 = vadd.f32 %v306_v4, %v201_v33  ;;  %v343_v7 = vadd.f32 %v342_v3, %v328_v2 }
  0xed   :  { %v344_v8 = vadd.f32 %v343_v7, %v329_v6  ;;  %v308_v9 = vadd.f32 %v307_v5, %v204_v45 }
  0xef   :  { %v309_v12 = vadd.f32 %v494_v28, %v308_v9  ;;  %v345_v14 = vadd.f32 %v344_v8, %v330_v10 }
  0xf1   :  { %v310_v15 = vadd.f32 %v495_v38, %v309_v12  ;;  %v346_v18 = vadd.f32 %v345_v14, %v331_v11 }
  0xf3   :  { %v311_v19 = vrot.slane %v310_v15, 4  ;;  %v347_v20 = vadd.f32 %v346_v18, %v332_v16 }
  0xf5   :  { %v312_v21 = vadd.f32 %v311_v19, %v310_v15  ;;  %v348_v13 = vrot.slane %v347_v20, 4 }
  0xf7   :  { %v313_v22 = vrot.slane %v312_v21, 2  ;;  %v349_v23 = vadd.f32 %v348_v13, %v347_v20 }
  0xf9   :  { %v314_v24 = vadd.f32 %v313_v22, %v312_v21  ;;  %v350_v17 = vrot.slane %v349_v23, 2 }
  0xfb   :  { %v315_v25 = vrot.slane %v314_v24, 1  ;;  %v351_v26 = vadd.f32 %v350_v17, %v349_v23 }
  0xfd   :  { %v352_v27 = vrot.slane %v351_v26, 1  ;;  %v316_v29 = vadd.f32 %v315_v25, %v314_v24 }
  0xff   :  { %v353_v30 = vadd.f32 %v352_v27, %v351_v26 }
 0x101   :  { %v355_v31 = vsel %vm354_vm2, %v316_v29, %v353_v30 }
 0x102   :  { %356 = vst [vmem:[%s606_s3] sm:$0x3] %v355_v31 }

// kernel: residual_block_forward.9
= control target key start
LH: loop header
LB: loop body
LE: loop exit
PB: predicated region body
PF: predicated region fallthrough
CT: control target
= control target key end

     0   :  { %s370_s0 = inlined_call_operand.vmem [shape: bf16[1,128,128], index: 0, kind: input, shape index: {}]   ;;  %s371_s1 = inlined_call_operand.vmem [shape: f32[1,128], index: 1, kind: input, shape index: {}]   ;;  %s372_s2 = inlined_call_operand.vmem [shape: f32[1,128], index: 2, kind: input, shape index: {}]   ;;  %s373_s3 = inlined_call_operand.vmem [shape: bf16[1,128,128], index: 3, kind: output, shape index: {}]  }
   0x1   :  { %v211_v0 = vld [vmem:[%s370_s0] sm:$0xff]   ;;  %v282_v4 = vld [vmem:[%s370_s0 + $0x8] sm:$0xff]   ;;  %v283_v5 = vld [vmem:[%s370_s0 + $0x10] sm:$0xff]  }
   0x2   :  { %v176_v1 = vld [vmem:[%s371_s1] ss:$0 sm:$0xff]  ;;  %v212_v2 = vunpack.c.l.bf16 %v211_v0  ;;  %v213_v3 = vunpack.c.h.bf16 %v211_v0  ;;  %v284_v6 = vld [vmem:[%s370_s0 + $0x18] sm:$0xff]   ;;  %v216_v8 = vunpack.c.l.bf16 %v282_v4  ;;  %v217_v9 = vunpack.c.h.bf16 %v282_v4  ;;  %v286_v25 = vld [vmem:[%s370_s0 + $0x28] sm:$0xff]  }
   0x3   :  { %v177_v7 = vld [vmem:[%s372_s2] ss:$0 sm:$0xff]  ;;  %v220_v10 = vunpack.c.l.bf16 %v283_v5  ;;  %v221_v11 = vunpack.c.h.bf16 %v283_v5  ;;  %v224_v14 = vunpack.c.l.bf16 %v284_v6  ;;  %v225_v15 = vunpack.c.h.bf16 %v284_v6  ;;  %v287_v30 = vld [vmem:[%s370_s0 + $0x30] sm:$0xff]   ;;  %v288_v35 = vld [vmem:[%s370_s0 + $0x38] sm:$0xff]  }
   0x4   :  { %v53_v12 = vmul.f32 %v212_v2, %v176_v1  ;;  %v54_v13 = vmul.f32 %v213_v3, %v176_v1  ;;  %v55_v16 = vmul.f32 %v216_v8, %v176_v1  ;;  %v56_v17 = vmul.f32 %v217_v9, %v176_v1  ;;  %v285_v20 = vld [vmem:[%s370_s0 + $0x20] sm:$0xff]  }
   0x5   :  { %v57_v18 = vmul.f32 %v220_v10, %v176_v1  ;;  %v58_v19 = vmul.f32 %v221_v11, %v176_v1  ;;  %v59_v23 = vmul.f32 %v224_v14, %v176_v1  ;;  %v60_v24 = vmul.f32 %v225_v15, %v176_v1 }
   0x6   :  { %v76_v21 = vadd.f32 %v177_v7, %v53_v12  ;;  %v77_v22 = vadd.f32 %v177_v7, %v54_v13  ;;  %v78_v26 = vadd.f32 %v177_v7, %v55_v16  ;;  %v79_v27 = vadd.f32 %v177_v7, %v56_v17 }
   0x7   :  { %v80_v28 = vadd.f32 %v177_v7, %v57_v18  ;;  %v81_v29 = vadd.f32 %v177_v7, %v58_v19  ;;  %v82_v32 = vadd.f32 %v177_v7, %v59_v23  ;;  %v83_v33 = vadd.f32 %v177_v7, %v60_v24 }
   0x8   :  { %v245_v31 = vpack.c.bf16 %v77_v22, %v76_v21  ;;  %v228_v34 = vunpack.c.l.bf16 %v285_v20  ;;  %v250_v36 = vpack.c.bf16 %v79_v27, %v78_v26  ;;  %v229_v38 = vunpack.c.h.bf16 %v285_v20 }
   0x9   :  { %v255_v37 = vpack.c.bf16 %v81_v29, %v80_v28  ;;  %v232_v39 = vunpack.c.l.bf16 %v286_v25  ;;  %v260_v40 = vpack.c.bf16 %v83_v33, %v82_v32  ;;  %v233_v42 = vunpack.c.h.bf16 %v286_v25 }
   0xa   :  { %246 = vst [vmem:[%s373_s3] sm:$0xff] %v245_v31   ;;  %v61_v41 = vmul.f32 %v228_v34, %v176_v1  ;;  %v236_v43 = vunpack.c.l.bf16 %v287_v30  ;;  %289 = vst [vmem:[%s373_s3 + $0x8] sm:$0xff] %v250_v36   ;;  %v62_v44 = vmul.f32 %v229_v38, %v176_v1  ;;  %v237_v46 = vunpack.c.h.bf16 %v287_v30 }
   0xb   :  { %290 = vst [vmem:[%s373_s3 + $0x10] sm:$0xff] %v255_v37   ;;  %v63_v45 = vmul.f32 %v232_v39, %v176_v1  ;;  %v240_v47 = vunpack.c.l.bf16 %v288_v35  ;;  %291 = vst [vmem:[%s373_s3 + $0x18] sm:$0xff] %v260_v40   ;;  %v64_v49 = vmul.f32 %v233_v42, %v176_v1  ;;  %v241_v51 = vunpack.c.h.bf16 %v288_v35 }
   0xc   :  { %v84_v48 = vadd.f32 %v177_v7, %v61_v41  ;;  %v65_v50 = vmul.f32 %v236_v43, %v176_v1  ;;  %v85_v52 = vadd.f32 %v177_v7, %v62_v44  ;;  %v66_v54 = vmul.f32 %v237_v46, %v176_v1 }
   0xd   :  { %v86_v53 = vadd.f32 %v177_v7, %v63_v45  ;;  %v67_v55 = vmul.f32 %v240_v47, %v176_v1  ;;  %v87_v56 = vadd.f32 %v177_v7, %v64_v49  ;;  %v68_v58 = vmul.f32 %v241_v51, %v176_v1 }
   0xe   :  { %v88_v57 = vadd.f32 %v177_v7, %v65_v50  ;;  %v265_v59 = vpack.c.bf16 %v85_v52, %v84_v48  ;;  %v89_v60 = vadd.f32 %v177_v7, %v66_v54 }
   0xf   :  { %v90_v61 = vadd.f32 %v177_v7, %v67_v55  ;;  %v270_v62 = vpack.c.bf16 %v87_v56, %v86_v53  ;;  %v91_v63 = vadd.f32 %v177_v7, %v68_v58 }
  0x10   :  { %292 = vst [vmem:[%s373_s3 + $0x20] sm:$0xff] %v265_v59   ;;  %v275_v0 = vpack.c.bf16 %v89_v60, %v88_v57 }
  0x11   :  { %293 = vst [vmem:[%s373_s3 + $0x28] sm:$0xff] %v270_v62   ;;  %v280_v2 = vpack.c.bf16 %v91_v63, %v90_v61 }
  0x12   :  { %294 = vst [vmem:[%s373_s3 + $0x30] sm:$0xff] %v275_v0  }
  0x13   :  { %295 = vst [vmem:[%s373_s3 + $0x38] sm:$0xff] %v280_v2  }

// kernel: residual_block_forward.8
= control target key start
LH: loop header
LB: loop body
LE: loop exit
PB: predicated region body
PF: predicated region fallthrough
CT: control target
= control target key end

     0   :  { %vm96_vm0 = vcmask 1043456   ;;  %vm71_vm1 = vcmask 64512   ;;  %vm335_vm2 = vcmask 1040384   ;;  %s562_s1 = inlined_call_operand.vmem [shape: bf16[8,128], index: 1, kind: input, shape index: {}]   ;;  %s563_s0 = inlined_call_operand.vmem [shape: bf16[128,8], index: 0, kind: input, shape index: {}]   ;;  %s564_s2 = inlined_call_operand.vmem [shape: bf16[128,128], index: 2, kind: output, shape index: {0}]   ;;  %s565_s3 = inlined_call_operand.vmem [shape: f32[1,2,128], index: 3, kind: output, shape index: {1}]  }
   0x1   :  { %v30_v0 = vld [vmem:[%s562_s1] sm:$0xf]  ;;  %v473_v3 = vld [vmem:[%s563_s0 + $0x8] sm:$0xff]   ;;  %v474_v4 = vld [vmem:[%s563_s0 + $0x10] sm:$0xff]  }
   0x2   :  { %470 = vmatprep.subr.msk.bf16.mxu0 %vm96_vm0, %v30_v0  ;;  %v98_v1 = vsel %vm96_vm0, %v30_v0, 0  ;;  %v472_v2 = vld [vmem:[%s563_s0] sm:$0xff]   ;;  %471 = vmatprep.subr.msk.bf16.mxu1 %vm96_vm0, %v30_v0  ;;  %v477_v6 = vld [vmem:[%s563_s0 + $0x28] sm:$0xff]   ;;  %v478_v7 = vld [vmem:[%s563_s0 + $0x30] sm:$0xff]  }
   0x3   :  { %451 = vmatpush3.bf16.msra.mxu0 %v98_v1  ;;  %469 = vmatpush3.bf16.msra.mxu1 %v98_v1  ;;  %v476_v5 = vld [vmem:[%s563_s0 + $0x20] sm:$0xff]   ;;  %v475_v8 = vld [vmem:[%s563_s0 + $0x18] sm:$0xff]  }
   0x4   :  { %452 = vmatprep.mubr.msk.bf16.mxu0 %vm71_vm1, %v472_v2  ;;  %460 = vmatprep.mubr.msk.bf16.mxu1 %vm71_vm1, %v476_v5  ;;  %v479_v9 = vld [vmem:[%s563_s0 + $0x38] sm:$0xff]  }
   0x6   :  { %453 = vmatmul.mubr.msk.bf16.vlgmr.msra.gmra.mxu0 %vm71_vm1, %v473_v3  ;;  %461 = vmatmul.mubr.msk.bf16.vlgmr.msra.gmra.mxu1 %vm71_vm1, %v477_v6 }
   0x7   :  { %456 = vmatprep.mubr.msk.bf16.mxu0 %vm71_vm1, %v474_v4  ;;  %464 = vmatprep.mubr.msk.bf16.mxu1 %vm71_vm1, %v478_v7 }
   0xe   :  { %457 = vmatmul.mubr.msk.bf16.gmra.mxu0 %vm71_vm1, %v475_v8  ;;  %465 = vmatmul.mubr.msk.bf16.gmra.mxu1 %vm71_vm1, %v479_v9 }
  0xc6   :  { %v454_v10 = vpop.f32.mrf.mxu0  ;;  %v462_v12 = vpop.f32.mrf.mxu1 }
  0xc7   :  { %v300_v24 = vmul.f32 %v454_v10, %v454_v10  ;;  %v308_v61 = vmul.f32 %v462_v12, %v462_v12 }
  0xc8   :  { %v134_v11 = vpop.f32.mrf.mxu0  ;;  %v166_v15 = vpop.f32.mrf.mxu1 }
  0xc9   :  { %v298_v17 = vmul.f32 %v134_v11, %v134_v11  ;;  %v306_v55 = vmul.f32 %v166_v15, %v166_v15 }
  0xca   :  { %v455_v13 = vpop.f32.mrf.mxu0  ;;  %v463_v21 = vpop.f32.mrf.mxu1 }
  0xcb   :  { %v402_v14 = vpack.c.bf16 %v455_v13, %v454_v10  ;;  %v422_v23 = vpack.c.bf16 %v463_v21, %v462_v12  ;;  %v301_v30 = vmul.f32 %v455_v13, %v455_v13  ;;  %v309_v0 = vmul.f32 %v463_v21, %v463_v21 }
  0xcc   :  { %v137_v16 = vpop.f32.mrf.mxu0  ;;  %v169_v27 = vpop.f32.mrf.mxu1 }
  0xcd   :  { %434 = vst [vmem:[%s564_s2 + $0x8] sm:$0xff] %v402_v14   ;;  %v397_v18 = vpack.c.bf16 %v137_v16, %v134_v11  ;;  %v277_v19 = vadd.f32 %v137_v16, %v134_v11  ;;  %v299_v20 = vmul.f32 %v137_v16, %v137_v16  ;;  %438 = vst [vmem:[%s564_s2 + $0x28] sm:$0xff] %v422_v23  }
  0xce   :  { %v458_v22 = vpop.f32.mrf.mxu0  ;;  %v417_v29 = vpack.c.bf16 %v169_v27, %v166_v15  ;;  %v466_v33 = vpop.f32.mrf.mxu1  ;;  %v307_v59 = vmul.f32 %v169_v27, %v169_v27 }
  0xcf   :  { %398 = vst [vmem:[%s564_s2] sm:$0xff] %v397_v18   ;;  %v278_v25 = vadd.f32 %v454_v10, %v277_v19  ;;  %v314_v26 = vadd.f32 %v299_v20, %v298_v17  ;;  %v304_v47 = vmul.f32 %v458_v22, %v458_v22  ;;  %v312_v9 = vmul.f32 %v466_v33, %v466_v33 }
  0xd0   :  { %v150_v28 = vpop.f32.mrf.mxu0  ;;  %437 = vst [vmem:[%s564_s2 + $0x20] sm:$0xff] %v417_v29   ;;  %v182_v39 = vpop.f32.mrf.mxu1 }
  0xd1   :  { %v315_v31 = vadd.f32 %v314_v26, %v300_v24  ;;  %v279_v32 = vadd.f32 %v455_v13, %v278_v25  ;;  %v302_v36 = vmul.f32 %v150_v28, %v150_v28  ;;  %v310_v4 = vmul.f32 %v182_v39, %v182_v39 }
  0xd2   :  { %v459_v34 = vpop.f32.mrf.mxu0  ;;  %v467_v45 = vpop.f32.mrf.mxu1 }
  0xd3   :  { %v280_v35 = vadd.f32 %v279_v32, %v150_v28  ;;  %v316_v37 = vadd.f32 %v315_v31, %v301_v30  ;;  %v412_v38 = vpack.c.bf16 %v459_v34, %v458_v22  ;;  %v432_v46 = vpack.c.bf16 %v467_v45, %v466_v33 }
  0xd4   :  { %v153_v40 = vpop.f32.mrf.mxu0  ;;  %v185_v50 = vpop.f32.mrf.mxu1  ;;  %v305_v52 = vmul.f32 %v459_v34, %v459_v34  ;;  %v313_v13 = vmul.f32 %v467_v45, %v467_v45 }
  0xd5   :  { %v317_v41 = vadd.f32 %v316_v37, %v302_v36  ;;  %436 = vst [vmem:[%s564_s2 + $0x18] sm:$0xff] %v412_v38   ;;  %v407_v42 = vpack.c.bf16 %v153_v40, %v150_v28  ;;  %v281_v43 = vadd.f32 %v280_v35, %v153_v40  ;;  %v303_v44 = vmul.f32 %v153_v40, %v153_v40 }
  0xd6   :  { %440 = vst [vmem:[%s564_s2 + $0x38] sm:$0xff] %v432_v46   ;;  %v427_v51 = vpack.c.bf16 %v185_v50, %v182_v39  ;;  %v311_v8 = vmul.f32 %v185_v50, %v185_v50 }
  0xd7   :  { %435 = vst [vmem:[%s564_s2 + $0x10] sm:$0xff] %v407_v42   ;;  %v282_v48 = vadd.f32 %v458_v22, %v281_v43  ;;  %v318_v49 = vadd.f32 %v317_v41, %v303_v44 }
  0xd8   :  { %439 = vst [vmem:[%s564_s2 + $0x30] sm:$0xff] %v427_v51  }
  0xd9   :  { %v283_v53 = vadd.f32 %v459_v34, %v282_v48  ;;  %v319_v54 = vadd.f32 %v318_v49, %v304_v47 }
  0xdb   :  { %v320_v56 = vadd.f32 %v319_v54, %v305_v52  ;;  %v284_v57 = vadd.f32 %v283_v53, %v166_v15 }
  0xdd   :  { %v285_v58 = vadd.f32 %v284_v57, %v169_v27  ;;  %v321_v60 = vadd.f32 %v320_v56, %v306_v55 }
  0xdf   :  { %v286_v62 = vadd.f32 %v462_v12, %v285_v58  ;;  %v322_v63 = vadd.f32 %v321_v60, %v307_v59 }
  0xe1   :  { %v323_v1 = vadd.f32 %v322_v63, %v308_v61  ;;  %v287_v2 = vadd.f32 %v463_v21, %v286_v62 }
  0xe3   :  { %v288_v3 = vadd.f32 %v287_v2, %v182_v39  ;;  %v324_v5 = vadd.f32 %v323_v1, %v309_v0 }
  0xe5   :  { %v325_v6 = vadd.f32 %v324_v5, %v310_v4  ;;  %v289_v7 = vadd.f32 %v288_v3, %v185_v50 }
  0xe7   :  { %v290_v10 = vadd.f32 %v466_v33, %v289_v7  ;;  %v326_v11 = vadd.f32 %v325_v6, %v311_v8 }
  0xe9   :  { %v291_v14 = vadd.f32 %v467_v45, %v290_v10  ;;  %v327_v15 = vadd.f32 %v326_v11, %v312_v9 }
  0xeb   :  { %v292_v16 = vrot.slane %v291_v14, 4  ;;  %v328_v17 = vadd.f32 %v327_v15, %v313_v13 }
  0xed   :  { %v293_v18 = vadd.f32 %v292_v16, %v291_v14  ;;  %v329_v12 = vrot.slane %v328_v17, 4 }
  0xef   :  { %v294_v19 = vrot.slane %v293_v18, 2  ;;  %v330_v20 = vadd.f32 %v329_v12, %v328_v17 }
  0xf1   :  { %v295_v22 = vadd.f32 %v294_v19, %v293_v18  ;;  %v331_v21 = vrot.slane %v330_v20, 2 }
  0xf3   :  { %v296_v23 = vrot.slane %v295_v22, 1  ;;  %v332_v24 = vadd.f32 %v331_v21, %v330_v20 }
  0xf5   :  { %v333_v25 = vrot.slane %v332_v24, 1  ;;  %v297_v26 = vadd.f32 %v296_v23, %v295_v22 }
  0xf7   :  { %v334_v27 = vadd.f32 %v333_v25, %v332_v24 }
  0xf9   :  { %v336_v28 = vsel %vm335_vm2, %v297_v26, %v334_v27 }
  0xfa   :  { %337 = vst [vmem:[%s565_s3] sm:$0x3] %v336_v28 }

// kernel: residual_block_forward.11
= control target key start
LH: loop header
LB: loop body
LE: loop exit
PB: predicated region body
PF: predicated region fallthrough
CT: control target
= control target key end

     0   :  { %s492_s15 = smov 0   ;;  %s572_s0 = inlined_call_operand.vmem [shape: bf16[2,80,128], index: 0, kind: input, shape index: {}]   ;;  %s573_s1 = inlined_call_operand.vmem [shape: f32[1,128], index: 1, kind: input, shape index: {}]   ;;  %s574_s2 = inlined_call_operand.vmem [shape: f32[1,128], index: 2, kind: input, shape index: {}]   ;;  %s575_s3 = inlined_call_operand.vmem [shape: bf16[2,80,128], index: 3, kind: input, shape index: {}]   ;;  %s576_s4 = inlined_call_operand.vmem [shape: f32[2,80,128], index: 4, kind: output, shape index: {}]  }
   0x1 LB: > { %s389_s16 = sadd.s32 4294967295, %s465_s15   ;;  %p393_p0 = scmp.ge.s32.totalorder %s465_s15, 1  ;;  %s465_s15 = sphi %s492_s15, %s14_s15  }
   0x2   : > { %p172_p1 = scmp.lt.s32.totalorder %s465_s15, 3 }
   0x4   : > { %p173_p2 = pnand %p393_p0, %p172_p1 }
   0x5   : > { %p203_p3 = scmp.lt.s32.totalorder (!%p173_p2), %s389_s16, 1 }
   0x6   : > { %176 = sbr.rel (%p173_p2) target bundleno = 38 (0x26), region = 36 }
   0xb   : > { %s578_s16 = smov (!%p203_p3, %s389_s16), 1  ;;  %v516_v0 = vld [vmem:[%s573_s1] ss:$0 sm:$0xff] }
   0xc   : > { %s449_s17 = smul.u32 40, %s578_s16  ;;  %v527_v11 = vld [vmem:[%s574_s2] ss:$0 sm:$0xff] }
   0xd   : > { %s450_s28 = smul.u32 80, %s578_s16 }
   0xe   : > { %s506_s20 = scalar_lea.vmem %s572_s0, %s449_s17  ;;  %s511_s23 = scalar_lea.vmem %s575_s3, %s449_s17 }
   0xf   : > { %v402_v1 = vld [vmem:[%s506_s20] sm:$0xff]   ;;  %v441_v3 = vld [vmem:[%s506_s20 + $0x8] sm:$0xff]   ;;  %v442_v9 = vld [vmem:[%s506_s20 + $0x10] sm:$0xff]   ;;  %s547_s5 = scalar_lea.vmem %s576_s4, %s450_s28 }
  0x10   : > { %v422_v2 = vld [vmem:[%s511_s23] sm:$0xff]   ;;  %v403_v4 = vunpack.c.l.bf16 %v402_v1  ;;  %v404_v6 = vunpack.c.h.bf16 %v402_v1  ;;  %v445_v8 = vld [vmem:[%s511_s23 + $0x8] sm:$0xff]   ;;  %v446_v10 = vld [vmem:[%s511_s23 + $0x10] sm:$0xff]   ;;  %v407_v12 = vunpack.c.l.bf16 %v441_v3  ;;  %v408_v14 = vunpack.c.h.bf16 %v441_v3 }
  0x11   : > { %v423_v5 = vunpack.c.l.bf16 %v422_v2  ;;  %v424_v7 = vunpack.c.h.bf16 %v422_v2  ;;  %v427_v13 = vunpack.c.l.bf16 %v445_v8  ;;  %v428_v15 = vunpack.c.h.bf16 %v445_v8  ;;  %v443_v16 = vld [vmem:[%s506_s20 + $0x18] sm:$0xff]   ;;  %v444_v42 = vld [vmem:[%s506_s20 + $0x20] sm:$0xff]  }
  0x12   : > { %v245_v17 = vmul.f32 %v403_v4, %v516_v0  ;;  %v246_v18 = vmul.f32 %v404_v6, %v516_v0  ;;  %v411_v19 = vunpack.c.l.bf16 %v442_v9  ;;  %v431_v20 = vunpack.c.l.bf16 %v446_v10  ;;  %v447_v21 = vld [vmem:[%s511_s23 + $0x18] sm:$0xff]   ;;  %v448_v51 = vld [vmem:[%s511_s23 + $0x20] sm:$0xff]  }
  0x13   : > { %v247_v22 = vmul.f32 %v407_v12, %v516_v0  ;;  %v248_v23 = vmul.f32 %v408_v14, %v516_v0  ;;  %v412_v24 = vunpack.c.h.bf16 %v442_v9  ;;  %v432_v25 = vunpack.c.h.bf16 %v446_v10 }
  0x14   : > { %v262_v26 = vadd.f32 %v527_v11, %v245_v17  ;;  %v263_v27 = vadd.f32 %v527_v11, %v246_v18  ;;  %v249_v28 = vmul.f32 %v411_v19, %v516_v0  ;;  %v415_v29 = vunpack.c.l.bf16 %v443_v16 }
  0x15   : > { %v264_v30 = vadd.f32 %v527_v11, %v247_v22  ;;  %v265_v31 = vadd.f32 %v527_v11, %v248_v23  ;;  %v250_v32 = vmul.f32 %v412_v24, %v516_v0  ;;  %v435_v33 = vunpack.c.l.bf16 %v447_v21 }
  0x16   : > { %v292_v34 = vadd.f32 %v423_v5, %v262_v26  ;;  %v293_v35 = vadd.f32 %v424_v7, %v263_v27  ;;  %v266_v36 = vadd.f32 %v527_v11, %v249_v28  ;;  %v251_v37 = vmul.f32 %v415_v29, %v516_v0 }
  0x17   : > { %v294_v38 = vadd.f32 %v427_v13, %v264_v30  ;;  %v295_v39 = vadd.f32 %v428_v15, %v265_v31  ;;  %v267_v40 = vadd.f32 %v527_v11, %v250_v32  ;;  %v416_v41 = vunpack.c.h.bf16 %v443_v16 }
  0x18   : > { %v302_v43 = vmax.f32 %v292_v34, 0.0  ;;  %v303_v44 = vmax.f32 %v293_v35, 0.0  ;;  %v296_v45 = vadd.f32 %v431_v20, %v266_v36  ;;  %v268_v46 = vadd.f32 %v527_v11, %v251_v37 }
  0x19   : > { %v304_v47 = vmax.f32 %v294_v38, 0.0  ;;  %v305_v48 = vmax.f32 %v295_v39, 0.0  ;;  %v297_v49 = vadd.f32 %v432_v25, %v267_v40  ;;  %v252_v50 = vmul.f32 %v416_v41, %v516_v0 }
  0x1a   : > { %312 = vst [vmem:[%s547_s5] sm:$0xff] %v302_v43  ;;  %313 = vst [vmem:[%s547_s5 + $0x8] sm:$0xff] %v303_v44  ;;  %v306_v52 = vmax.f32 %v296_v45, 0.0  ;;  %v298_v53 = vadd.f32 %v435_v33, %v268_v46  ;;  %v436_v54 = vunpack.c.h.bf16 %v447_v21  ;;  %v419_v55 = vunpack.c.l.bf16 %v444_v42 }
  0x1b   : > { %314 = vst [vmem:[%s547_s5 + $0x10] sm:$0xff] %v304_v47  ;;  %315 = vst [vmem:[%s547_s5 + $0x18] sm:$0xff] %v305_v48  ;;  %v307_v56 = vmax.f32 %v297_v49, 0.0  ;;  %v269_v57 = vadd.f32 %v527_v11, %v252_v50  ;;  %v420_v58 = vunpack.c.h.bf16 %v444_v42  ;;  %v439_v61 = vunpack.c.l.bf16 %v448_v51 }
  0x1c   : > { %316 = vst [vmem:[%s547_s5 + $0x20] sm:$0xff] %v306_v52  ;;  %v308_v59 = vmax.f32 %v298_v53, 0.0  ;;  %v253_v60 = vmul.f32 %v419_v55, %v516_v0  ;;  %v440_v1 = vunpack.c.h.bf16 %v448_v51 }
  0x1d   : > { %317 = vst [vmem:[%s547_s5 + $0x28] sm:$0xff] %v307_v56  ;;  %v299_v62 = vadd.f32 %v436_v54, %v269_v57  ;;  %v254_v63 = vmul.f32 %v420_v58, %v516_v0 }
  0x1e   : > { %318 = vst [vmem:[%s547_s5 + $0x30] sm:$0xff] %v308_v59  ;;  %v270_v2 = vadd.f32 %v527_v11, %v253_v60 }
  0x1f   : > { %v309_v3 = vmax.f32 %v299_v62, 0.0  ;;  %v271_v4 = vadd.f32 %v527_v11, %v254_v63 }
  0x20   : > { %v300_v5 = vadd.f32 %v439_v61, %v270_v2 }
  0x21   : > { %319 = vst [vmem:[%s547_s5 + $0x38] sm:$0xff] %v309_v3  ;;  %v301_v6 = vadd.f32 %v440_v1, %v271_v4 }
  0x22   : > { %v310_v7 = vmax.f32 %v300_v5, 0.0 }
  0x23   : > { %v311_v8 = vmax.f32 %v301_v6, 0.0 }
  0x24   : > { %320 = vst [vmem:[%s547_s5 + $0x40] sm:$0xff] %v310_v7 }
  0x25   : > { %321 = vst [vmem:[%s547_s5 + $0x48] sm:$0xff] %v311_v8 }
  0x26 PF: > { %s14_s15 = sadd.s32 1, %s465_s15  }
  0x27   : > { %p11_p4 = scmp.ge.s32.totalorder %s14_s15, 4  }
  0x29   :  { %13 = sbr.rel (!%p11_p4) target bundleno = 1 (0x1), region = 69 }

// kernel: residual_block_forward.10
= control target key start
LH: loop header
LB: loop body
LE: loop exit
PB: predicated region body
PF: predicated region fallthrough
CT: control target
= control target key end

     0   :  { %s2055_s15 = smov 0   ;;  %s2884_s0 = inlined_call_operand.vmem [shape: bf16[2,120,8], index: 0, kind: input, shape index: {}]   ;;  %s2885_s1 = inlined_call_operand.vmem [shape: bf16[72,128], index: 1, kind: input, shape index: {}]   ;;  %s2886_s2 = inlined_call_operand.vmem [shape: f32[80,1], index: 2, kind: input, shape index: {}]   ;;  %s2887_s3 = inlined_call_operand.vmem [shape: bf16[2,80,128], index: 3, kind: output, shape index: {0}]   ;;  %s2888_s4 = inlined_call_operand.vmem [shape: f32[2,2,128], index: 4, kind: output, shape index: {1}]  }
   0x1 LB: > { %s1850_s16 = sadd.s32 4294967295, %s2017_s15   ;;  %p1854_p0 = scmp.ge.s32.totalorder %s2017_s15, 1  ;;  %s2017_s15 = sphi %s2055_s15, %s15_s15  }
   0x2   : > { %p165_p1 = scmp.lt.s32.totalorder %s2017_s15, 3 }
   0x4   : > { %p166_p2 = pnand %p1854_p0, %p165_p1 }
   0x5   : > { %p195_p3 = scmp.lt.s32.totalorder (!%p166_p2), %s1850_s16, 1  ;;  %s2019_s21 = smov (!%p166_p2), 8  }
   0x6   : > { %169 = sbr.rel (%p166_p2) target bundleno = 520 (0x208), region = 32  ;;  %s2020_s22 = smov (!%p166_p2), 32  }
   0x7   : > { %s2021_s23 = smov (!%p166_p2), 16   ;;  %s2022_s24 = smov (!%p166_p2), 24  }
   0x8   : > { %s2023_s25 = smov (!%p166_p2), 40   ;;  %s2024_s26 = smov (!%p166_p2), 48  }
   0x9   : > { %s2025_s27 = smov (!%p166_p2), 56   ;;  %s2026_s28 = smov (!%p166_p2), 64  }
   0xb   : > { %s2904_s16 = smov (!%p195_p3, %s1850_s16), 1  ;;  %vm371_vm0 = vcmask 1042432   ;;  %vm372_vm1 = vcmask 1046532   ;;  %vm791_vm2 = vcmask 1041408   ;;  %vm792_vm3 = vcmask 1045508  }
   0xc   : > { %s1978_s17 = smul.u32 60, %s2904_s16  ;;  %vm457_vm4 = vsmask.f32 2304  ;;  %vm2071_vm5 = vmor %vm371_vm0, %vm372_vm1  ;;  %vm458_vm6 = vsmask.f32 6416  ;;  %vm1211_vm11 = vcmask 1040384  }
   0xd   : > { %vm2081_vm7 = vmor %vm791_vm2, %vm792_vm3  ;;  %vm877_vm8 = vsmask.f32 1280  ;;  %vm878_vm9 = vsmask.f32 5392  ;;  %vm1212_vm12 = vcmask 1044484   ;;  %s1979_s9 = smul.u32 40, %s2904_s16 }
   0xe   : > { %s2069_s20 = scalar_lea.vmem %s2884_s0, %s1978_s17  ;;  %vm2114_vm10 = vmor %vm457_vm4, %vm458_vm6  ;;  %vm1297_vm13 = vsmask.f32 256  ;;  %vm1298_vm15 = vsmask.f32 4368  ;;  %vm221_vm2 = vsmask.f32 3328 }
   0xf   : > { %v349_v1 = vld [vmem:[%s2069_s20 + $0x4] sm:$0xe]  ;;  %v350_v2 = vld [vmem:[%s2069_s20 + $0x8] sm:$0xf]  ;;  %v770_v3 = vld [vmem:[%s2069_s20 + $0xc] sm:$0xf]  ;;  %s2869_s12 = scalar_lea.vmem %s2887_s3, %s1979_s9 }
  0x10   : > { %v1858_v4 = vrot.slane %v349_v1, 9  ;;  %v376_v5 = vrot.slane %v350_v2, 5  ;;  %v2079_v6 = vld [vmem:[%s2069_s20 + $0x10] sm:$0xf]  ;;  %v796_v7 = vrot.slane %v770_v3, 6  ;;  %vm2149_vm14 = vmor %vm877_vm8, %vm878_vm9  ;;  %vm338_vm4 = vcmask 60416  }
  0x11   : > { %v799_v9 = vrot.slane %v2079_v6, 6  ;;  %v769_v10 = vld [vmem:[%s2069_s20 + $0x8] sm:$0xc]  ;;  %v446_v11 = vld [vmem:[%s2069_s20 + $0x4] sm:$0xe]  ;;  %vm2181_vm0 = vmor %vm1211_vm11, %vm1212_vm12  ;;  %vm1522_vm8 = vcmask 1043456  }
  0x12   : > { %v377_v12 = vsel %vm2071_vm5, %v1858_v4, %v376_v5  ;;  %v798_v13 = vrot.slane %v796_v7, 4  ;;  %v1859_v14 = vrot.slane %v769_v10, 10  ;;  %v447_v15 = vld [vmem:[%s2069_s20 + $0x8] sm:$0xf]  ;;  %v461_v16 = vshrl.u32 %v446_v11, 16  ;;  %vm2196_vm1 = vmor %vm1297_vm13, %vm1298_vm15  ;;  %s1857_s13 = sshll.u32 %s2904_s16, 1 }
  0x13   : > { %405 = vrot.lane.b32.xlu0 %v377_v12, %s2019_s21  ;;  %v464_v17 = vshll.u32 %v446_v11, 16  ;;  %v470_v18 = vshrl.u32 %v447_v15, 16  ;;  %v473_v19 = vshll.u32 %v447_v15, 16  ;;  %v2093_v20 = vld [vmem:[%s2069_s20 + $0xc] sm:$0xf]  ;;  %v378_v21 = vrot.slane %v376_v5, 4  ;;  %s208_s18 = scalar_lea.vmem %s2888_s4, %s1857_s13 }
  0x14   : > { %v800_v22 = vsel %vm2081_vm7, %v798_v13, %v799_v9  ;;  %v797_v23 = vsel %vm2081_vm7, %v1859_v14, %v796_v7  ;;  %v463_v24 = vrot.slane %v461_v16, 5  ;;  %v379_v25 = vrot.slane %v2093_v20, 5  ;;  %v448_v26 = vld [vmem:[%s2069_s20 + $0xc] sm:$0xf]  ;;  %v609_v27 = vld [vmem:[%s2069_s20 + $0x8] sm:$0xe] }
  0x15   : > { %827 = vrot.lane.b32.xlu1 %v800_v22, %s2020_s22  ;;  %v466_v28 = vrot.slane %v464_v17, 6  ;;  %v472_v29 = vrot.slane %v470_v18, 5  ;;  %v475_v30 = vrot.slane %v473_v19, 6  ;;  %v480_v31 = vshrl.u32 %v448_v26, 16  ;;  %v610_v32 = vld [vmem:[%s2069_s20 + $0xc] sm:$0xf] }
  0x16   : > { %v380_v33 = vsel %vm2071_vm5, %v378_v21, %v379_v25  ;;  %v483_v34 = vshll.u32 %v448_v26, 16  ;;  %v621_v35 = vshrl.u32 %v609_v27, 16  ;;  %v624_v36 = vshll.u32 %v609_v27, 16  ;;  %v611_v37 = vld [vmem:[%s2069_s20 + $0x10] sm:$0xf] }
  0x17   : > { %825 = vrot.lane.b32.xlu0 %v797_v23, %s2020_s22  ;;  %v467_v38 = vor.u32 %v466_v28, %v463_v24  ;;  %v476_v39 = vor.u32 %v475_v30, %v472_v29  ;;  %v482_v40 = vrot.slane %v480_v31, 5  ;;  %v630_v41 = vshrl.u32 %v610_v32, 16  ;;  %v867_v47 = vld [vmem:[%s2069_s20 + $0xc] sm:$0xf]  ;;  %v868_v56 = vld [vmem:[%s2069_s20 + $0x10] sm:$0xf] }
  0x18   : > { %v485_v43 = vrot.slane %v483_v34, 6  ;;  %v623_v44 = vrot.slane %v621_v35, 5  ;;  %v626_v45 = vrot.slane %v624_v36, 6  ;;  %v633_v46 = vshll.u32 %v610_v32, 16  ;;  %v866_v61 = vld [vmem:[%s2069_s20 + $0x8] sm:$0xc] }
  0x19   : > { %v468_v48 = vrot.slane %v467_v38, 4  ;;  %v478_v49 = vrot.slane %v476_v39, 4  ;;  %v632_v50 = vrot.slane %v630_v41, 5  ;;  %v640_v51 = vshrl.u32 %v611_v37, 16  ;;  %v1030_v10 = vld [vmem:[%s2069_s20 + $0x10] sm:$0xf] }
  0x1a   : > { %v2119_v52 = vor.u32 %v485_v43, %v482_v40  ;;  %v627_v53 = vor.u32 %v626_v45, %v623_v44  ;;  %v635_v54 = vrot.slane %v633_v46, 6  ;;  %v643_v55 = vshll.u32 %v611_v37, 16  ;;  %v1031_v15 = vld [vmem:[%s2069_s20 + $0x14] sm:$0xf]  ;;  %v1029_v21 = vld [vmem:[%s2069_s20 + $0xc] sm:$0xc] }
  0x1b   : > { %v477_v57 = vsel %vm2114_vm10, %v468_v48, %v476_v39  ;;  %407 = vrot.lane.b32.xlu0 %v380_v33, %s2019_s21  ;;  %v642_v58 = vrot.slane %v640_v51, 5  ;;  %v890_v59 = vshrl.u32 %v867_v47, 16  ;;  %v893_v60 = vshll.u32 %v867_v47, 16  ;;  %v2145_v31 = vld [vmem:[%s2069_s20 + $0x10] sm:$0xf] }
  0x1c   : > { %568 = vrot.lane.b32.xlu1 %v477_v57, %s2021_s23  ;;  %v487_v62 = vsel %vm2114_vm10, %v478_v49, %v2119_v52  ;;  %v628_v63 = vrot.slane %v627_v53, 4  ;;  %v636_v1 = vor.u32 %v635_v54, %v632_v50  ;;  %v645_v2 = vrot.slane %v643_v55, 6  ;;  %v2154_v37 = vld [vmem:[%s2069_s20 + $0x14] sm:$0xf]  ;;  %v1189_v41 = vld [vmem:[%s2069_s20 + $0xc] sm:$0x8] }
  0x1d   : > { %v892_v3 = vrot.slane %v890_v59, 6  ;;  %v895_v4 = vrot.slane %v893_v60, 7  ;;  %v900_v5 = vshrl.u32 %v868_v56, 16  ;;  %v903_v7 = vshll.u32 %v868_v56, 16  ;;  %v1287_v43 = vld [vmem:[%s2069_s20 + $0x10] sm:$0xf] }
  0x1e   : > { %v637_v11 = vsel %vm2114_vm10, %v628_v63, %v636_v1  ;;  %v638_v12 = vrot.slane %v636_v1, 4  ;;  %v2133_v13 = vor.u32 %v645_v2, %v642_v58  ;;  %v881_v14 = vshrl.u32 %v866_v61, 16  ;;  %v1288_v48 = vld [vmem:[%s2069_s20 + $0x14] sm:$0xf]  ;;  %v1286_v57 = vld [vmem:[%s2069_s20 + $0xc] sm:$0x8] }
  0x1f   : > { %728 = vrot.lane.b32.xlu0 %v637_v11, %s2022_s24  ;;  %v896_v16 = vor.u32 %v895_v4, %v892_v3  ;;  %v902_v17 = vrot.slane %v900_v5, 6  ;;  %v905_v18 = vrot.slane %v903_v7, 7  ;;  %v884_v19 = vshll.u32 %v866_v61, 16  ;;  %v352_v3 = vld [vmem:[%s2069_s20 + $0x10] sm:$0xf] }
  0x20   : > { %570 = vrot.lane.b32.xlu1 %v487_v62, %s2021_s23  ;;  %v647_v22 = vsel %vm2114_vm10, %v638_v12, %v2133_v13  ;;  %v883_v23 = vrot.slane %v881_v14, 6  ;;  %v1050_v24 = vshrl.u32 %v1030_v10, 16  ;;  %v1053_v26 = vshll.u32 %v1030_v10, 16  ;;  %v449_v11 = vld [vmem:[%s2069_s20 + $0x10] sm:$0xf] }
  0x21   : > { %v898_v27 = vrot.slane %v896_v16, 4  ;;  %v2142_v28 = vor.u32 %v905_v18, %v902_v17  ;;  %v886_v29 = vrot.slane %v884_v19, 7  ;;  %v1060_v30 = vshrl.u32 %v1031_v15, 16  ;;  %v450_v14 = vld [vmem:[%s2069_s20 + $0x14] sm:$0xf] }
  0x22   : > { %v1052_v33 = vrot.slane %v1050_v24, 6  ;;  %v1055_v34 = vrot.slane %v1053_v26, 7  ;;  %v1063_v35 = vshll.u32 %v1031_v15, 16  ;;  %v1041_v36 = vshrl.u32 %v1029_v21, 16  ;;  %v2190_v18 = vld [vmem:[%s2069_s20 + $0x14] sm:$0xf] }
  0x23   : > { %v887_v38 = vor.u32 %v886_v29, %v883_v23  ;;  %v1062_v39 = vrot.slane %v1060_v30, 6  ;;  %v1044_v40 = vshll.u32 %v1029_v21, 16  ;;  %v1216_v47 = vrot.slane %v2145_v31, 7  ;;  %v1650_v21 = vld [vmem:[%s2886_s2 + $0x8] sm:$0xff] }
  0x24   : > { %730 = vrot.lane.b32.xlu1 %v647_v22, %s2022_s24  ;;  %v1056_v44 = vor.u32 %v1055_v34, %v1052_v33  ;;  %v1065_v45 = vrot.slane %v1063_v35, 7  ;;  %v1043_v46 = vrot.slane %v1041_v36, 6  ;;  %v907_v49 = vsel %vm2149_vm14, %v898_v27, %v2142_v28  ;;  %v612_v27 = vld [vmem:[%s2069_s20 + $0x14] sm:$0xf]  ;;  %v613_v34 = vld [vmem:[%s2069_s20 + $0x18] sm:$0xf] }
  0x25   : > { %v888_v50 = vrot.slane %v887_v38, 4  ;;  %v1046_v51 = vrot.slane %v1044_v40, 7  ;;  %v1219_v55 = vrot.slane %v2154_v37, 7  ;;  %v1306_v56 = vshrl.u32 %v1287_v43, 16 }
  0x26   : > { %v1058_v53 = vrot.slane %v1056_v44, 4  ;;  %v2164_v54 = vor.u32 %v1065_v45, %v1062_v39  ;;  %v1860_v60 = vrot.slane %v1189_v41, 11  ;;  %v1315_v61 = vshrl.u32 %v1288_v48, 16 }
  0x27   : > { %v897_v58 = vsel %vm2149_vm14, %v888_v50, %v896_v16  ;;  %v1047_v59 = vor.u32 %v1046_v51, %v1043_v46  ;;  %v1218_v63 = vrot.slane %v1216_v47, 4  ;;  %v1308_v1 = vrot.slane %v1306_v56, 7  ;;  %v869_v51 = vld [vmem:[%s2069_s20 + $0x14] sm:$0xf] }
  0x28   : > { %990 = vrot.lane.b32.xlu1 %v907_v49, %s2023_s25  ;;  %988 = vrot.lane.b32.xlu0 %v897_v58, %s2023_s25  ;;  %v1067_v62 = vsel %vm2149_vm14, %v1058_v53, %v2164_v54  ;;  %v1318_v2 = vshll.u32 %v1288_v48, 16  ;;  %v2176_v5 = vrot.slane %v1315_v61, 7  ;;  %v1301_v7 = vshrl.u32 %v1286_v57, 16 }
  0x29   : > { %v1048_v4 = vrot.slane %v1047_v59, 4  ;;  %v1309_v10 = vshll.u32 %v1287_v43, 16  ;;  %v1313_v16 = vrot.slane %v1308_v1, 4  ;;  %v382_v19 = vrot.slane %v352_v3, 5  ;;  %v772_v59 = vld [vmem:[%s2069_s20 + $0x14] sm:$0xf] }
  0x2a   : > { %v1320_v17 = vor.u32 %v1318_v2, %v2176_v5  ;;  %v1861_v22 = vrot.slane %v1301_v7, 11  ;;  %v490_v24 = vshrl.u32 %v449_v11, 16  ;;  %v493_v26 = vshll.u32 %v449_v11, 16  ;;  %v870_v3 = vld [vmem:[%s2069_s20 + $0x18] sm:$0xf] }
  0x2b   : > { %v1057_v15 = vsel %vm2149_vm14, %v1048_v4, %v1056_v44  ;;  %v1311_v23 = vor.u32 %v1309_v10, %v1308_v1  ;;  %v1220_v29 = vsel %vm2181_vm0, %v1218_v63, %v1219_v55  ;;  %v1217_v30 = vsel %vm2181_vm0, %v1860_v60, %v1216_v47  ;;  %v1032_v4 = vld [vmem:[%s2069_s20 + $0x18] sm:$0xf] }
  0x2c   : > { %1150 = vrot.lane.b32.xlu1 %v1067_v62, %s2024_s26  ;;  %1148 = vrot.lane.b32.xlu0 %v1057_v15, %s2024_s26  ;;  %v500_v31 = vshrl.u32 %v450_v14, 16  ;;  %v503_v33 = vshll.u32 %v450_v14, 16  ;;  %v385_v35 = vrot.slane %v2190_v18, 5  ;;  %v381_v36 = vrot.slane %v379_v25, 4  ;;  %v2238_v15 = vld [vmem:[%s2069_s20 + $0x18] sm:$0xf] }
  0x2d   : > { %v492_v38 = vrot.slane %v490_v24, 5  ;;  %v495_v39 = vrot.slane %v493_v26, 6  ;;  %v1321_v40 = vsel %vm2196_vm1, %v1313_v16, %v1320_v17  ;;  %v384_v41 = vrot.slane %v382_v19, 4  ;;  %v1033_v26 = vld [vmem:[%s2069_s20 + $0x1c] sm:$0xf] }
  0x2e   : > { %v650_v43 = vshrl.u32 %v612_v27, 16  ;;  %v653_v44 = vshll.u32 %v612_v27, 16  ;;  %v1312_v45 = vsel %vm2196_vm1, %v1861_v22, %v1311_v23  ;;  %v502_v20 = vrot.slane %v500_v31, 5 }
  0x2f   : > { %v660_v25 = vshrl.u32 %v613_v34, 16  ;;  %v663_v46 = vshll.u32 %v613_v34, 16  ;;  %v496_v47 = vor.u32 %v495_v39, %v492_v38  ;;  %v505_v48 = vrot.slane %v503_v33, 6 }
  0x30   : > { %1247 = vrot.lane.b32.xlu1 %v1220_v29, %s2025_s27  ;;  %1245 = vrot.lane.b32.xlu0 %v1217_v30, %s2025_s27  ;;  %v652_v49 = vrot.slane %v650_v43, 5  ;;  %v655_v50 = vrot.slane %v653_v44, 6  ;;  %v383_v58 = vsel %vm2071_vm5, %v381_v36, %v382_v19  ;;  %v910_v60 = vshrl.u32 %v869_v51, 16 }
  0x31   : > { %v662_v56 = vrot.slane %v660_v25, 5  ;;  %v665_v57 = vrot.slane %v663_v46, 6  ;;  %v913_v61 = vshll.u32 %v869_v51, 16  ;;  %v386_v62 = vsel %vm2071_vm5, %v384_v41, %v385_v35 }
  0x32   : > { %v656_v53 = vor.u32 %v655_v50, %v652_v49  ;;  %v498_v63 = vrot.slane %v496_v47, 4  ;;  %v2227_v1 = vor.u32 %v505_v48, %v502_v20  ;;  %v488_v2 = vrot.slane %v2119_v52, 4  ;;  %v1192_v48 = vld [vmem:[%s2069_s20 + $0x18] sm:$0xf]  ;;  %v1290_v50 = vld [vmem:[%s2069_s20 + $0x1c] sm:$0xf] }
  0x33   : > { %v2232_v10 = vor.u32 %v665_v57, %v662_v56  ;;  %v648_v11 = vrot.slane %v2133_v13, 4  ;;  %v802_v14 = vrot.slane %v772_v59, 6  ;;  %v912_v16 = vrot.slane %v910_v60, 6  ;;  %v1289_v49 = vld [vmem:[%s2069_s20 + $0x18] sm:$0xf] }
  0x34   : > { %1396 = vrot.lane.b32.xlu1 %v1321_v40, %s2026_s28  ;;  %1394 = vrot.lane.b32.xlu0 %v1312_v45, %s2026_s28  ;;  %v658_v7 = vrot.slane %v656_v53, 4  ;;  %v915_v17 = vrot.slane %v913_v61, 7  ;;  %v920_v19 = vshrl.u32 %v870_v3, 16  ;;  %v923_v22 = vshll.u32 %v870_v3, 16  ;;  %v2276_v56 = vld [vmem:[%s2069_s20 + $0x1c] sm:$0xf] }
  0x35   : > { %v507_v52 = vsel %vm2114_vm10, %v498_v63, %v2227_v1  ;;  %v497_v23 = vsel %vm2114_vm10, %v488_v2, %v496_v47  ;;  %v1070_v24 = vshrl.u32 %v1032_v4, 16  ;;  %v1073_v13 = vshll.u32 %v1032_v4, 16  ;;  %v451_v4 = vld [vmem:[%s2069_s20 + $0x18] sm:$0xf] }
  0x36   : > { %v657_v27 = vsel %vm2114_vm10, %v648_v11, %v656_v53  ;;  %v804_v29 = vrot.slane %v802_v14, 4  ;;  %v805_v30 = vrot.slane %v2238_v15, 6  ;;  %v801_v31 = vrot.slane %v799_v9, 4 }
  0x37   : > { %v667_v33 = vsel %vm2114_vm10, %v658_v7, %v2232_v10  ;;  %v916_v34 = vor.u32 %v915_v17, %v912_v16  ;;  %v922_v36 = vrot.slane %v920_v19, 6  ;;  %v925_v38 = vrot.slane %v923_v22, 7  ;;  %v354_v17 = vld [vmem:[%s2069_s20 + $0x18] sm:$0xf]  ;;  %v356_v19 = vld [vmem:[%s2069_s20 + $0x20] sm:$0xf] }
  0x38   : > { %411 = vrot.lane.b32.xlu1 %v386_v62, %s2019_s21  ;;  %409 = vrot.lane.b32.xlu0 %v383_v58, %s2019_s21  ;;  %v1072_v39 = vrot.slane %v1070_v24, 6  ;;  %v1075_v40 = vrot.slane %v1073_v13, 7  ;;  %v1080_v41 = vshrl.u32 %v1033_v26, 16  ;;  %v1083_v43 = vshll.u32 %v1033_v26, 16  ;;  %v452_v22 = vld [vmem:[%s2069_s20 + $0x1c] sm:$0xf] }
  0x39   : > { %v806_v6 = vsel %vm2081_vm7, %v804_v29, %v805_v30  ;;  %v803_v9 = vsel %vm2081_vm7, %v801_v31, %v802_v14  ;;  %v918_v44 = vrot.slane %v916_v34, 4  ;;  %v908_v45 = vrot.slane %v2142_v28, 4  ;;  %v355_v13 = vld [vmem:[%s2069_s20 + $0x1c] sm:$0xf] }
  0x3a   : > { %v2265_v20 = vor.u32 %v925_v38, %v922_v36  ;;  %v1076_v25 = vor.u32 %v1075_v40, %v1072_v39  ;;  %v1082_v46 = vrot.slane %v1080_v41, 6  ;;  %v1085_v47 = vrot.slane %v1083_v43, 7  ;;  %v2313_v40 = vld [vmem:[%s2069_s20 + $0x24] sm:$0xf] }
  0x3b   : > { %v917_v51 = vsel %vm2149_vm14, %v908_v45, %v916_v34  ;;  %v1068_v53 = vrot.slane %v2164_v54, 4  ;;  %v1222_v28 = vrot.slane %v1192_v48, 7  ;;  %v1324_v57 = vshrl.u32 %v1289_v49, 16  ;;  %v614_v34 = vld [vmem:[%s2069_s20 + $0x1c] sm:$0xf] }
  0x3c   : > { %574 = vrot.lane.b32.xlu1 %v507_v52, %s2021_s23  ;;  %572 = vrot.lane.b32.xlu0 %v497_v23, %s2021_s23  ;;  %v927_v58 = vsel %vm2149_vm14, %v918_v44, %v2265_v20  ;;  %v1078_v59 = vrot.slane %v1076_v25, 4  ;;  %v2281_v60 = vor.u32 %v1085_v47, %v1082_v46  ;;  %v1333_v61 = vshrl.u32 %v1290_v50, 16 }
  0x3d   : > { %v1225_v62 = vrot.slane %v2276_v56, 7  ;;  %v1077_v54 = vsel %vm2149_vm14, %v1068_v53, %v1076_v25  ;;  %v1224_v63 = vrot.slane %v1222_v28, 4  ;;  %v1221_v2 = vrot.slane %v1219_v55, 4  ;;  %v2003_v56 = vld [vmem:[%s2885_s1 + $0x10] sm:$0xff]  }
  0x3e   : > { %v1326_v3 = vrot.slane %v1324_v57, 7  ;;  %v1087_v7 = vsel %vm2149_vm14, %v1078_v59, %v2281_v60  ;;  %v2294_v11 = vrot.slane %v1333_v61, 7  ;;  %v1336_v14 = vshll.u32 %v1290_v50, 16  ;;  %v615_v57 = vld [vmem:[%s2069_s20 + $0x20] sm:$0xf] }
  0x3f   : > { %v1327_v16 = vshll.u32 %v1289_v49, 16  ;;  %v510_v52 = vshrl.u32 %v451_v4, 16  ;;  %v513_v23 = vshll.u32 %v451_v4, 16  ;;  %v1226_v37 = vsel %vm2181_vm0, %v1224_v63, %v1225_v62 }
  0x40   : > { %734 = vrot.lane.b32.xlu1 %v667_v33, %s2022_s24  ;;  %732 = vrot.lane.b32.xlu0 %v657_v27, %s2022_s24  ;;  %v1223_v55 = vsel %vm2181_vm0, %v1221_v2, %v1222_v28  ;;  %v1322_v24 = vrot.slane %v2176_v5, 4  ;;  %v1331_v26 = vrot.slane %v1326_v3, 4  ;;  %v1338_v27 = vor.u32 %v1336_v14, %v2294_v11  ;;  %v453_v33 = vld [vmem:[%s2069_s20 + $0x20] sm:$0xf]  ;;  %v454_v5 = vld [vmem:[%s2069_s20 + $0x24] sm:$0xf] }
  0x41   : > { %v1329_v29 = vor.u32 %v1327_v16, %v1326_v3  ;;  %v388_v31 = vrot.slane %v354_v17, 5  ;;  %v394_v36 = vrot.slane %v356_v19, 5  ;;  %v520_v38 = vshrl.u32 %v452_v22, 16 }
  0x42   : > { %v391_v39 = vrot.slane %v355_v13, 5  ;;  %v512_v41 = vrot.slane %v510_v52, 5  ;;  %v515_v43 = vrot.slane %v513_v23, 6  ;;  %v533_v44 = vshll.u32 %v453_v33, 16 }
  0x43   : > { %v670_v45 = vshrl.u32 %v614_v34, 16  ;;  %v673_v25 = vshll.u32 %v614_v34, 16  ;;  %v1339_v46 = vsel %vm2196_vm1, %v1331_v26, %v1338_v27  ;;  %v1330_v47 = vsel %vm2196_vm1, %v1322_v24, %v1329_v29  ;;  %v617_v26 = vld [vmem:[%s2069_s20 + $0x28] sm:$0xf] }
  0x44   : > { %831 = vrot.lane.b32.xlu1 %v806_v6, %s2020_s22  ;;  %829 = vrot.lane.b32.xlu0 %v803_v9, %s2020_s22  ;;  %v523_v6 = vshll.u32 %v452_v22, 16  ;;  %v530_v9 = vshrl.u32 %v453_v33, 16  ;;  %v390_v48 = vrot.slane %v388_v31, 4  ;;  %v387_v49 = vrot.slane %v385_v35, 4  ;;  %v616_v35 = vld [vmem:[%s2069_s20 + $0x24] sm:$0xf] }
  0x45   : > { %v396_v50 = vrot.slane %v394_v36, 4  ;;  %v393_v53 = vrot.slane %v391_v39, 4  ;;  %v522_v28 = vrot.slane %v520_v38, 5  ;;  %v540_v61 = vshrl.u32 %v454_v5, 16 }
  0x46   : > { %v525_v59 = vrot.slane %v523_v6, 6  ;;  %v532_v63 = vrot.slane %v530_v9, 5  ;;  %v535_v2 = vrot.slane %v533_v44, 6  ;;  %v672_v3 = vrot.slane %v670_v45, 5 }
  0x47   : > { %v675_v18 = vrot.slane %v673_v25, 6  ;;  %v392_v4 = vsel %vm2071_vm5, %v390_v48, %v391_v39  ;;  %v680_v14 = vshrl.u32 %v615_v57, 16  ;;  %v683_v16 = vshll.u32 %v615_v57, 16  ;;  %v774_v39 = vld [vmem:[%s2069_s20 + $0x1c] sm:$0xf] }
  0x48   : > { %994 = vrot.lane.b32.xlu1 %v927_v58, %s2023_s25  ;;  %992 = vrot.lane.b32.xlu0 %v917_v51, %s2023_s25  ;;  %v397_v51 = vrot.slane %v2313_v40, 5  ;;  %v516_v58 = vor.u32 %v515_v43, %v512_v41  ;;  %v395_v17 = vsel %vm2071_vm5, %v393_v53, %v394_v36  ;;  %v508_v22 = vrot.slane %v2227_v1, 4 }
  0x49   : > { %v690_v52 = vshrl.u32 %v616_v35, 16  ;;  %v693_v23 = vshll.u32 %v616_v35, 16  ;;  %v542_v24 = vrot.slane %v540_v61, 5  ;;  %v526_v27 = vor.u32 %v525_v59, %v522_v28  ;;  %v210_v59 = vld [vmem:[%s2069_s20 + $0x4] sm:$0xf] }
  0x4a   : > { %v398_v19 = vsel %vm2071_vm5, %v396_v50, %v397_v51  ;;  %v676_v29 = vor.u32 %v675_v18, %v672_v3  ;;  %v685_v33 = vrot.slane %v683_v16, 6  ;;  %v700_v1 = vshrl.u32 %v617_v26, 16  ;;  %v211_v3 = vld [vmem:[%s2069_s20 + $0x8] sm:$0xf] }
  0x4b   : > { %v692_v34 = vrot.slane %v690_v52, 5  ;;  %v695_v36 = vrot.slane %v693_v23, 6  ;;  %v703_v38 = vshll.u32 %v617_v26, 16  ;;  %v528_v6 = vrot.slane %v526_v27, 4 }
  0x4c   : > { %1154 = vrot.lane.b32.xlu1 %v1087_v7, %s2024_s26  ;;  %1152 = vrot.lane.b32.xlu0 %v1077_v54, %s2024_s26  ;;  %v543_v54 = vshll.u32 %v454_v5, 16  ;;  %v389_v7 = vsel %vm2071_vm5, %v387_v49, %v388_v31  ;;  %v682_v31 = vrot.slane %v680_v14, 5  ;;  %v668_v5 = vrot.slane %v2232_v10, 4  ;;  %v871_v49 = vld [vmem:[%s2069_s20 + $0x1c] sm:$0xf] }
  0x4d   : > { %v517_v44 = vsel %vm2114_vm10, %v508_v22, %v516_v58  ;;  %v678_v45 = vrot.slane %v676_v29, 4  ;;  %v807_v48 = vrot.slane %v805_v30, 4  ;;  %v696_v50 = vor.u32 %v695_v36, %v692_v34  ;;  %v776_v10 = vld [vmem:[%s2069_s20 + $0x24] sm:$0xf]  ;;  %v872_v30 = vld [vmem:[%s2069_s20 + $0x20] sm:$0xf] }
  0x4e   : > { %v545_v13 = vrot.slane %v543_v54, 6  ;;  %v686_v25 = vor.u32 %v685_v33, %v682_v31  ;;  %v702_v53 = vrot.slane %v700_v1, 5  ;;  %v705_v28 = vrot.slane %v703_v38, 6  ;;  %v874_v36 = vld [vmem:[%s2069_s20 + $0x28] sm:$0xf] }
  0x4f   : > { %v677_v15 = vsel %vm2114_vm10, %v668_v5, %v676_v29  ;;  %vm222_vm3 = vsmask.f32 7440  ;;  %v698_v14 = vrot.slane %v696_v50, 4  ;;  %v228_v22 = vshll.u32 %v210_v59, 16  ;;  %v1034_v1 = vld [vmem:[%s2069_s20 + $0x20] sm:$0xf] }
  0x50   : > { %1251 = vrot.lane.b32.xlu1 %v1226_v37, %s2025_s27  ;;  %1249 = vrot.lane.b32.xlu0 %v1223_v55, %s2025_s27  ;;  %v518_v37 = vrot.slane %v516_v58, 4  ;;  %v536_v55 = vor.u32 %v535_v2, %v532_v63  ;;  %v2346_v43 = vor.u32 %v545_v13, %v542_v24  ;;  %v687_v61 = vsel %vm2114_vm10, %v678_v45, %v686_v25  ;;  %vm2403_vm6 = vmor %vm221_vm2, %vm222_vm3 }
  0x51   : > { %v930_v63 = vshrl.u32 %v871_v49, 16  ;;  %v933_v2 = vshll.u32 %v871_v49, 16  ;;  %v688_v18 = vrot.slane %v686_v25, 4  ;;  %v2376_v16 = vor.u32 %v705_v28, %v702_v53  ;;  %v1036_v53 = vld [vmem:[%s2069_s20 + $0x28] sm:$0xf] }
  0x52   : > { %v538_v41 = vrot.slane %v536_v55, 4  ;;  %v527_v9 = vsel %vm2114_vm10, %v518_v37, %v526_v27  ;;  %v537_v58 = vsel %vm2114_vm10, %v528_v6, %v536_v55  ;;  %v940_v23 = vshrl.u32 %v872_v30, 16  ;;  %v873_v55 = vld [vmem:[%s2069_s20 + $0x24] sm:$0xf] }
  0x53   : > { %v943_v37 = vshll.u32 %v872_v30, 16  ;;  %v234_v24 = vshll.u32 %v211_v3, 16  ;;  %v932_v13 = vrot.slane %v930_v63, 6  ;;  %v935_v26 = vrot.slane %v933_v2, 7 }
  0x54   : > { %1400 = vrot.lane.b32.xlu1 %v1339_v46, %s2026_s28  ;;  %1398 = vrot.lane.b32.xlu0 %v1330_v47, %s2026_s28  ;;  %v775_v46 = vld [vmem:[%s2069_s20 + $0x20] sm:$0xf]  ;;  %v808_v47 = vrot.slane %v774_v39, 6  ;;  %v547_v57 = vsel %vm2114_vm10, %v538_v41, %v2346_v43  ;;  %v230_v29 = vrot.slane %v228_v22, 5  ;;  %v697_v31 = vsel %vm2114_vm10, %v688_v18, %v696_v50 }
  0x55   : > { %v811_v54 = vrot.slane %v775_v46, 6  ;;  %v238_v38 = vshrl.u32 %v211_v3, 16  ;;  %v950_v39 = vshrl.u32 %v873_v55, 16  ;;  %v953_v41 = vshll.u32 %v873_v55, 16 }
  0x56   : > { %v810_v35 = vrot.slane %v808_v47, 4  ;;  %v236_v5 = vrot.slane %v234_v24, 5  ;;  %v942_v46 = vrot.slane %v940_v23, 6  ;;  %v945_v49 = vrot.slane %v943_v37, 7  ;;  %v2420_v24 = vld [vmem:[%s2069_s20 + $0x20] sm:$0xf] }
  0x57   : > { %v813_v52 = vrot.slane %v811_v54, 4  ;;  %v960_v50 = vshrl.u32 %v874_v36, 16  ;;  %v952_v30 = vrot.slane %v950_v39, 6  ;;  %v1110_v2 = vshrl.u32 %v1036_v53, 16 }
  0x58   : > { %415 = vrot.lane.b32.xlu1 %v392_v4, %s2019_s21  ;;  %413 = vrot.lane.b32.xlu0 %v389_v7, %s2019_s21  ;;  %v2374_v4 = vsel %vm2081_vm7, %v807_v48, %v808_v47  ;;  %v814_v7 = vrot.slane %v776_v10, 6  ;;  %v812_v33 = vsel %vm2081_vm7, %v810_v35, %v811_v54  ;;  %v936_v48 = vor.u32 %v935_v26, %v932_v13 }
  0x59   : > { %v963_v10 = vshll.u32 %v874_v36, 16  ;;  %v1093_v54 = vshll.u32 %v1034_v1, 16  ;;  %v1113_v3 = vshll.u32 %v1036_v53, 16  ;;  %v962_v22 = vrot.slane %v960_v50, 6  ;;  %v2423_v36 = vld [vmem:[%s2069_s20 + $0x24] sm:$0xf] }
  0x5a   : > { %v816_v45 = vrot.slane %v814_v7, 4  ;;  %v815_v25 = vsel %vm2081_vm7, %v813_v52, %v814_v7  ;;  %v938_v7 = vrot.slane %v936_v48, 4  ;;  %v1037_v52 = vld [vmem:[%s2069_s20 + $0x2c] sm:$0xf]  ;;  %v1342_v50 = vshrl.u32 %v2420_v24, 16 }
  0x5b   : > { %v965_v23 = vrot.slane %v963_v10, 7  ;;  %v1351_v53 = vshrl.u32 %v2423_v36, 16  ;;  %vm435_vm9 = vcmask 126016   ;;  %vm598_vm12 = vcmask 191616  }
  0x5c   : > { %419 = vrot.lane.b32.xlu1 %v398_v19, %s2019_s21  ;;  %417 = vrot.lane.b32.xlu0 %v395_v17, %s2019_s21  ;;  %v2379_v17 = vld [vmem:[%s2069_s20 + $0x28] sm:$0xf]  ;;  %v225_v19 = vshrl.u32 %v210_v59, 16  ;;  %v955_v59 = vrot.slane %v953_v41, 7  ;;  %vm2028_vm13 = vmmov 0   ;;  %vm758_vm15 = vcmask 257216  }
  0x5d   : > { %v817_v34 = vrot.slane %v2379_v17, 6  ;;  %vm855_vm2 = vcmask 322816   ;;  %vm1178_vm3 = vcmask 454016  }
  0x5e   : > { %v227_v27 = vrot.slane %v225_v19, 4  ;;  %v928_v19 = vrot.slane %v2265_v20, 4  ;;  %v956_v26 = vor.u32 %v955_v59, %v952_v30 }
  0x5f   : > { %v818_v20 = vsel %vm2081_vm7, %v816_v45, %v817_v34 }
  0x60   : > { %578 = vrot.lane.b32.xlu1 %v527_v9, %s2021_s23  ;;  %576 = vrot.lane.b32.xlu0 %v517_v44, %s2021_s23  ;;  %v231_v6 = vor.u32 %v230_v29, %v227_v27  ;;  %v2392_v9 = vld [vmem:[%s2069_s20 + $0xc] sm:$0xf]  ;;  %v707_v44 = vsel %vm2114_vm10, %v698_v14, %v2376_v16  ;;  %v946_v14 = vor.u32 %v945_v49, %v942_v46  ;;  %v2447_v49 = vld [vmem:[%s2069_s20 + $0x28] sm:$0xf] }
  0x62   : > { %v232_v28 = vrot.slane %v231_v6, 4  ;;  %v948_v27 = vrot.slane %v946_v14, 4  ;;  %v947_v41 = vsel %vm2149_vm14, %v938_v7, %v946_v14  ;;  %v1120_v6 = vshrl.u32 %v1037_v52, 16 }
  0x63   : > { %v2465_v7 = vrot.slane %v1351_v53, 7  ;;  %v1354_v14 = vshll.u32 %v2423_v36, 16 }
  0x64   : > { %582 = vrot.lane.b32.xlu1 %v547_v57, %s2021_s23  ;;  %580 = vrot.lane.b32.xlu0 %v537_v58, %s2021_s23  ;;  %v1090_v57 = vshrl.u32 %v1034_v1, 16  ;;  %v240_v58 = vrot.slane %v238_v38, 4  ;;  %v237_v63 = vsel %vm2403_vm6, %v232_v28, %v236_v5  ;;  %v1112_v1 = vrot.slane %v1110_v2, 6 }
  0x65   : > { %339 = vst.msk [vmem:[#allocation2] sm:$0xf] %vm338_vm4, %v237_v63  ;;  %v1115_v38 = vrot.slane %v1113_v3, 7  ;;  %v2451_v28 = vor.u32 %v965_v23, %v962_v22  ;;  %v957_v10 = vsel %vm2149_vm14, %v948_v27, %v956_v26  ;;  %v1122_v59 = vrot.slane %v1120_v6, 6 }
  0x66   : > { %v241_v18 = vor.u32 %v240_v58, %v236_v5  ;;  %v1092_v29 = vrot.slane %v1090_v57, 6  ;;  %v1123_v5 = vshll.u32 %v1037_v52, 16  ;;  %v2027_v63 = vmov 0.0  }
  0x67   : > { %v1116_v58 = vor.u32 %v1115_v38, %v1112_v1  ;;  %1938 = vmatprep.subr.bf16.mxu0 %v2027_v63  ;;  %1968 = vmatprep.subr.bf16.mxu1 %v2027_v63  ;;  %v1088_v23 = vrot.slane %v2281_v60, 4 }
  0x68   : > { %738 = vrot.lane.b32.xlu1 %v687_v61, %s2022_s24  ;;  %736 = vrot.lane.b32.xlu0 %v677_v15, %s2022_s24  ;;  %v244_v15 = vshll.u32 %v2392_v9, 16  ;;  %v1035_v61 = vld [vmem:[%s2069_s20 + $0x24] sm:$0xf]  ;;  %v242_v13 = vrot.slane %v241_v18, 4  ;;  %v2463_v18 = vld [vmem:[%s2069_s20 + $0x2c] sm:$0xf] }
  0x69   : > { %v1100_v37 = vshrl.u32 %v1035_v61, 16  ;;  %v1103_v55 = vshll.u32 %v1035_v61, 16  ;;  %v1125_v61 = vrot.slane %v1123_v5, 7  ;;  %1948 = vmatprep.mubr.msk.bf16.mxu0 %vm2028_vm13, %v2027_v63  ;;  %1960 = vmatprep.mubr.msk.bf16.mxu1 %vm2028_vm13, %v2027_v63 }
  0x6a   : > { %v2415_v35 = vrot.slane %v244_v15, 5  ;;  %v1195_v15 = vld [vmem:[%s2069_s20 + $0x24] sm:$0xf] }
  0x6b   : > { %v1102_v45 = vrot.slane %v1100_v37, 6  ;;  %v1105_v46 = vrot.slane %v1103_v55, 7  ;;  %v1231_v37 = vrot.slane %v1195_v15, 7  ;;  %v2476_v55 = vld [vmem:[%s2069_s20 + $0x28] sm:$0xf]  ;;  %v2487_v60 = vor.u32 %v1125_v61, %v1122_v59 }
  0x6c   : > { %742 = vrot.lane.b32.xlu1 %v707_v44, %s2022_s24  ;;  %740 = vrot.lane.b32.xlu0 %v697_v31, %s2022_s24  ;;  %v1095_v31 = vrot.slane %v1093_v54, 7  ;;  %v247_v39 = vsel %vm2403_vm6, %v242_v13, %v2415_v35  ;;  %v2001_v44 = vld [vmem:[%s2885_s1 + $0x20] ss:$0 sps:$4 sm:$0xff]   ;;  %v1234_v54 = vrot.slane %v2447_v49, 7  ;;  %v1118_v13 = vrot.slane %v1116_v58, 4  ;;  %v2004_v59 = vld [vmem:[%s2885_s1 + $0x8] sm:$0xff]  }
  0x6d   : > { %340 = vst.msk [vmem:[#allocation2 + $0x4] sm:$0xf] %vm338_vm4, %v247_v39  ;;  %v1524_v2 = vsel %vm1522_vm8, %v2001_v44, 0  ;;  %v1106_v3 = vor.u32 %v1105_v46, %v1102_v45  ;;  %v1233_v1 = vrot.slane %v1231_v37, 4  ;;  %v1356_v39 = vor.u32 %v1354_v14, %v2465_v7  ;;  %v2518_v49 = vld [vmem:[%s2069_s20 + $0x14] sm:$0xf] }
  0x6e   : > { %v1096_v57 = vor.u32 %v1095_v31, %v1092_v29  ;;  %1939 = vmatpush3.bf16.msra.mxu0 %v1524_v2  ;;  %1973 = vmatpush3.bf16.msra.mxu1 %v1524_v2  ;;  %v1227_v29 = vrot.slane %v1225_v62, 4  ;;  %v2485_v31 = vld [vmem:[%s2069_s20 + $0x2c] sm:$0xf]  ;;  %v1236_v36 = vrot.slane %v1234_v54, 4  ;;  %v1360_v6 = vshrl.u32 %v2476_v55, 16 }
  0x6f   : > { %1940 = vmatprep.subr.bf16.mxu0 %v2027_v63  ;;  %1969 = vmatprep.subr.bf16.mxu1 %v2027_v63  ;;  %v1369_v5 = vshrl.u32 %v2485_v31, 16  ;;  %v248_v46 = vshrl.u32 %v2392_v9, 16  ;;  %v455_v9 = vld [vmem:[%s2069_s20 + $0x28] sm:$0xf]  ;;  %v1372_v15 = vshll.u32 %v2485_v31, 16 }
  0x70   : > { %835 = vrot.lane.b32.xlu1 %v812_v33, %s2020_s22  ;;  %833 = vrot.lane.b32.xlu0 %v2374_v4, %s2020_s22  ;;  %v937_v33 = vsel %vm2149_vm14, %v928_v19, %v936_v48  ;;  %v2440_v4 = vld [vmem:[%s2069_s20 + $0x20] sm:$0xf]  ;;  %v958_v48 = vrot.slane %v956_v26, 4  ;;  %v2002_v19 = vld [vmem:[%s2885_s1 + $0x18] sm:$0xff]   ;;  %v1098_v52 = vrot.slane %v1096_v57, 4  ;;  %v1108_v26 = vrot.slane %v1106_v3, 4 }
  0x71   : > { %v1228_v30 = vrot.slane %v2440_v4, 7  ;;  %v2546_v2 = vrot.slane %v1369_v5, 7  ;;  %v550_v14 = vshrl.u32 %v455_v9, 16 }
  0x72   : > { %v967_v22 = vsel %vm2149_vm14, %v958_v48, %v2451_v28  ;;  %1941 = vmatpush3.bf16.msra.mxu0 %v2002_v19  ;;  %1974 = vmatpush3.bf16.msra.mxu1 %v2002_v19  ;;  %v1107_v62 = vsel %vm2149_vm14, %v1098_v52, %v1106_v3  ;;  %v1117_v4 = vsel %vm2149_vm14, %v1108_v26, %v1116_v58  ;;  %v553_v19 = vshll.u32 %v455_v9, 16  ;;  %v619_v9 = vld [vmem:[%s2069_s20 + $0x30] sm:$0x3] }
  0x73   : > { %v1230_v27 = vrot.slane %v1228_v30, 4  ;;  %1942 = vmatprep.subr.bf16.mxu0 %v2027_v63  ;;  %1970 = vmatprep.subr.bf16.mxu1 %v2027_v63  ;;  %v2514_v45 = vsel %vm2181_vm0, %v1227_v29, %v1228_v30  ;;  %v2531_v48 = vsel %vm2181_vm0, %v1233_v1, %v1234_v54  ;;  %v358_v30 = vld [vmem:[%s2069_s20 + $0x28] sm:$0xf]  ;;  %v2544_v54 = vrot.slane %v1360_v6, 7 }
  0x74   : > { %839 = vrot.lane.b32.xlu1 %v818_v20, %s2020_s22  ;;  %837 = vrot.lane.b32.xlu0 %v815_v25, %s2020_s22  ;;  %v1344_v25 = vrot.slane %v1342_v50, 7  ;;  %v1237_v20 = vrot.slane %v2463_v18, 7  ;;  %v1127_v50 = vsel %vm2149_vm14, %v1118_v13, %v2487_v60  ;;  %v250_v52 = vrot.slane %v248_v46, 4 }
  0x75   : > { %v2510_v44 = vsel %vm2181_vm0, %v1230_v27, %v1231_v37  ;;  %v1363_v37 = vshll.u32 %v2476_v55, 16  ;;  %v400_v13 = vrot.slane %v358_v30, 5  ;;  %v359_v27 = vld [vmem:[%s2069_s20 + $0x2c] sm:$0x1]  ;;  %v399_v29 = vrot.slane %v397_v51, 4 }
  0x76   : > { %v1349_v38 = vrot.slane %v1344_v25, 4  ;;  %v2527_v53 = vsel %vm2181_vm0, %v1236_v36, %v1237_v20  ;;  %1943 = vmatpush3.bf16.msra.mxu0 %v2003_v56  ;;  %1975 = vmatpush3.bf16.msra.mxu1 %v2003_v56  ;;  %v251_v1 = vor.u32 %v250_v52, %v2415_v35  ;;  %v1374_v55 = vor.u32 %v1372_v15, %v2546_v2  ;;  %v618_v35 = vld [vmem:[%s2069_s20 + $0x2c] sm:$0xf] }
  0x77   : > { %1944 = vmatprep.subr.bf16.mxu0 %v2027_v63  ;;  %1971 = vmatprep.subr.bf16.mxu1 %v2027_v63  ;;  %v552_v40 = vrot.slane %v550_v14, 5  ;;  %v555_v51 = vrot.slane %v553_v19, 6  ;;  %v402_v6 = vrot.slane %v400_v13, 4  ;;  %v403_v5 = vrot.slane %v359_v27, 5  ;;  %v216_v14 = vld [vmem:[%s2069_s20 + $0x1c] sm:$0xf] }
  0x78   : > { %998 = vrot.lane.b32.xlu1 %v947_v41, %s2023_s25  ;;  %996 = vrot.lane.b32.xlu0 %v937_v33, %s2023_s25  ;;  %v1345_v41 = vshll.u32 %v2420_v24, 16  ;;  %v1097_v33 = vsel %vm2149_vm14, %v1088_v23, %v1096_v57  ;;  %v213_v24 = vld [vmem:[%s2069_s20 + $0x10] sm:$0xf]  ;;  %v2537_v57 = vsel %vm2196_vm1, %v1349_v38, %v1356_v39  ;;  %v1358_v23 = vrot.slane %v2465_v7, 4  ;;  %v2005_v38 = vld [vmem:[%s2885_s1] sm:$0xff]  }
  0x79   : > { %v254_v61 = vshll.u32 %v213_v24, 16  ;;  %v258_v3 = vshrl.u32 %v213_v24, 16  ;;  %v1367_v7 = vrot.slane %v2544_v54, 4  ;;  %v252_v56 = vrot.slane %v251_v1, 4  ;;  %v217_v27 = vld [vmem:[%s2069_s20 + $0x20] sm:$0xf] }
  0x7a   : > { %v1347_v58 = vor.u32 %v1345_v41, %v1344_v25  ;;  %v264_v25 = vshll.u32 %v2518_v49, 16  ;;  %1945 = vmatpush3.bf16.msra.mxu0 %v2004_v59  ;;  %1976 = vmatpush3.bf16.msra.mxu1 %v2004_v59  ;;  %v2589_v30 = vsel %vm2071_vm5, %v399_v29, %v400_v13  ;;  %v710_v59 = vshrl.u32 %v618_v35, 16  ;;  %v218_v1 = vld [vmem:[%s2069_s20 + $0x24] sm:$0xf] }
  0x7b   : > { %v260_v26 = vrot.slane %v258_v3, 4  ;;  %1946 = vmatprep.subr.bf16.mxu0 %v2027_v63  ;;  %1972 = vmatprep.subr.bf16.mxu1 %v2027_v63  ;;  %v2606_v3 = vor.u32 %v555_v51, %v552_v40  ;;  %v2617_v19 = vsel %vm2071_vm5, %v402_v6, %v403_v5  ;;  %v723_v52 = vshll.u32 %v619_v9, 16  ;;  %v219_v5 = vld [vmem:[%s2069_s20 + $0x28] sm:$0xf] }
  0x7c   : > { %1002 = vrot.lane.b32.xlu1 %v967_v22, %s2023_s25  ;;  %1000 = vrot.lane.b32.xlu0 %v957_v10, %s2023_s25  ;;  %v1340_v10 = vrot.slane %v2294_v11, 4  ;;  %v456_v11 = vld [vmem:[%s2069_s20 + $0x2c] sm:$0x3]  ;;  %v256_v22 = vrot.slane %v254_v61, 5  ;;  %v2565_v41 = vrot.slane %v264_v25, 5  ;;  %v713_v61 = vshll.u32 %v618_v35, 16 }
  0x7d   : > { %v560_v31 = vshrl.u32 %v456_v11, 16  ;;  %v563_v36 = vshll.u32 %v456_v11, 16  ;;  %v2604_v11 = vsel %vm2196_vm1, %v1367_v7, %v1374_v55  ;;  %v268_v25 = vshrl.u32 %v2518_v49, 16 }
  0x7e   : > { %v261_v39 = vor.u32 %v260_v26, %v256_v22  ;;  %v257_v15 = vsel %vm2403_vm6, %v252_v56, %v256_v22  ;;  %1947 = vmatpush3.bf16.msra.mxu0 %v2005_v38  ;;  %1977 = vmatpush3.bf16.msra.mxu1 %v2005_v38  ;;  %v720_v22 = vshrl.u32 %v619_v9, 16  ;;  %v548_v49 = vrot.slane %v2346_v43, 4  ;;  %v1038_v43 = vld [vmem:[%s2069_s20 + $0x30] sm:$0xf] }
  0x7f   : > { %v2580_v46 = vrot.slane %v560_v31, 5  ;;  %341 = vst.msk [vmem:[#allocation2 + $0x8] sm:$0xf] %vm338_vm4, %v257_v15  ;;  %v708_v13 = vrot.slane %v2376_v16, 4  ;;  %v712_v29 = vrot.slane %v710_v59, 5  ;;  %v715_v31 = vrot.slane %v713_v61, 6 }
  0x80   : > { %1158 = vrot.lane.b32.xlu1 %v1107_v62, %s2024_s26  ;;  %1156 = vrot.lane.b32.xlu0 %v1097_v33, %s2024_s26  ;;  %v1365_v33 = vor.u32 %v1363_v37, %v2544_v54  ;;  %v262_v24 = vrot.slane %v261_v39, 4  ;;  %v558_v0 = vrot.slane %v2606_v3, 4  ;;  %v288_v7 = vshrl.u32 %v216_v14, 16  ;;  %v220_v61 = vld [vmem:[%s2069_s20 + $0x2c] sm:$0x1] }
  0x81   : > { %v270_v55 = vrot.slane %v268_v25, 4  ;;  %v2630_v40 = vrot.slane %v720_v22, 5  ;;  %v2632_v51 = vrot.slane %v723_v52, 6  ;;  %v294_v56 = vshll.u32 %v217_v27, 16  ;;  %v875_v22 = vld [vmem:[%s2069_s20 + $0x2c] sm:$0xf] }
  0x82   : > { %v304_v6 = vshll.u32 %v218_v1, 16  ;;  %v308_v59 = vshrl.u32 %v218_v1, 16  ;;  %vm1018_vm5 = vcmask 388416   ;;  %v290_v25 = vrot.slane %v288_v7, 4  ;;  %v2651_v1 = vld [vmem:[%s2069_s20 + $0x2c] sm:$0xf] }
  0x83   : > { %v296_v15 = vrot.slane %v294_v56, 5  ;;  %v973_v56 = vshll.u32 %v875_v22, 16 }
  0x84   : > { %1162 = vrot.lane.b32.xlu1 %v1127_v50, %s2024_s26  ;;  %1160 = vrot.lane.b32.xlu0 %v1117_v4, %s2024_s26  ;;  %v1348_v4 = vsel %vm2196_vm1, %v1340_v10, %v1347_v58  ;;  %v2582_v50 = vrot.slane %v563_v36, 6  ;;  %v267_v10 = vsel %vm2403_vm6, %v262_v24, %v2565_v41  ;;  %v215_v58 = vld [vmem:[%s2069_s20 + $0x18] sm:$0xf]  ;;  %v2638_v24 = vor.u32 %v715_v31, %v712_v29 }
  0x85   : > { %v406_v62 = vpop.permute.xlu0 %405  ;;  %342 = vst.msk [vmem:[#allocation2 + $0xc] sm:$0xf] %vm338_vm4, %v267_v10  ;;  %v274_v26 = vshll.u32 %v215_v58, 16  ;;  %v278_v36 = vshrl.u32 %v215_v58, 16  ;;  %v306_v58 = vrot.slane %v304_v6, 5 }
  0x86   : > { %436 = vst.msk [vmem:[#allocation2] sm:$0xf] %vm435_vm9, %v406_v62  ;;  %v566_v37 = vor.u32 %v2582_v50, %v2580_v46  ;;  %v726_v46 = vor.u32 %v2632_v51, %v2630_v40 }
  0x87   : > { %v2600_v54 = vpop.permute.xlu1 %827  ;;  %v276_v38 = vrot.slane %v274_v26, 5  ;;  %v280_v35 = vrot.slane %v278_v36, 4  ;;  %v314_v26 = vshll.u32 %v219_v5, 16 }
  0x88   : > { %1255 = vrot.lane.b32.xlu1 %v2510_v44, %s2025_s27  ;;  %1253 = vrot.lane.b32.xlu0 %v2514_v45, %s2025_s27  ;;  %v2613_v45 = vsel %vm2196_vm1, %v1358_v23, %v1365_v33  ;;  %v284_v23 = vshll.u32 %v216_v14, 16  ;;  %v298_v33 = vshrl.u32 %v217_v27, 16  ;;  %v318_v27 = vshrl.u32 %v219_v5, 16 }
  0x89   : > { %v826_v44 = vpop.permute.xlu0 %825  ;;  %v281_v9 = vor.u32 %v280_v35, %v276_v38  ;;  %v970_v35 = vshrl.u32 %v875_v22, 16 }
  0x8b   : > { %v282_v52 = vrot.slane %v281_v9, 4  ;;  %v820_v9 = vrot.slane %v2651_v1, 6 }
  0x8c   : > { %1259 = vrot.lane.b32.xlu1 %v2527_v53, %s2025_s27  ;;  %1257 = vrot.lane.b32.xlu0 %v2531_v48, %s2025_s27  ;;  %v286_v53 = vrot.slane %v284_v23, 5  ;;  %v271_v48 = vor.u32 %v270_v55, %v2565_v41  ;;  %v300_v41 = vrot.slane %v298_v33, 4  ;;  %v324_v23 = vshll.u32 %v220_v61, 16 }
  0x8d   : > { %v408_v39 = vpop.permute.xlu0 %407  ;;  %v316_v55 = vrot.slane %v314_v26, 5  ;;  %v718_v61 = vrot.slane %v2638_v24, 4  ;;  %v822_v47 = vrot.slane %v820_v9, 4 }
  0x8e   : > { %v569_v62 = vpop.permute.xlu1 %568  ;;  %437 = vst.msk [vmem:[#allocation2 + $0x4] sm:$0xf] %vm435_vm9, %v408_v39  ;;  %v272_v10 = vrot.slane %v271_v48, 4  ;;  %v291_v36 = vor.u32 %v290_v25, %v286_v53  ;;  %v287_v7 = vsel %vm2403_vm6, %v282_v52, %v286_v53  ;;  %v310_v39 = vrot.slane %v308_v59, 4  ;;  %v876_v48 = vld [vmem:[%s2069_s20 + $0x30] sm:$0x7] }
  0x8f   : > { %599 = vst.msk [vmem:[#allocation2] sm:$0xf] %vm598_vm12, %v569_v62  ;;  %v557_v53 = vsel %vm2114_vm10, %v548_v49, %v2606_v3  ;;  %v326_v6 = vrot.slane %v324_v23, 5  ;;  %v980_v40 = vshrl.u32 %v876_v48, 16  ;;  %v983_v51 = vshll.u32 %v876_v48, 16 }
  0x90   : > { %1404 = vrot.lane.b32.xlu1 %v2537_v57, %s2026_s28  ;;  %1402 = vrot.lane.b32.xlu0 %v1348_v4, %s2026_s28  ;;  %v277_v31 = vsel %vm2403_vm6, %v272_v10, %v276_v38  ;;  %v301_v57 = vor.u32 %v300_v41, %v296_v15  ;;  %v2029_v4 = vmov 0   ;;  %v320_v38 = vrot.slane %v318_v27, 4  ;;  %344 = vst.msk [vmem:[#allocation2 + $0x14] sm:$0xf] %vm338_vm4, %v287_v7  ;;  %v1199_v48 = vld [vmem:[%s2069_s20 + $0x34] sm:$0x7] }
  0x91   : > { %v729_v14 = vpop.permute.xlu0 %728  ;;  %1999 = vset.pattern.permute.xlu0 %v2029_v4  ;;  %2000 = vset.pattern.permute.xlu1 %v2029_v4  ;;  %343 = vst.msk [vmem:[#allocation2 + $0x10] sm:$0xf] %vm338_vm4, %v277_v31  ;;  %v292_v62 = vrot.slane %v291_v36, 4  ;;  %v311_v5 = vor.u32 %v310_v39, %v306_v58  ;;  %v1130_v10 = vshrl.u32 %v1038_v43, 16  ;;  %v1133_v41 = vshll.u32 %v1038_v43, 16 }
  0x92   : > { %v571_v29 = vpop.permute.xlu1 %570  ;;  %759 = vst.msk [vmem:[#allocation2] sm:$0xf] %vm758_vm15, %v729_v14  ;;  %v321_v33 = vor.u32 %v320_v38, %v316_v55  ;;  %v819_v52 = vrot.slane %v817_v34, 4  ;;  %v727_v26 = vsel %vm2114_vm10, %v718_v61, %v726_v46  ;;  %v985_v31 = vrot.slane %v983_v51, 7  ;;  %v1198_v39 = vld [vmem:[%s2069_s20 + $0x30] sm:$0xf] }
  0x93   : > { %600 = vst.msk [vmem:[#allocation2 + $0x4] sm:$0xf] %vm598_vm12, %v571_v29  ;;  %v297_v59 = vsel %vm2403_vm6, %v292_v62, %v296_v15  ;;  %v312_v3 = vrot.slane %v311_v5, 4  ;;  %v975_v15 = vrot.slane %v973_v56, 7  ;;  %v982_v29 = vrot.slane %v980_v40, 6 }
  0x94   : > { %856 = vst.msk [vmem:[#allocation2] sm:$0xf] %vm855_vm2, %v826_v44  ;;  %1408 = vrot.lane.b32.xlu1 %v2604_v11, %s2026_s28  ;;  %1406 = vrot.lane.b32.xlu0 %v2613_v45, %s2026_s28  ;;  %v302_v44 = vrot.slane %v301_v57, 4  ;;  %v567_v45 = vsel %vm2114_vm10, %v558_v0, %v566_v37  ;;  %v322_v50 = vrot.slane %v321_v33, 4  ;;  %v779_v37 = vld [vmem:[%s2069_s20 + $0x30] sm:$0x3]  ;;  %v821_v42 = vsel %vm2081_vm7, %v819_v52, %v820_v9 }
  0x95   : > { %345 = vst.msk [vmem:[#allocation2 + $0x18] sm:$0xf] %vm338_vm4, %v297_v59  ;;  %v972_v0 = vrot.slane %v970_v35, 6  ;;  %v317_v25 = vsel %vm2403_vm6, %v312_v3, %v316_v55  ;;  %v823_v22 = vrot.slane %v779_v37, 6  ;;  %v1132_v57 = vrot.slane %v1130_v10, 6  ;;  %v1651_v52 = vld [vmem:[%s2886_s2 + $0x10] sm:$0xff] }
  0x96   : > { %v731_v11 = vpop.permute.xlu1 %730  ;;  %v307_v49 = vsel %vm2403_vm6, %v302_v44, %v306_v58  ;;  %v327_v58 = vsel %vm2403_vm6, %v322_v50, %v326_v6  ;;  %347 = vst.msk [vmem:[#allocation2 + $0x20] sm:$0xf] %vm338_vm4, %v317_v25  ;;  %v1135_v16 = vrot.slane %v1133_v41, 7  ;;  %v986_v34 = vor.u32 %v985_v31, %v982_v29  ;;  %v1295_v44 = vld [vmem:[%s2069_s20 + $0x30] sm:$0xf]  ;;  %v1653_v31 = vld [vmem:[%s2886_s2 + $0x20] sm:$0xff] }
  0x97   : > { %760 = vst.msk [vmem:[#allocation2 + $0x4] sm:$0xf] %vm758_vm15, %v731_v11  ;;  %v976_v27 = vor.u32 %v975_v15, %v972_v0  ;;  %v968_v23 = vrot.slane %v2451_v28, 4  ;;  %v824_v1 = vsel %vm2081_vm7, %v822_v47, %v823_v22  ;;  %v1296_v62 = vld [vmem:[%s2069_s20 + $0x34] sm:$0xf]  ;;  %v1240_v33 = vrot.slane %v1198_v39, 7 }
  0x98   : > { %346 = vst.msk [vmem:[#allocation2 + $0x1c] sm:$0xf] %vm338_vm4, %v307_v49  ;;  %423 = vrot.lane.b32.xlu1 %v2617_v19, %s2019_s21  ;;  %421 = vrot.lane.b32.xlu0 %v2589_v30, %s2019_s21  ;;  %v1039_v30 = vld [vmem:[%s2069_s20 + $0x34] sm:$0x7]  ;;  %348 = vst.msk [vmem:[#allocation2 + $0x24] sm:$0xf] %vm338_vm4, %v327_v58  ;;  %v1136_v7 = vor.u32 %v1135_v16, %v1132_v57 }
  0x99   : > { %857 = vst.msk [vmem:[#allocation2 + $0x4] sm:$0xf] %vm855_vm2, %v2600_v54  ;;  %v717_v54 = vsel %vm2114_vm10, %v708_v13, %v2638_v24  ;;  %v1140_v36 = vshrl.u32 %v1039_v30, 16  ;;  %v1143_v4 = vshll.u32 %v1039_v30, 16  ;;  %vm1275_vm4 = vcmask 519616   ;;  %v1654_v57 = vld [vmem:[%s2886_s2 + $0x28] sm:$0xff] }
  0x9a   : > { %v991_v19 = vpop.permute.xlu1 %990  ;;  %v989_v14 = vpop.permute.xlu0 %988  ;;  %v978_v17 = vrot.slane %v976_v27, 4  ;;  %vm1424_vm10 = vcmask 585216   ;;  %v977_v28 = vsel %vm2149_vm14, %v968_v23, %v976_v27  ;;  %v1138_v6 = vrot.slane %v1136_v7, 4 }
  0x9b   : > { %1020 = vst.msk [vmem:[#allocation2 + $0x4] sm:$0xf] %vm1018_vm5, %v991_v19  ;;  %1019 = vst.msk [vmem:[#allocation2] sm:$0xf] %vm1018_vm5, %v989_v14  ;;  %v1142_v55 = vrot.slane %v1140_v36, 6  ;;  %v1145_v38 = vrot.slane %v1143_v4, 7 }
  0x9c   : > { %586 = vrot.lane.b32.xlu1 %v567_v45, %s2021_s23  ;;  %584 = vrot.lane.b32.xlu0 %v557_v53, %s2021_s23  ;;  %v987_v8 = vsel %vm2149_vm14, %v978_v17, %v986_v34  ;;  %v1128_v53 = vrot.slane %v2487_v60, 4  ;;  %v1378_v11 = vshrl.u32 %v1295_v44, 16  ;;  %v1387_v45 = vshrl.u32 %v1296_v62, 16  ;;  %v1655_v4 = vld [vmem:[%s2886_s2 + $0x30] sm:$0xff]  ;;  %v1657_v17 = vld [vmem:[%s2886_s2 + $0x40] sm:$0xff] }
  0x9d   : > { %v1146_v5 = vor.u32 %v1145_v38, %v1142_v55  ;;  %v1243_v49 = vrot.slane %v1199_v48, 7  ;;  %v1242_v59 = vrot.slane %v1240_v33, 4  ;;  %v1239_v61 = vrot.slane %v1237_v20, 4  ;;  %v1658_v34 = vld [vmem:[%s2886_s2 + $0x48] sm:$0xff] }
  0x9e   : > { %v1151_v13 = vpop.permute.xlu1 %1150  ;;  %v1149_v24 = vpop.permute.xlu0 %1148  ;;  %v1137_v60 = vsel %vm2149_vm14, %v1128_v53, %v1136_v7  ;;  %v1390_v46 = vshll.u32 %v1296_v62, 16  ;;  %v1380_v3 = vrot.slane %v1378_v11, 7  ;;  %v1389_v37 = vrot.slane %v1387_v45, 7 }
  0x9f   : > { %1180 = vst.msk [vmem:[#allocation2 + $0x4] sm:$0xf] %vm1178_vm3, %v1151_v13  ;;  %1179 = vst.msk [vmem:[#allocation2] sm:$0xf] %vm1178_vm3, %v1149_v24  ;;  %v1147_v50 = vsel %vm2149_vm14, %v1138_v6, %v1146_v5  ;;  %v1381_v0 = vshll.u32 %v1295_v44, 16  ;;  %v1244_v18 = vsel %vm2181_vm0, %v1242_v59, %v1243_v49  ;;  %v1241_v32 = vsel %vm2181_vm0, %v1239_v61, %v1240_v33  ;;  %v1656_v13 = vld [vmem:[%s2886_s2 + $0x38] sm:$0xff] }
  0xa0   : > { %746 = vrot.lane.b32.xlu1 %v727_v26, %s2022_s24  ;;  %744 = vrot.lane.b32.xlu0 %v717_v54, %s2022_s24  ;;  %v1385_v20 = vrot.slane %v1380_v3, 4  ;;  %v1392_v51 = vor.u32 %v1390_v46, %v1389_v37  ;;  %v1376_v10 = vrot.slane %v2546_v2, 4  ;;  %vm1506_vm7 = vcmask 588800   ;;  %v1649_v54 = vld [vmem:[%s2886_s2] sm:$0xff]  ;;  %v1652_v26 = vld [vmem:[%s2886_s2 + $0x18] sm:$0xff] }
  0xa1   : > { %v1383_v41 = vor.u32 %v1381_v0, %v1380_v3 }
  0xa2   : > { %v1248_v35 = vpop.permute.xlu1 %1247  ;;  %v1246_v56 = vpop.permute.xlu0 %1245  ;;  %v1393_v12 = vsel %vm2196_vm1, %v1385_v20, %v1392_v51 }
  0xa3   : > { %1277 = vst.msk [vmem:[#allocation2 + $0x4] sm:$0xf] %vm1275_vm4, %v1248_v35  ;;  %1276 = vst.msk [vmem:[#allocation2] sm:$0xf] %vm1275_vm4, %v1246_v56  ;;  %v1384_v2 = vsel %vm2196_vm1, %v1376_v10, %v1383_v41 }
  0xa4   : > { %843 = vrot.lane.b32.xlu1 %v824_v1, %s2020_s22  ;;  %841 = vrot.lane.b32.xlu0 %v821_v42, %s2020_s22 }
  0xa6   : > { %v1397_v9 = vpop.permute.xlu1 %1396  ;;  %v1395_v43 = vpop.permute.xlu0 %1394 }
  0xa7   : > { %1426 = vst.msk [vmem:[#allocation2 + $0x4] sm:$0xf] %vm1424_vm10, %v1397_v9  ;;  %1425 = vst.msk [vmem:[#allocation2] sm:$0xf] %vm1424_vm10, %v1395_v43 }
  0xa8   : > { %1006 = vrot.lane.b32.xlu1 %v987_v8, %s2023_s25  ;;  %1004 = vrot.lane.b32.xlu0 %v977_v28, %s2023_s25 }
  0xaa   : > { %v412_v15 = vpop.permute.xlu1 %411  ;;  %v410_v40 = vpop.permute.xlu0 %409 }
  0xab   : > { %439 = vst.msk [vmem:[#allocation2 + $0xc] sm:$0xf] %vm435_vm9, %v412_v15  ;;  %438 = vst.msk [vmem:[#allocation2 + $0x8] sm:$0xf] %vm435_vm9, %v410_v40 }
  0xac   : > { %1166 = vrot.lane.b32.xlu1 %v1147_v50, %s2024_s26  ;;  %1164 = vrot.lane.b32.xlu0 %v1137_v60, %s2024_s26 }
  0xae   : > { %v575_v58 = vpop.permute.xlu1 %574  ;;  %v573_v25 = vpop.permute.xlu0 %572  ;;  %v2006_v19 = vld [vmem:[#allocation2] sm:$0xff]  }
  0xaf   : > { %602 = vst.msk [vmem:[#allocation2 + $0xc] sm:$0xf] %vm598_vm12, %v575_v58  ;;  %601 = vst.msk [vmem:[#allocation2 + $0x8] sm:$0xf] %vm598_vm12, %v573_v25  ;;  %1949 = vmatmul.mubr.msk.bf16.vlgmr.msra.gmra.mxu0 %vm1506_vm7, %v2006_v19 }
  0xb0   : > { %1263 = vrot.lane.b32.xlu1 %v1244_v18, %s2025_s27  ;;  %1261 = vrot.lane.b32.xlu0 %v1241_v32, %s2025_s27 }
  0xb1   : > { %1952 = vmatprep.mubr.msk.bf16.mxu0 %vm2028_vm13, %v2027_v63 }
  0xb2   : > { %v735_v14 = vpop.permute.xlu1 %734  ;;  %v733_v30 = vpop.permute.xlu0 %732 }
  0xb3   : > { %762 = vst.msk [vmem:[#allocation2 + $0xc] sm:$0xf] %vm758_vm15, %v735_v14  ;;  %761 = vst.msk [vmem:[#allocation2 + $0x8] sm:$0xf] %vm758_vm15, %v733_v30 }
  0xb4   : > { %1412 = vrot.lane.b32.xlu1 %v1393_v12, %s2026_s28  ;;  %1410 = vrot.lane.b32.xlu0 %v1384_v2, %s2026_s28 }
  0xb6   : > { %v832_v47 = vpop.permute.xlu1 %831  ;;  %v830_v22 = vpop.permute.xlu0 %829 }
  0xb7   : > { %859 = vst.msk [vmem:[#allocation2 + $0xc] sm:$0xf] %vm855_vm2, %v832_v47  ;;  %858 = vst.msk [vmem:[#allocation2 + $0x8] sm:$0xf] %vm855_vm2, %v830_v22 }
  0xb8   : > { %1661 = vperm.xlu0 %1999, %v1649_v54   ;;  %1666 = vperm.xlu1 %2000, %v1650_v21  }
  0xba   : > { %v995_v27 = vpop.permute.xlu1 %994  ;;  %v993_v29 = vpop.permute.xlu0 %992 }
  0xbb   : > { %1022 = vst.msk [vmem:[#allocation2 + $0xc] sm:$0xf] %vm1018_vm5, %v995_v27  ;;  %1021 = vst.msk [vmem:[#allocation2 + $0x8] sm:$0xf] %vm1018_vm5, %v993_v29 }
  0xbc   : > { %1671 = vperm.xlu1 %2000, %v1651_v52   ;;  %1676 = vperm.xlu0 %1999, %v1652_v26  }
  0xbe   : > { %v1155_v16 = vpop.permute.xlu1 %1154  ;;  %v1153_v36 = vpop.permute.xlu0 %1152 }
  0xbf   : > { %1182 = vst.msk [vmem:[#allocation2 + $0xc] sm:$0xf] %vm1178_vm3, %v1155_v16  ;;  %1181 = vst.msk [vmem:[#allocation2 + $0x8] sm:$0xf] %vm1178_vm3, %v1153_v36 }
  0xc0   : > { %1681 = vperm.xlu1 %2000, %v1653_v31   ;;  %1686 = vperm.xlu0 %1999, %v1654_v57  }
  0xc2   : > { %v1252_v24 = vpop.permute.xlu1 %1251  ;;  %v1250_v42 = vpop.permute.xlu0 %1249 }
  0xc3   : > { %1279 = vst.msk [vmem:[#allocation2 + $0xc] sm:$0xf] %vm1275_vm4, %v1252_v24  ;;  %1278 = vst.msk [vmem:[#allocation2 + $0x8] sm:$0xf] %vm1275_vm4, %v1250_v42 }
  0xc4   : > { %1691 = vperm.xlu1 %2000, %v1655_v4   ;;  %1696 = vperm.xlu0 %1999, %v1656_v13  }
  0xc6   : > { %v1401_v23 = vpop.permute.xlu1 %1400  ;;  %v1399_v1 = vpop.permute.xlu0 %1398 }
  0xc7   : > { %1428 = vst.msk [vmem:[#allocation2 + $0xc] sm:$0xf] %vm1424_vm10, %v1401_v23  ;;  %1427 = vst.msk [vmem:[#allocation2 + $0x8] sm:$0xf] %vm1424_vm10, %v1399_v1 }
  0xc8   : > { %1701 = vperm.xlu1 %2000, %v1657_v17   ;;  %1706 = vperm.xlu0 %1999, %v1658_v34  }
  0xca   : > { %v416_v7 = vpop.permute.xlu1 %415  ;;  %v414_v55 = vpop.permute.xlu0 %413 }
  0xcb   : > { %441 = vst.msk [vmem:[#allocation2 + $0x14] sm:$0xf] %vm435_vm9, %v416_v7  ;;  %440 = vst.msk [vmem:[#allocation2 + $0x10] sm:$0xf] %vm435_vm9, %v414_v55 }
  0xce   : > { %v420_v38 = vpop.permute.xlu1 %419  ;;  %v418_v39 = vpop.permute.xlu0 %417  ;;  %v2007_v35 = vld [vmem:[#allocation2 + $0x8] sm:$0xff]  }
  0xcf   : > { %443 = vst.msk [vmem:[#allocation2 + $0x1c] sm:$0xf] %vm435_vm9, %v420_v38  ;;  %442 = vst.msk [vmem:[#allocation2 + $0x18] sm:$0xf] %vm435_vm9, %v418_v39  ;;  %1953 = vmatmul.mubr.msk.bf16.gmra.mxu0 %vm1506_vm7, %v2007_v35 }
  0xd0   : > { %1956 = vmatprep.mubr.msk.bf16.mxu0 %vm2028_vm13, %v2027_v63 }
  0xd2   : > { %v579_v56 = vpop.permute.xlu1 %578  ;;  %v577_v44 = vpop.permute.xlu0 %576 }
  0xd3   : > { %604 = vst.msk [vmem:[#allocation2 + $0x14] sm:$0xf] %vm598_vm12, %v579_v56  ;;  %603 = vst.msk [vmem:[#allocation2 + $0x10] sm:$0xf] %vm598_vm12, %v577_v44 }
  0xd6   : > { %v583_v62 = vpop.permute.xlu1 %582  ;;  %v581_v8 = vpop.permute.xlu0 %580 }
  0xd7   : > { %606 = vst.msk [vmem:[#allocation2 + $0x1c] sm:$0xf] %vm598_vm12, %v583_v62  ;;  %605 = vst.msk [vmem:[#allocation2 + $0x18] sm:$0xf] %vm598_vm12, %v581_v8 }
  0xda   : > { %v739_v28 = vpop.permute.xlu1 %738  ;;  %v737_v53 = vpop.permute.xlu0 %736 }
  0xdb   : > { %764 = vst.msk [vmem:[#allocation2 + $0x14] sm:$0xf] %vm758_vm15, %v739_v28  ;;  %763 = vst.msk [vmem:[#allocation2 + $0x10] sm:$0xf] %vm758_vm15, %v737_v53 }
  0xde   : > { %v743_v48 = vpop.permute.xlu1 %742  ;;  %v741_v33 = vpop.permute.xlu0 %740 }
  0xdf   : > { %766 = vst.msk [vmem:[#allocation2 + $0x1c] sm:$0xf] %vm758_vm15, %v743_v48  ;;  %765 = vst.msk [vmem:[#allocation2 + $0x18] sm:$0xf] %vm758_vm15, %v741_v33 }
  0xe2   : > { %v836_v6 = vpop.permute.xlu1 %835  ;;  %v834_v5 = vpop.permute.xlu0 %833 }
  0xe3   : > { %861 = vst.msk [vmem:[#allocation2 + $0x14] sm:$0xf] %vm855_vm2, %v836_v6  ;;  %860 = vst.msk [vmem:[#allocation2 + $0x10] sm:$0xf] %vm855_vm2, %v834_v5 }
  0xe6   : > { %v840_v11 = vpop.permute.xlu1 %839  ;;  %v838_v45 = vpop.permute.xlu0 %837 }
  0xe7   : > { %863 = vst.msk [vmem:[#allocation2 + $0x1c] sm:$0xf] %vm855_vm2, %v840_v11  ;;  %862 = vst.msk [vmem:[#allocation2 + $0x18] sm:$0xf] %vm855_vm2, %v838_v45 }
  0xea   : > { %v999_v9 = vpop.permute.xlu1 %998  ;;  %v997_v43 = vpop.permute.xlu0 %996 }
  0xeb   : > { %1024 = vst.msk [vmem:[#allocation2 + $0x14] sm:$0xf] %vm1018_vm5, %v999_v9  ;;  %1023 = vst.msk [vmem:[#allocation2 + $0x10] sm:$0xf] %vm1018_vm5, %v997_v43 }
  0xee   : > { %v1003_v49 = vpop.permute.xlu1 %1002  ;;  %v1001_v60 = vpop.permute.xlu0 %1000 }
  0xef   : > { %1026 = vst.msk [vmem:[#allocation2 + $0x1c] sm:$0xf] %vm1018_vm5, %v1003_v49  ;;  %1025 = vst.msk [vmem:[#allocation2 + $0x18] sm:$0xf] %vm1018_vm5, %v1001_v60 }
  0xf2   : > { %v1159_v59 = vpop.permute.xlu1 %1158  ;;  %v1157_v61 = vpop.permute.xlu0 %1156 }
  0xf3   : > { %1184 = vst.msk [vmem:[#allocation2 + $0x14] sm:$0xf] %vm1178_vm3, %v1159_v59  ;;  %1183 = vst.msk [vmem:[#allocation2 + $0x10] sm:$0xf] %vm1178_vm3, %v1157_v61 }
  0xf6   : > { %v1163_v46 = vpop.permute.xlu1 %1162  ;;  %v1161_v50 = vpop.permute.xlu0 %1160 }
  0xf7   : > { %1186 = vst.msk [vmem:[#allocation2 + $0x1c] sm:$0xf] %vm1178_vm3, %v1163_v46  ;;  %1185 = vst.msk [vmem:[#allocation2 + $0x18] sm:$0xf] %vm1178_vm3, %v1161_v50 }
  0xfa   : > { %v1256_v3 = vpop.permute.xlu1 %1255  ;;  %v1254_v37 = vpop.permute.xlu0 %1253 }
  0xfb   : > { %1281 = vst.msk [vmem:[#allocation2 + $0x14] sm:$0xf] %vm1275_vm4, %v1256_v3  ;;  %1280 = vst.msk [vmem:[#allocation2 + $0x10] sm:$0xf] %vm1275_vm4, %v1254_v37 }
  0xfe   : > { %v1260_v0 = vpop.permute.xlu1 %1259  ;;  %v1258_v15 = vpop.permute.xlu0 %1257 }
  0xff   : > { %1283 = vst.msk [vmem:[#allocation2 + $0x1c] sm:$0xf] %vm1275_vm4, %v1260_v0  ;;  %1282 = vst.msk [vmem:[#allocation2 + $0x18] sm:$0xf] %vm1275_vm4, %v1258_v15 }
 0x102   : > { %v1405_v40 = vpop.permute.xlu1 %1404  ;;  %v1403_v18 = vpop.permute.xlu0 %1402 }
 0x103   : > { %1430 = vst.msk [vmem:[#allocation2 + $0x14] sm:$0xf] %vm1424_vm10, %v1405_v40  ;;  %1429 = vst.msk [vmem:[#allocation2 + $0x10] sm:$0xf] %vm1424_vm10, %v1403_v18 }
 0x106   : > { %v1409_v32 = vpop.permute.xlu1 %1408  ;;  %v1407_v20 = vpop.permute.xlu0 %1406 }
 0x107   : > { %1432 = vst.msk [vmem:[#allocation2 + $0x1c] sm:$0xf] %vm1424_vm10, %v1409_v32  ;;  %1431 = vst.msk [vmem:[#allocation2 + $0x18] sm:$0xf] %vm1424_vm10, %v1407_v20 }
 0x10a   : > { %v424_v51 = vpop.permute.xlu1 %423  ;;  %v422_v10 = vpop.permute.xlu0 %421  ;;  %v2008_v41 = vld [vmem:[#allocation2 + $0x10] sm:$0xff]  }
 0x10b   : > { %445 = vst.msk [vmem:[#allocation2 + $0x24] sm:$0xf] %vm435_vm9, %v424_v51  ;;  %444 = vst.msk [vmem:[#allocation2 + $0x20] sm:$0xf] %vm435_vm9, %v422_v10  ;;  %1957 = vmatmul.mubr.msk.bf16.gmra.mxu0 %vm1506_vm7, %v2008_v41 }
 0x10e   : > { %v587_v58 = vpop.permute.xlu1 %586  ;;  %v585_v25 = vpop.permute.xlu0 %584  ;;  %v2009_v19 = vld [vmem:[#allocation2 + $0x18] sm:$0xff]  }
 0x10f   : > { %608 = vst.msk [vmem:[#allocation2 + $0x24] sm:$0xf] %vm598_vm12, %v587_v58  ;;  %607 = vst.msk [vmem:[#allocation2 + $0x20] sm:$0xf] %vm598_vm12, %v585_v25  ;;  %1961 = vmatmul.mubr.msk.bf16.vlgmr.msra.gmra.mxu1 %vm1506_vm7, %v2009_v19 }
 0x110   : > { %1964 = vmatprep.mubr.msk.bf16.mxu1 %vm2028_vm13, %v2027_v63 }
 0x112   : > { %v747_v12 = vpop.permute.xlu1 %746  ;;  %v745_v2 = vpop.permute.xlu0 %744 }
 0x113   : > { %768 = vst.msk [vmem:[#allocation2 + $0x24] sm:$0xf] %vm758_vm15, %v747_v12  ;;  %767 = vst.msk [vmem:[#allocation2 + $0x20] sm:$0xf] %vm758_vm15, %v745_v2 }
 0x116   : > { %v844_v14 = vpop.permute.xlu1 %843  ;;  %v842_v30 = vpop.permute.xlu0 %841 }
 0x117   : > { %865 = vst.msk [vmem:[#allocation2 + $0x24] sm:$0xf] %vm855_vm2, %v844_v14  ;;  %864 = vst.msk [vmem:[#allocation2 + $0x20] sm:$0xf] %vm855_vm2, %v842_v30 }
 0x11a   : > { %v1007_v54 = vpop.permute.xlu1 %1006  ;;  %v1005_v21 = vpop.permute.xlu0 %1004 }
 0x11b   : > { %1028 = vst.msk [vmem:[#allocation2 + $0x24] sm:$0xf] %vm1018_vm5, %v1007_v54  ;;  %1027 = vst.msk [vmem:[#allocation2 + $0x20] sm:$0xf] %vm1018_vm5, %v1005_v21 }
 0x11e   : > { %v1167_v47 = vpop.permute.xlu1 %1166  ;;  %v1165_v63 = vpop.permute.xlu0 %1164 }
 0x11f   : > { %1188 = vst.msk [vmem:[#allocation2 + $0x24] sm:$0xf] %vm1178_vm3, %v1167_v47  ;;  %1187 = vst.msk [vmem:[#allocation2 + $0x20] sm:$0xf] %vm1178_vm3, %v1165_v63 }
 0x122   : > { %v1264_v22 = vpop.permute.xlu1 %1263  ;;  %v1262_v52 = vpop.permute.xlu0 %1261 }
 0x123   : > { %1285 = vst.msk [vmem:[#allocation2 + $0x24] sm:$0xf] %vm1275_vm4, %v1264_v22  ;;  %1284 = vst.msk [vmem:[#allocation2 + $0x20] sm:$0xf] %vm1275_vm4, %v1262_v52 }
 0x126   : > { %v1413_v26 = vpop.permute.xlu1 %1412  ;;  %v1411_v27 = vpop.permute.xlu0 %1410 }
 0x127   : > { %1434 = vst.msk [vmem:[#allocation2 + $0x24] sm:$0xf] %vm1424_vm10, %v1413_v26  ;;  %1433 = vst.msk [vmem:[#allocation2 + $0x20] sm:$0xf] %vm1424_vm10, %v1411_v27 }
 0x12e   : > { %v2010_v29 = vld [vmem:[#allocation2 + $0x20] sm:$0xff]  }
 0x12f   : > { %1965 = vmatmul.mubr.msk.bf16.gmra.mxu1 %vm1506_vm7, %v2010_v29 }
 0x133   : > { %v1662_v31 = vpop.permute.xlu0 %1661  ;;  %v1667_v36 = vpop.permute.xlu1 %1666 }
 0x137   : > { %v1672_v55 = vpop.permute.xlu1 %1671  ;;  %v1677_v56 = vpop.permute.xlu0 %1676 }
 0x13b   : > { %v1682_v37 = vpop.permute.xlu1 %1681  ;;  %v1687_v0 = vpop.permute.xlu0 %1686 }
 0x13f   : > { %v1692_v32 = vpop.permute.xlu1 %1691  ;;  %v1697_v10 = vpop.permute.xlu0 %1696 }
 0x143   : > { %v1702_v30 = vpop.permute.xlu1 %1701  ;;  %v1707_v27 = vpop.permute.xlu0 %1706 }
 0x16f   : > { %v1560_v57 = vpop.f32.mrf.mxu0 }
 0x170   : > { %v1709_v4 = vmul.f32 %v1662_v31, %v1560_v57 }
 0x171   : > { %v1950_v16 = vpop.f32.mrf.mxu0 }
 0x172   : > { %v1735_v34 = vmul.f32 %v1709_v4, %v1560_v57 }
 0x173   : > { %v1563_v13 = vpop.f32.mrf.mxu0 }
 0x174   : > { %v1902_v24 = vpack.c.bf16 %v1563_v13, %v1560_v57  ;;  %v1710_v42 = vmul.f32 %v1667_v36, %v1563_v13 }
 0x175   : > { %v1951_v17 = vpop.f32.mrf.mxu0 }
 0x176   : > { %1903 = vst [vmem:[%s2869_s12] sm:$0xff] %v1902_v24   ;;  %v1719_v23 = vadd.f32 %v1710_v42, %v1709_v4  ;;  %v1736_v1 = vmul.f32 %v1710_v42, %v1563_v13 }
 0x178   : > { %v1745_v7 = vadd.f32 %v1736_v1, %v1735_v34 }
 0x18f   : > { %v1568_v38 = vpop.f32.mrf.mxu0 }
 0x190   : > { %v1711_v39 = vmul.f32 %v1672_v55, %v1568_v38 }
 0x191   : > { %v1954_v35 = vpop.f32.mrf.mxu0 }
 0x192   : > { %v1720_v44 = vadd.f32 %v1719_v23, %v1711_v39  ;;  %v1737_v62 = vmul.f32 %v1711_v39, %v1568_v38 }
 0x193   : > { %v1571_v8 = vpop.f32.mrf.mxu0 }
 0x194   : > { %v1746_v28 = vadd.f32 %v1745_v7, %v1737_v62  ;;  %v1907_v53 = vpack.c.bf16 %v1571_v8, %v1568_v38  ;;  %v1712_v48 = vmul.f32 %v1677_v56, %v1571_v8 }
 0x195   : > { %v1955_v33 = vpop.f32.mrf.mxu0 }
 0x196   : > { %1924 = vst [vmem:[%s2869_s12 + $0x8] sm:$0xff] %v1907_v53   ;;  %v1721_v6 = vadd.f32 %v1720_v44, %v1712_v48  ;;  %v1738_v5 = vmul.f32 %v1712_v48, %v1571_v8 }
 0x198   : > { %v1747_v11 = vadd.f32 %v1746_v28, %v1738_v5 }
 0x1cb   : > { %v1576_v45 = vpop.f32.mrf.mxu0 }
 0x1cc   : > { %v1713_v15 = vmul.f32 %v1682_v37, %v1576_v45 }
 0x1cd   : > { %v1958_v9 = vpop.f32.mrf.mxu0 }
 0x1ce   : > { %v1739_v18 = vmul.f32 %v1713_v15, %v1576_v45  ;;  %v1722_v20 = vadd.f32 %v1721_v6, %v1713_v15 }
 0x1cf   : > { %v1579_v43 = vpop.f32.mrf.mxu0  ;;  %v1584_v49 = vpop.f32.mrf.mxu1 }
 0x1d0   : > { %v1912_v60 = vpack.c.bf16 %v1579_v43, %v1576_v45  ;;  %v1714_v40 = vmul.f32 %v1687_v0, %v1579_v43  ;;  %v1748_v41 = vadd.f32 %v1747_v11, %v1739_v18  ;;  %v1715_v25 = vmul.f32 %v1692_v32, %v1584_v49 }
 0x1d1   : > { %v1959_v59 = vpop.f32.mrf.mxu0  ;;  %v1962_v61 = vpop.f32.mrf.mxu1 }
 0x1d2   : > { %1925 = vst [vmem:[%s2869_s12 + $0x10] sm:$0xff] %v1912_v60   ;;  %v1740_v51 = vmul.f32 %v1714_v40, %v1579_v43  ;;  %v1723_v58 = vadd.f32 %v1722_v20, %v1714_v40  ;;  %v1741_v14 = vmul.f32 %v1715_v25, %v1584_v49 }
 0x1d3   : > { %v1587_v46 = vpop.f32.mrf.mxu1 }
 0x1d4   : > { %v1917_v50 = vpack.c.bf16 %v1587_v46, %v1584_v49  ;;  %v1749_v19 = vadd.f32 %v1748_v41, %v1740_v51  ;;  %v1716_v12 = vmul.f32 %v1697_v10, %v1587_v46  ;;  %v1724_v2 = vadd.f32 %v1723_v58, %v1715_v25 }
 0x1d5   : > { %v1963_v3 = vpop.f32.mrf.mxu1 }
 0x1d6   : > { %1926 = vst [vmem:[%s2869_s12 + $0x18] sm:$0xff] %v1917_v50   ;;  %v1750_v21 = vadd.f32 %v1749_v19, %v1741_v14  ;;  %v1742_v47 = vmul.f32 %v1716_v12, %v1587_v46  ;;  %v1725_v52 = vadd.f32 %v1724_v2, %v1716_v12 }
 0x1d8   : > { %v1751_v31 = vadd.f32 %v1750_v21, %v1742_v47 }
 0x1ef   : > { %v1592_v54 = vpop.f32.mrf.mxu1 }
 0x1f0   : > { %v1717_v63 = vmul.f32 %v1702_v30, %v1592_v54 }
 0x1f1   : > { %v1966_v22 = vpop.f32.mrf.mxu1 }
 0x1f2   : > { %v1743_v26 = vmul.f32 %v1717_v63, %v1592_v54  ;;  %v1726_v57 = vadd.f32 %v1725_v52, %v1717_v63 }
 0x1f3   : > { %v1595_v29 = vpop.f32.mrf.mxu1 }
 0x1f4   : > { %v1922_v16 = vpack.c.bf16 %v1595_v29, %v1592_v54  ;;  %v1718_v36 = vmul.f32 %v1707_v27, %v1595_v29  ;;  %v1752_v13 = vadd.f32 %v1751_v31, %v1743_v26 }
 0x1f5   : > { %v1967_v4 = vpop.f32.mrf.mxu1 }
 0x1f6   : > { %1927 = vst [vmem:[%s2869_s12 + $0x20] sm:$0xff] %v1922_v16   ;;  %v1727_v24 = vadd.f32 %v1726_v57, %v1718_v36  ;;  %v1744_v42 = vmul.f32 %v1718_v36, %v1595_v29 }
 0x1f8   : > { %v1728_v17 = vrot.slane %v1727_v24, 4  ;;  %v1753_v34 = vadd.f32 %v1752_v13, %v1744_v42 }
 0x1fa   : > { %v1729_v23 = vadd.f32 %v1728_v17, %v1727_v24  ;;  %v1754_v1 = vrot.slane %v1753_v34, 4 }
 0x1fc   : > { %v1730_v7 = vrot.slane %v1729_v23, 2  ;;  %v1755_v55 = vadd.f32 %v1754_v1, %v1753_v34 }
 0x1fe   : > { %v1731_v38 = vadd.f32 %v1730_v7, %v1729_v23  ;;  %v1756_v39 = vrot.slane %v1755_v55, 2 }
 0x200   : > { %v1732_v35 = vrot.slane %v1731_v38, 1  ;;  %v1757_v56 = vadd.f32 %v1756_v39, %v1755_v55 }
 0x202   : > { %v1758_v44 = vrot.slane %v1757_v56, 1  ;;  %v1733_v62 = vadd.f32 %v1732_v35, %v1731_v38 }
 0x204   : > { %v1759_v8 = vadd.f32 %v1758_v44, %v1757_v56 }
 0x206   : > { %v1762_v28 = vsel %vm1211_vm11, %v1733_v62, %v1759_v8 }
 0x207   : > { %1763 = vst [vmem:[%s208_s18] sm:$0x3] %v1762_v28 }
 0x208 PF: > { %s15_s15 = sadd.s32 1, %s2017_s15  }
 0x209   : > { %p12_p4 = scmp.ge.s32.totalorder %s15_s15, 4  }
 0x20b   :  { %14 = sbr.rel (!%p12_p4) target bundleno = 1 (0x1), region = 74 }

</bundles_post_ra>
